<compile_context>
chip_gen: v7x
topology: tpu7x:2x2x1
jax: 0.10.0
libtpu: 0.0.40
codegen_flags: <defaults>
</compile_context>

<pallas_src>
import jax
import jax.numpy as jnp
import numpy as np
from jax import lax
from jax.experimental import pallas as pl
from jax.experimental.pallas import tpu as pltpu

VOCAB = 50
VOCAB_PAD = 64          # embed table padded to a sublane-friendly row count (zero rows)
EMBED = 16
HIDDEN = 32
NUM_LAYERS = 2
NUM_CLASSES = 4
BATCH = 2
SEQ = 8


# ---------------------------------------------------------------------------
# Fused Pallas kernel: embedding + 2 bidirectional LSTM layers + fc
# ---------------------------------------------------------------------------
def _bilstm_fused_kernel(ids_ref, embed_ref,
                         wih0f_ref, whh0f_ref, b0f_ref,
                         wih0b_ref, whh0b_ref, b0b_ref,
                         wih1f_ref, whh1f_ref, b1f_ref,
                         wih1b_ref, whh1b_ref, b1b_ref,
                         fcw_ref, fcb_ref,
                         out_ref):
    """Whole BiLSTM forward in a single kernel invocation.

    ids_ref:   (T*B, 1) int32, time-major rows (r = t*B + b)
    embed_ref: (V_pad, E)
    w_ih*:     (D_in, 4H)   w_hh*: (H, 4H)   b*: (1, 4H)   gate order [i, f, g, o]
    fcw_ref:   (2H, C)      fcb_ref: (1, C)
    out_ref:   (B, C)
    """
    TB = ids_ref.shape[0]
    B, _ = out_ref.shape
    T = TB // B
    H = whh0f_ref.shape[0]
    Vp = embed_ref.shape[0]
    f32 = jnp.float32

    # ---- embedding lookup as an exact one-hot selection matmul (time-major) ----
    ids = ids_ref[...]                                                   # (T*B, 1)
    onehot = (ids == lax.broadcasted_iota(jnp.int32, (TB, Vp), 1)).astype(f32)
    x0 = jnp.dot(onehot, embed_ref[...], preferred_element_type=f32)     # (T*B, E)

    # ---- gate nonlinearity: full-width transcendentals, hoisted lane mask ----
    lane = lax.broadcasted_iota(jnp.int32, (B, 4 * H), 1)
    tanh_lanes = (lane >= 2 * H) & (lane < 3 * H)                        # g-gate lanes

    def lstm_cell(gates, c):
        acts = jnp.where(tanh_lanes, jnp.tanh(gates), jax.nn.sigmoid(gates))
        i = acts[:, 0 * H:1 * H]
        f = acts[:, 1 * H:2 * H]
        g = acts[:, 2 * H:3 * H]
        o = acts[:, 3 * H:4 * H]
        c_new = f * c + i * g
        h_new = o * jnp.tanh(c_new)
        return h_new, c_new

    def bidir_layer(x_seq, wih_f, whh_f, b_f, wih_b, whh_b, b_b, need_seq):
        # Input projection hoisted out of the serial recurrence (no h dependence).
        gx_f = jnp.dot(x_seq, wih_f, preferred_element_type=f32) + b_f   # (T*B, 4H)
        gx_b = jnp.dot(x_seq, wih_b, preferred_element_type=f32) + b_b   # (T*B, 4H)

        h_f = c_f = h_b = c_b = jnp.zeros((B, H), f32)
        out_f = [None] * T
        out_b = [None] * T
        # Fully unrolled (T is static); fw consumes time s, bw consumes time T-1-s,
        # so the two independent latency-bound chains interleave in one loop.
        for s in range(T):
            tb = T - 1 - s
            gates_f = gx_f[s * B:(s + 1) * B, :] + jnp.dot(
                h_f, whh_f, preferred_element_type=f32)
            gates_b = gx_b[tb * B:(tb + 1) * B, :] + jnp.dot(
                h_b, whh_b, preferred_element_type=f32)
            h_f, c_f = lstm_cell(gates_f, c_f)
            h_b, c_b = lstm_cell(gates_b, c_b)
            if need_seq:
                out_f[s] = h_f
                out_b[tb] = h_b

        if need_seq:
            seq = jnp.concatenate(
                [jnp.concatenate([out_f[t], out_b[t]], axis=1) for t in range(T)],
                axis=0)                                                  # (T*B, 2H)
        else:
            seq = None
        return h_f, h_b, seq

    # Layer 0 (input E), then layer 1 (input 2H). Weight loads happen at the call
    # sites so layer-1 weights are not kept live during layer 0.
    _, _, seq0 = bidir_layer(
        x0,
        wih0f_ref[...], whh0f_ref[...], b0f_ref[...],
        wih0b_ref[...], whh0b_ref[...], b0b_ref[...],
        need_seq=True)
    h_f1, h_b1, _ = bidir_layer(
        seq0,
        wih1f_ref[...], whh1f_ref[...], b1f_ref[...],
        wih1b_ref[...], whh1b_ref[...], b1b_ref[...],
        need_seq=False)

    # h_n[-2] = last-layer forward final hidden, h_n[-1] = last-layer backward final.
    feat = jnp.concatenate([h_f1, h_b1], axis=1)                         # (B, 2H)
    out_ref[...] = jnp.dot(feat, fcw_ref[...],
                           preferred_element_type=f32) + fcb_ref[...]


# ---------------------------------------------------------------------------
# Wrapper: single pallas_call, everything resident in VMEM (<100 KB total)
# ---------------------------------------------------------------------------
def bilstm_forward(token_ids, params):
    # (B, S) -> time-major flat (S*B, 1): row r = t*B + b. Tiny int op, fuses into
    # the surrounding jit graph.
    ids_tm = token_ids.T.reshape(SEQ * BATCH, 1).astype(jnp.int32)
    vmem = pl.BlockSpec(memory_space=pltpu.MemorySpace.VMEM)
    args = (ids_tm, params['embed'],
            params['w_ih_l0_d0'], params['w_hh_l0_d0'], params['b_l0_d0'],
            params['w_ih_l0_d1'], params['w_hh_l0_d1'], params['b_l0_d1'],
            params['w_ih_l1_d0'], params['w_hh_l1_d0'], params['b_l1_d0'],
            params['w_ih_l1_d1'], params['w_hh_l1_d1'], params['b_l1_d1'],
            params['fc_w'], params['fc_b'])
    return pl.pallas_call(
        _bilstm_fused_kernel,
        out_shape=jax.ShapeDtypeStruct((BATCH, NUM_CLASSES), jnp.float32),
        in_specs=[vmem] * len(args),
        out_specs=vmem,
    )(*args)


bilstm_forward_jit = jax.jit(bilstm_forward)


# ---------------------------------------------------------------------------
# Deterministic parameter init (PyTorch LSTM-style uniform ranges)
# ---------------------------------------------------------------------------
def init_params(key):
    params = {}
    k = 1.0 / np.sqrt(HIDDEN)

    def uni(kk, shape, bound):
        return jax.random.uniform(kk, shape, jnp.float32, -bound, bound)

    keys = iter(jax.random.split(key, 1 + NUM_LAYERS * 2 * 4 + 2))
    embed = jax.random.normal(next(keys), (VOCAB, EMBED), jnp.float32)
    params['embed'] = jnp.pad(embed, ((0, VOCAB_PAD - VOCAB), (0, 0)))   # zero pad rows
    for l in range(NUM_LAYERS):
        in_feat = EMBED if l == 0 else 2 * HIDDEN
        for d in range(2):
            params[f'w_ih_l{l}_d{d}'] = uni(next(keys), (in_feat, 4 * HIDDEN), k)
            params[f'w_hh_l{l}_d{d}'] = uni(next(keys), (HIDDEN, 4 * HIDDEN), k)
            b_ih = uni(next(keys), (4 * HIDDEN,), k)
            b_hh = uni(next(keys), (4 * HIDDEN,), k)
            params[f'b_l{l}_d{d}'] = (b_ih + b_hh).reshape(1, 4 * HIDDEN)
    kf = 1.0 / np.sqrt(2 * HIDDEN)
    params['fc_w'] = uni(next(keys), (2 * HIDDEN, NUM_CLASSES), kf)
    params['fc_b'] = uni(next(keys), (NUM_CLASSES,), kf).reshape(1, NUM_CLASSES)
    return params


# ---------------------------------------------------------------------------
# Pure-JAX reference (independent path: gather + scan)
# ---------------------------------------------------------------------------
def _lstm_dir_ref(x_tm, w_ih, w_hh, b):
    _, B, _ = x_tm.shape
    H = HIDDEN

    def step(carry, x_t):
        h, c = carry
        gates = x_t @ w_ih + h @ w_hh + b
        i = jax.nn.sigmoid(gates[:, :H])
        f = jax.nn.sigmoid(gates[:, H:2 * H])
        g = jnp.tanh(gates[:, 2 * H:3 * H])
        o = jax.nn.sigmoid(gates[:, 3 * H:])
        c = f * c + i * g
        h = o * jnp.tanh(c)
        return (h, c), h

    (h, _), out = lax.scan(step, (jnp.zeros((B, H)), jnp.zeros((B, H))), x_tm)
    return out, h


def bilstm_ref(token_ids, params):
    emb = jnp.take(params['embed'], token_ids, axis=0)
    x = jnp.transpose(emb, (1, 0, 2)).astype(jnp.float32)
    h_fw = h_bw = None
    for l in range(NUM_LAYERS):
        out_f, h_fw = _lstm_dir_ref(
            x, params[f'w_ih_l{l}_d0'], params[f'w_hh_l{l}_d0'], params[f'b_l{l}_d0'])
        out_b_rev, h_bw = _lstm_dir_ref(
            x[::-1], params[f'w_ih_l{l}_d1'], params[f'w_hh_l{l}_d1'], params[f'b_l{l}_d1'])
        x = jnp.concatenate([out_f, out_b_rev[::-1]], axis=-1)
    feat = jnp.concatenate([h_fw, h_bw], axis=-1)
    return feat @ params['fc_w'] + params['fc_b']


if __name__ == "__main__":
    root = jax.random.PRNGKey(0)
    pkey, dkey = jax.random.split(root)
    params = init_params(pkey)
    token_ids = jax.random.randint(dkey, (BATCH, SEQ), 0, VOCAB, dtype=jnp.int32)

    logits = bilstm_forward_jit(token_ids, params)
    logits = jax.block_until_ready(logits)

    ref = bilstm_ref(token_ids, params)
    # Tolerance accommodates MXU f32 pass-decomposition differences between the
    # in-kernel matmuls and the XLA reference; real semantic bugs are O(0.1) here.
    np.testing.assert_allclose(np.asarray(logits), np.asarray(ref),
                               rtol=1e-3, atol=1e-3)
    assert logits.shape == (BATCH, NUM_CLASSES)
    print("KERNEL_OK")
</pallas_src>

<mosaic_0001>
module attributes {stable_mosaic.version = 11 : i64} {
  func.func @_bilstm_fused_kernel(%arg0: memref<16x1xi32, #tpu.memory_space<vmem>>, %arg1: memref<64x16xf32, #tpu.memory_space<vmem>>, %arg2: memref<16x128xf32, #tpu.memory_space<vmem>>, %arg3: memref<32x128xf32, #tpu.memory_space<vmem>>, %arg4: memref<1x128xf32, #tpu.memory_space<vmem>>, %arg5: memref<16x128xf32, #tpu.memory_space<vmem>>, %arg6: memref<32x128xf32, #tpu.memory_space<vmem>>, %arg7: memref<1x128xf32, #tpu.memory_space<vmem>>, %arg8: memref<64x128xf32, #tpu.memory_space<vmem>>, %arg9: memref<32x128xf32, #tpu.memory_space<vmem>>, %arg10: memref<1x128xf32, #tpu.memory_space<vmem>>, %arg11: memref<64x128xf32, #tpu.memory_space<vmem>>, %arg12: memref<32x128xf32, #tpu.memory_space<vmem>>, %arg13: memref<1x128xf32, #tpu.memory_space<vmem>>, %arg14: memref<64x4xf32, #tpu.memory_space<vmem>>, %arg15: memref<1x4xf32, #tpu.memory_space<vmem>>, %arg16: memref<2x4xf32, #tpu.memory_space<vmem>>) attributes {dimension_semantics = [], scalar_prefetch = 0 : i64, scratch_operands = 0 : i64, tpu.core_type = #tpu.core_type<tc>} {
    %c0 = arith.constant 0 : index
    %c0_0 = arith.constant 0 : index
    %0 = vector.load %arg0[%c0, %c0_0] : memref<16x1xi32, #tpu.memory_space<vmem>>, vector<16x1xi32>
    %1 = tpu.iota {dimensions = array<i32: 1>} : vector<16x64xi32>
    %2 = vector.broadcast %0 : vector<16x1xi32> to vector<16x64xi32>
    %3 = arith.cmpi eq, %2, %1 : vector<16x64xi32>
    %4 = arith.extui %3 : vector<16x64xi1> to vector<16x64xi32>
    %5 = arith.sitofp %4 : vector<16x64xi32> to vector<16x64xf32>
    %c0_1 = arith.constant 0 : index
    %c0_2 = arith.constant 0 : index
    %6 = vector.load %arg1[%c0_1, %c0_2] : memref<64x16xf32, #tpu.memory_space<vmem>>, vector<64x16xf32>
    %cst = arith.constant dense<0.000000e+00> : vector<16x16xf32>
    %7 = tpu.matmul %5, %6, %cst {dimension_numbers = #tpu.dot_dimension_numbers<[1], [0], [0], [1], [0, 0, 1, 1], [], []>} : vector<16x64xf32>, vector<64x16xf32>, vector<16x16xf32> -> vector<16x16xf32>
    %8 = tpu.iota {dimensions = array<i32: 1>} : vector<2x128xi32>
    %c64_i32 = arith.constant 64 : i32
    %9 = vector.broadcast %c64_i32 : i32 to vector<2x128xi32>
    %10 = arith.cmpi sge, %8, %9 : vector<2x128xi32>
    %c96_i32 = arith.constant 96 : i32
    %11 = vector.broadcast %c96_i32 : i32 to vector<2x128xi32>
    %12 = arith.cmpi slt, %8, %11 : vector<2x128xi32>
    %13 = arith.andi %10, %12 : vector<2x128xi1>
    %c0_3 = arith.constant 0 : index
    %c0_4 = arith.constant 0 : index
    %14 = vector.load %arg2[%c0_3, %c0_4] : memref<16x128xf32, #tpu.memory_space<vmem>>, vector<16x128xf32>
    %c0_5 = arith.constant 0 : index
    %c0_6 = arith.constant 0 : index
    %15 = vector.load %arg3[%c0_5, %c0_6] : memref<32x128xf32, #tpu.memory_space<vmem>>, vector<32x128xf32>
    %c0_7 = arith.constant 0 : index
    %c0_8 = arith.constant 0 : index
    %16 = vector.load %arg4[%c0_7, %c0_8] : memref<1x128xf32, #tpu.memory_space<vmem>>, vector<1x128xf32>
    %c0_9 = arith.constant 0 : index
    %c0_10 = arith.constant 0 : index
    %17 = vector.load %arg5[%c0_9, %c0_10] : memref<16x128xf32, #tpu.memory_space<vmem>>, vector<16x128xf32>
    %c0_11 = arith.constant 0 : index
    %c0_12 = arith.constant 0 : index
    %18 = vector.load %arg6[%c0_11, %c0_12] : memref<32x128xf32, #tpu.memory_space<vmem>>, vector<32x128xf32>
    %c0_13 = arith.constant 0 : index
    %c0_14 = arith.constant 0 : index
    %19 = vector.load %arg7[%c0_13, %c0_14] : memref<1x128xf32, #tpu.memory_space<vmem>>, vector<1x128xf32>
    %cst_15 = arith.constant dense<0.000000e+00> : vector<16x128xf32>
    %20 = tpu.matmul %7, %14, %cst_15 {dimension_numbers = #tpu.dot_dimension_numbers<[1], [0], [0], [1], [0, 0, 1, 1], [], []>} : vector<16x16xf32>, vector<16x128xf32>, vector<16x128xf32> -> vector<16x128xf32>
    %21 = vector.broadcast %16 : vector<1x128xf32> to vector<16x128xf32>
    %22 = arith.addf %20, %21 : vector<16x128xf32>
    %cst_16 = arith.constant dense<0.000000e+00> : vector<16x128xf32>
    %23 = tpu.matmul %7, %17, %cst_16 {dimension_numbers = #tpu.dot_dimension_numbers<[1], [0], [0], [1], [0, 0, 1, 1], [], []>} : vector<16x16xf32>, vector<16x128xf32>, vector<16x128xf32> -> vector<16x128xf32>
    %24 = vector.broadcast %19 : vector<1x128xf32> to vector<16x128xf32>
    %25 = arith.addf %23, %24 : vector<16x128xf32>
    %cst_17 = arith.constant 0.000000e+00 : f32
    %26 = vector.broadcast %cst_17 : f32 to vector<2x32xf32>
    %27 = vector.extract_strided_slice %22 {offsets = [0, 0], sizes = [2, 128], strides = [1, 1]} : vector<16x128xf32> to vector<2x128xf32>
    %cst_18 = arith.constant dense<0.000000e+00> : vector<2x128xf32>
    %28 = tpu.matmul %26, %15, %cst_18 {dimension_numbers = #tpu.dot_dimension_numbers<[1], [0], [0], [1], [0, 0, 1, 1], [], []>} : vector<2x32xf32>, vector<32x128xf32>, vector<2x128xf32> -> vector<2x128xf32>
    %29 = arith.addf %27, %28 : vector<2x128xf32>
    %30 = vector.extract_strided_slice %25 {offsets = [14, 0], sizes = [2, 128], strides = [1, 1]} : vector<16x128xf32> to vector<2x128xf32>
    %cst_19 = arith.constant dense<0.000000e+00> : vector<2x128xf32>
    %31 = tpu.matmul %26, %18, %cst_19 {dimension_numbers = #tpu.dot_dimension_numbers<[1], [0], [0], [1], [0, 0, 1, 1], [], []>} : vector<2x32xf32>, vector<32x128xf32>, vector<2x128xf32> -> vector<2x128xf32>
    %32 = arith.addf %30, %31 : vector<2x128xf32>
    %33 = math.tanh %29 : vector<2x128xf32>
    %34 = arith.negf %29 : vector<2x128xf32>
    %35 = math.exp %34 : vector<2x128xf32>
    %cst_20 = arith.constant 1.000000e+00 : f32
    %36 = vector.broadcast %cst_20 : f32 to vector<2x128xf32>
    %37 = arith.addf %36, %35 : vector<2x128xf32>
    %38 = arith.divf %36, %37 : vector<2x128xf32>
    %39 = arith.select %13, %33, %38 : vector<2x128xi1>, vector<2x128xf32>
    %40 = vector.extract_strided_slice %39 {offsets = [0, 0], sizes = [2, 32], strides = [1, 1]} : vector<2x128xf32> to vector<2x32xf32>
    %41 = vector.extract_strided_slice %39 {offsets = [0, 32], sizes = [2, 32], strides = [1, 1]} : vector<2x128xf32> to vector<2x32xf32>
    %42 = vector.extract_strided_slice %39 {offsets = [0, 64], sizes = [2, 32], strides = [1, 1]} : vector<2x128xf32> to vector<2x32xf32>
    %43 = vector.extract_strided_slice %39 {offsets = [0, 96], sizes = [2, 32], strides = [1, 1]} : vector<2x128xf32> to vector<2x32xf32>
    %44 = arith.mulf %41, %26 : vector<2x32xf32>
    %45 = arith.mulf %40, %42 : vector<2x32xf32>
    %46 = arith.addf %44, %45 : vector<2x32xf32>
    %47 = math.tanh %46 : vector<2x32xf32>
    %48 = arith.mulf %43, %47 : vector<2x32xf32>
    %49 = math.tanh %32 : vector<2x128xf32>
    %50 = arith.negf %32 : vector<2x128xf32>
    %51 = math.exp %50 : vector<2x128xf32>
    %cst_21 = arith.constant 1.000000e+00 : f32
    %52 = vector.broadcast %cst_21 : f32 to vector<2x128xf32>
    %53 = arith.addf %52, %51 : vector<2x128xf32>
    %54 = arith.divf %52, %53 : vector<2x128xf32>
    %55 = arith.select %13, %49, %54 : vector<2x128xi1>, vector<2x128xf32>
    %56 = vector.extract_strided_slice %55 {offsets = [0, 0], sizes = [2, 32], strides = [1, 1]} : vector<2x128xf32> to vector<2x32xf32>
    %57 = vector.extract_strided_slice %55 {offsets = [0, 32], sizes = [2, 32], strides = [1, 1]} : vector<2x128xf32> to vector<2x32xf32>
    %58 = vector.extract_strided_slice %55 {offsets = [0, 64], sizes = [2, 32], strides = [1, 1]} : vector<2x128xf32> to vector<2x32xf32>
    %59 = vector.extract_strided_slice %55 {offsets = [0, 96], sizes = [2, 32], strides = [1, 1]} : vector<2x128xf32> to vector<2x32xf32>
    %60 = arith.mulf %57, %26 : vector<2x32xf32>
    %61 = arith.mulf %56, %58 : vector<2x32xf32>
    %62 = arith.addf %60, %61 : vector<2x32xf32>
    %63 = math.tanh %62 : vector<2x32xf32>
    %64 = arith.mulf %59, %63 : vector<2x32xf32>
    %65 = vector.extract_strided_slice %22 {offsets = [2, 0], sizes = [2, 128], strides = [1, 1]} : vector<16x128xf32> to vector<2x128xf32>
    %cst_22 = arith.constant dense<0.000000e+00> : vector<2x128xf32>
    %66 = tpu.matmul %48, %15, %cst_22 {dimension_numbers = #tpu.dot_dimension_numbers<[1], [0], [0], [1], [0, 0, 1, 1], [], []>} : vector<2x32xf32>, vector<32x128xf32>, vector<2x128xf32> -> vector<2x128xf32>
    %67 = arith.addf %65, %66 : vector<2x128xf32>
    %68 = vector.extract_strided_slice %25 {offsets = [12, 0], sizes = [2, 128], strides = [1, 1]} : vector<16x128xf32> to vector<2x128xf32>
    %cst_23 = arith.constant dense<0.000000e+00> : vector<2x128xf32>
    %69 = tpu.matmul %64, %18, %cst_23 {dimension_numbers = #tpu.dot_dimension_numbers<[1], [0], [0], [1], [0, 0, 1, 1], [], []>} : vector<2x32xf32>, vector<32x128xf32>, vector<2x128xf32> -> vector<2x128xf32>
    %70 = arith.addf %68, %69 : vector<2x128xf32>
    %71 = math.tanh %67 : vector<2x128xf32>
    %72 = arith.negf %67 : vector<2x128xf32>
    %73 = math.exp %72 : vector<2x128xf32>
    %cst_24 = arith.constant 1.000000e+00 : f32
    %74 = vector.broadcast %cst_24 : f32 to vector<2x128xf32>
    %75 = arith.addf %74, %73 : vector<2x128xf32>
    %76 = arith.divf %74, %75 : vector<2x128xf32>
    %77 = arith.select %13, %71, %76 : vector<2x128xi1>, vector<2x128xf32>
    %78 = vector.extract_strided_slice %77 {offsets = [0, 0], sizes = [2, 32], strides = [1, 1]} : vector<2x128xf32> to vector<2x32xf32>
    %79 = vector.extract_strided_slice %77 {offsets = [0, 32], sizes = [2, 32], strides = [1, 1]} : vector<2x128xf32> to vector<2x32xf32>
    %80 = vector.extract_strided_slice %77 {offsets = [0, 64], sizes = [2, 32], strides = [1, 1]} : vector<2x128xf32> to vector<2x32xf32>
    %81 = vector.extract_strided_slice %77 {offsets = [0, 96], sizes = [2, 32], strides = [1, 1]} : vector<2x128xf32> to vector<2x32xf32>
    %82 = arith.mulf %79, %46 : vector<2x32xf32>
    %83 = arith.mulf %78, %80 : vector<2x32xf32>
    %84 = arith.addf %82, %83 : vector<2x32xf32>
    %85 = math.tanh %84 : vector<2x32xf32>
    %86 = arith.mulf %81, %85 : vector<2x32xf32>
    %87 = math.tanh %70 : vector<2x128xf32>
    %88 = arith.negf %70 : vector<2x128xf32>
    %89 = math.exp %88 : vector<2x128xf32>
    %cst_25 = arith.constant 1.000000e+00 : f32
    %90 = vector.broadcast %cst_25 : f32 to vector<2x128xf32>
    %91 = arith.addf %90, %89 : vector<2x128xf32>
    %92 = arith.divf %90, %91 : vector<2x128xf32>
    %93 = arith.select %13, %87, %92 : vector<2x128xi1>, vector<2x128xf32>
    %94 = vector.extract_strided_slice %93 {offsets = [0, 0], sizes = [2, 32], strides = [1, 1]} : vector<2x128xf32> to vector<2x32xf32>
    %95 = vector.extract_strided_slice %93 {offsets = [0, 32], sizes = [2, 32], strides = [1, 1]} : vector<2x128xf32> to vector<2x32xf32>
    %96 = vector.extract_strided_slice %93 {offsets = [0, 64], sizes = [2, 32], strides = [1, 1]} : vector<2x128xf32> to vector<2x32xf32>
    %97 = vector.extract_strided_slice %93 {offsets = [0, 96], sizes = [2, 32], strides = [1, 1]} : vector<2x128xf32> to vector<2x32xf32>
    %98 = arith.mulf %95, %62 : vector<2x32xf32>
    %99 = arith.mulf %94, %96 : vector<2x32xf32>
    %100 = arith.addf %98, %99 : vector<2x32xf32>
    %101 = math.tanh %100 : vector<2x32xf32>
    %102 = arith.mulf %97, %101 : vector<2x32xf32>
    %103 = vector.extract_strided_slice %22 {offsets = [4, 0], sizes = [2, 128], strides = [1, 1]} : vector<16x128xf32> to vector<2x128xf32>
    %cst_26 = arith.constant dense<0.000000e+00> : vector<2x128xf32>
    %104 = tpu.matmul %86, %15, %cst_26 {dimension_numbers = #tpu.dot_dimension_numbers<[1], [0], [0], [1], [0, 0, 1, 1], [], []>} : vector<2x32xf32>, vector<32x128xf32>, vector<2x128xf32> -> vector<2x128xf32>
    %105 = arith.addf %103, %104 : vector<2x128xf32>
    %106 = vector.extract_strided_slice %25 {offsets = [10, 0], sizes = [2, 128], strides = [1, 1]} : vector<16x128xf32> to vector<2x128xf32>
    %cst_27 = arith.constant dense<0.000000e+00> : vector<2x128xf32>
    %107 = tpu.matmul %102, %18, %cst_27 {dimension_numbers = #tpu.dot_dimension_numbers<[1], [0], [0], [1], [0, 0, 1, 1], [], []>} : vector<2x32xf32>, vector<32x128xf32>, vector<2x128xf32> -> vector<2x128xf32>
    %108 = arith.addf %106, %107 : vector<2x128xf32>
    %109 = math.tanh %105 : vector<2x128xf32>
    %110 = arith.negf %105 : vector<2x128xf32>
    %111 = math.exp %110 : vector<2x128xf32>
    %cst_28 = arith.constant 1.000000e+00 : f32
    %112 = vector.broadcast %cst_28 : f32 to vector<2x128xf32>
    %113 = arith.addf %112, %111 : vector<2x128xf32>
    %114 = arith.divf %112, %113 : vector<2x128xf32>
    %115 = arith.select %13, %109, %114 : vector<2x128xi1>, vector<2x128xf32>
    %116 = vector.extract_strided_slice %115 {offsets = [0, 0], sizes = [2, 32], strides = [1, 1]} : vector<2x128xf32> to vector<2x32xf32>
    %117 = vector.extract_strided_slice %115 {offsets = [0, 32], sizes = [2, 32], strides = [1, 1]} : vector<2x128xf32> to vector<2x32xf32>
    %118 = vector.extract_strided_slice %115 {offsets = [0, 64], sizes = [2, 32], strides = [1, 1]} : vector<2x128xf32> to vector<2x32xf32>
    %119 = vector.extract_strided_slice %115 {offsets = [0, 96], sizes = [2, 32], strides = [1, 1]} : vector<2x128xf32> to vector<2x32xf32>
    %120 = arith.mulf %117, %84 : vector<2x32xf32>
    %121 = arith.mulf %116, %118 : vector<2x32xf32>
    %122 = arith.addf %120, %121 : vector<2x32xf32>
    %123 = math.tanh %122 : vector<2x32xf32>
    %124 = arith.mulf %119, %123 : vector<2x32xf32>
    %125 = math.tanh %108 : vector<2x128xf32>
    %126 = arith.negf %108 : vector<2x128xf32>
    %127 = math.exp %126 : vector<2x128xf32>
    %cst_29 = arith.constant 1.000000e+00 : f32
    %128 = vector.broadcast %cst_29 : f32 to vector<2x128xf32>
    %129 = arith.addf %128, %127 : vector<2x128xf32>
    %130 = arith.divf %128, %129 : vector<2x128xf32>
    %131 = arith.select %13, %125, %130 : vector<2x128xi1>, vector<2x128xf32>
    %132 = vector.extract_strided_slice %131 {offsets = [0, 0], sizes = [2, 32], strides = [1, 1]} : vector<2x128xf32> to vector<2x32xf32>
    %133 = vector.extract_strided_slice %131 {offsets = [0, 32], sizes = [2, 32], strides = [1, 1]} : vector<2x128xf32> to vector<2x32xf32>
    %134 = vector.extract_strided_slice %131 {offsets = [0, 64], sizes = [2, 32], strides = [1, 1]} : vector<2x128xf32> to vector<2x32xf32>
    %135 = vector.extract_strided_slice %131 {offsets = [0, 96], sizes = [2, 32], strides = [1, 1]} : vector<2x128xf32> to vector<2x32xf32>
    %136 = arith.mulf %133, %100 : vector<2x32xf32>
    %137 = arith.mulf %132, %134 : vector<2x32xf32>
    %138 = arith.addf %136, %137 : vector<2x32xf32>
    %139 = math.tanh %138 : vector<2x32xf32>
    %140 = arith.mulf %135, %139 : vector<2x32xf32>
    %141 = vector.extract_strided_slice %22 {offsets = [6, 0], sizes = [2, 128], strides = [1, 1]} : vector<16x128xf32> to vector<2x128xf32>
    %cst_30 = arith.constant dense<0.000000e+00> : vector<2x128xf32>
    %142 = tpu.matmul %124, %15, %cst_30 {dimension_numbers = #tpu.dot_dimension_numbers<[1], [0], [0], [1], [0, 0, 1, 1], [], []>} : vector<2x32xf32>, vector<32x128xf32>, vector<2x128xf32> -> vector<2x128xf32>
    %143 = arith.addf %141, %142 : vector<2x128xf32>
    %144 = vector.extract_strided_slice %25 {offsets = [8, 0], sizes = [2, 128], strides = [1, 1]} : vector<16x128xf32> to vector<2x128xf32>
    %cst_31 = arith.constant dense<0.000000e+00> : vector<2x128xf32>
    %145 = tpu.matmul %140, %18, %cst_31 {dimension_numbers = #tpu.dot_dimension_numbers<[1], [0], [0], [1], [0, 0, 1, 1], [], []>} : vector<2x32xf32>, vector<32x128xf32>, vector<2x128xf32> -> vector<2x128xf32>
    %146 = arith.addf %144, %145 : vector<2x128xf32>
    %147 = math.tanh %143 : vector<2x128xf32>
    %148 = arith.negf %143 : vector<2x128xf32>
    %149 = math.exp %148 : vector<2x128xf32>
    %cst_32 = arith.constant 1.000000e+00 : f32
    %150 = vector.broadcast %cst_32 : f32 to vector<2x128xf32>
    %151 = arith.addf %150, %149 : vector<2x128xf32>
    %152 = arith.divf %150, %151 : vector<2x128xf32>
    %153 = arith.select %13, %147, %152 : vector<2x128xi1>, vector<2x128xf32>
    %154 = vector.extract_strided_slice %153 {offsets = [0, 0], sizes = [2, 32], strides = [1, 1]} : vector<2x128xf32> to vector<2x32xf32>
    %155 = vector.extract_strided_slice %153 {offsets = [0, 32], sizes = [2, 32], strides = [1, 1]} : vector<2x128xf32> to vector<2x32xf32>
    %156 = vector.extract_strided_slice %153 {offsets = [0, 64], sizes = [2, 32], strides = [1, 1]} : vector<2x128xf32> to vector<2x32xf32>
    %157 = vector.extract_strided_slice %153 {offsets = [0, 96], sizes = [2, 32], strides = [1, 1]} : vector<2x128xf32> to vector<2x32xf32>
    %158 = arith.mulf %155, %122 : vector<2x32xf32>
    %159 = arith.mulf %154, %156 : vector<2x32xf32>
    %160 = arith.addf %158, %159 : vector<2x32xf32>
    %161 = math.tanh %160 : vector<2x32xf32>
    %162 = arith.mulf %157, %161 : vector<2x32xf32>
    %163 = math.tanh %146 : vector<2x128xf32>
    %164 = arith.negf %146 : vector<2x128xf32>
    %165 = math.exp %164 : vector<2x128xf32>
    %cst_33 = arith.constant 1.000000e+00 : f32
    %166 = vector.broadcast %cst_33 : f32 to vector<2x128xf32>
    %167 = arith.addf %166, %165 : vector<2x128xf32>
    %168 = arith.divf %166, %167 : vector<2x128xf32>
    %169 = arith.select %13, %163, %168 : vector<2x128xi1>, vector<2x128xf32>
    %170 = vector.extract_strided_slice %169 {offsets = [0, 0], sizes = [2, 32], strides = [1, 1]} : vector<2x128xf32> to vector<2x32xf32>
    %171 = vector.extract_strided_slice %169 {offsets = [0, 32], sizes = [2, 32], strides = [1, 1]} : vector<2x128xf32> to vector<2x32xf32>
    %172 = vector.extract_strided_slice %169 {offsets = [0, 64], sizes = [2, 32], strides = [1, 1]} : vector<2x128xf32> to vector<2x32xf32>
    %173 = vector.extract_strided_slice %169 {offsets = [0, 96], sizes = [2, 32], strides = [1, 1]} : vector<2x128xf32> to vector<2x32xf32>
    %174 = arith.mulf %171, %138 : vector<2x32xf32>
    %175 = arith.mulf %170, %172 : vector<2x32xf32>
    %176 = arith.addf %174, %175 : vector<2x32xf32>
    %177 = math.tanh %176 : vector<2x32xf32>
    %178 = arith.mulf %173, %177 : vector<2x32xf32>
    %179 = vector.extract_strided_slice %22 {offsets = [8, 0], sizes = [2, 128], strides = [1, 1]} : vector<16x128xf32> to vector<2x128xf32>
    %cst_34 = arith.constant dense<0.000000e+00> : vector<2x128xf32>
    %180 = tpu.matmul %162, %15, %cst_34 {dimension_numbers = #tpu.dot_dimension_numbers<[1], [0], [0], [1], [0, 0, 1, 1], [], []>} : vector<2x32xf32>, vector<32x128xf32>, vector<2x128xf32> -> vector<2x128xf32>
    %181 = arith.addf %179, %180 : vector<2x128xf32>
    %182 = vector.extract_strided_slice %25 {offsets = [6, 0], sizes = [2, 128], strides = [1, 1]} : vector<16x128xf32> to vector<2x128xf32>
    %cst_35 = arith.constant dense<0.000000e+00> : vector<2x128xf32>
    %183 = tpu.matmul %178, %18, %cst_35 {dimension_numbers = #tpu.dot_dimension_numbers<[1], [0], [0], [1], [0, 0, 1, 1], [], []>} : vector<2x32xf32>, vector<32x128xf32>, vector<2x128xf32> -> vector<2x128xf32>
    %184 = arith.addf %182, %183 : vector<2x128xf32>
    %185 = math.tanh %181 : vector<2x128xf32>
    %186 = arith.negf %181 : vector<2x128xf32>
    %187 = math.exp %186 : vector<2x128xf32>
    %cst_36 = arith.constant 1.000000e+00 : f32
    %188 = vector.broadcast %cst_36 : f32 to vector<2x128xf32>
    %189 = arith.addf %188, %187 : vector<2x128xf32>
    %190 = arith.divf %188, %189 : vector<2x128xf32>
    %191 = arith.select %13, %185, %190 : vector<2x128xi1>, vector<2x128xf32>
    %192 = vector.extract_strided_slice %191 {offsets = [0, 0], sizes = [2, 32], strides = [1, 1]} : vector<2x128xf32> to vector<2x32xf32>
    %193 = vector.extract_strided_slice %191 {offsets = [0, 32], sizes = [2, 32], strides = [1, 1]} : vector<2x128xf32> to vector<2x32xf32>
    %194 = vector.extract_strided_slice %191 {offsets = [0, 64], sizes = [2, 32], strides = [1, 1]} : vector<2x128xf32> to vector<2x32xf32>
    %195 = vector.extract_strided_slice %191 {offsets = [0, 96], sizes = [2, 32], strides = [1, 1]} : vector<2x128xf32> to vector<2x32xf32>
    %196 = arith.mulf %193, %160 : vector<2x32xf32>
    %197 = arith.mulf %192, %194 : vector<2x32xf32>
    %198 = arith.addf %196, %197 : vector<2x32xf32>
    %199 = math.tanh %198 : vector<2x32xf32>
    %200 = arith.mulf %195, %199 : vector<2x32xf32>
    %201 = math.tanh %184 : vector<2x128xf32>
    %202 = arith.negf %184 : vector<2x128xf32>
    %203 = math.exp %202 : vector<2x128xf32>
    %cst_37 = arith.constant 1.000000e+00 : f32
    %204 = vector.broadcast %cst_37 : f32 to vector<2x128xf32>
    %205 = arith.addf %204, %203 : vector<2x128xf32>
    %206 = arith.divf %204, %205 : vector<2x128xf32>
    %207 = arith.select %13, %201, %206 : vector<2x128xi1>, vector<2x128xf32>
    %208 = vector.extract_strided_slice %207 {offsets = [0, 0], sizes = [2, 32], strides = [1, 1]} : vector<2x128xf32> to vector<2x32xf32>
    %209 = vector.extract_strided_slice %207 {offsets = [0, 32], sizes = [2, 32], strides = [1, 1]} : vector<2x128xf32> to vector<2x32xf32>
    %210 = vector.extract_strided_slice %207 {offsets = [0, 64], sizes = [2, 32], strides = [1, 1]} : vector<2x128xf32> to vector<2x32xf32>
    %211 = vector.extract_strided_slice %207 {offsets = [0, 96], sizes = [2, 32], strides = [1, 1]} : vector<2x128xf32> to vector<2x32xf32>
    %212 = arith.mulf %209, %176 : vector<2x32xf32>
    %213 = arith.mulf %208, %210 : vector<2x32xf32>
    %214 = arith.addf %212, %213 : vector<2x32xf32>
    %215 = math.tanh %214 : vector<2x32xf32>
    %216 = arith.mulf %211, %215 : vector<2x32xf32>
    %217 = vector.extract_strided_slice %22 {offsets = [10, 0], sizes = [2, 128], strides = [1, 1]} : vector<16x128xf32> to vector<2x128xf32>
    %cst_38 = arith.constant dense<0.000000e+00> : vector<2x128xf32>
    %218 = tpu.matmul %200, %15, %cst_38 {dimension_numbers = #tpu.dot_dimension_numbers<[1], [0], [0], [1], [0, 0, 1, 1], [], []>} : vector<2x32xf32>, vector<32x128xf32>, vector<2x128xf32> -> vector<2x128xf32>
    %219 = arith.addf %217, %218 : vector<2x128xf32>
    %220 = vector.extract_strided_slice %25 {offsets = [4, 0], sizes = [2, 128], strides = [1, 1]} : vector<16x128xf32> to vector<2x128xf32>
    %cst_39 = arith.constant dense<0.000000e+00> : vector<2x128xf32>
    %221 = tpu.matmul %216, %18, %cst_39 {dimension_numbers = #tpu.dot_dimension_numbers<[1], [0], [0], [1], [0, 0, 1, 1], [], []>} : vector<2x32xf32>, vector<32x128xf32>, vector<2x128xf32> -> vector<2x128xf32>
    %222 = arith.addf %220, %221 : vector<2x128xf32>
    %223 = math.tanh %219 : vector<2x128xf32>
    %224 = arith.negf %219 : vector<2x128xf32>
    %225 = math.exp %224 : vector<2x128xf32>
    %cst_40 = arith.constant 1.000000e+00 : f32
    %226 = vector.broadcast %cst_40 : f32 to vector<2x128xf32>
    %227 = arith.addf %226, %225 : vector<2x128xf32>
    %228 = arith.divf %226, %227 : vector<2x128xf32>
    %229 = arith.select %13, %223, %228 : vector<2x128xi1>, vector<2x128xf32>
    %230 = vector.extract_strided_slice %229 {offsets = [0, 0], sizes = [2, 32], strides = [1, 1]} : vector<2x128xf32> to vector<2x32xf32>
    %231 = vector.extract_strided_slice %229 {offsets = [0, 32], sizes = [2, 32], strides = [1, 1]} : vector<2x128xf32> to vector<2x32xf32>
    %232 = vector.extract_strided_slice %229 {offsets = [0, 64], sizes = [2, 32], strides = [1, 1]} : vector<2x128xf32> to vector<2x32xf32>
    %233 = vector.extract_strided_slice %229 {offsets = [0, 96], sizes = [2, 32], strides = [1, 1]} : vector<2x128xf32> to vector<2x32xf32>
    %234 = arith.mulf %231, %198 : vector<2x32xf32>
    %235 = arith.mulf %230, %232 : vector<2x32xf32>
    %236 = arith.addf %234, %235 : vector<2x32xf32>
    %237 = math.tanh %236 : vector<2x32xf32>
    %238 = arith.mulf %233, %237 : vector<2x32xf32>
    %239 = math.tanh %222 : vector<2x128xf32>
    %240 = arith.negf %222 : vector<2x128xf32>
    %241 = math.exp %240 : vector<2x128xf32>
    %cst_41 = arith.constant 1.000000e+00 : f32
    %242 = vector.broadcast %cst_41 : f32 to vector<2x128xf32>
    %243 = arith.addf %242, %241 : vector<2x128xf32>
    %244 = arith.divf %242, %243 : vector<2x128xf32>
    %245 = arith.select %13, %239, %244 : vector<2x128xi1>, vector<2x128xf32>
    %246 = vector.extract_strided_slice %245 {offsets = [0, 0], sizes = [2, 32], strides = [1, 1]} : vector<2x128xf32> to vector<2x32xf32>
    %247 = vector.extract_strided_slice %245 {offsets = [0, 32], sizes = [2, 32], strides = [1, 1]} : vector<2x128xf32> to vector<2x32xf32>
    %248 = vector.extract_strided_slice %245 {offsets = [0, 64], sizes = [2, 32], strides = [1, 1]} : vector<2x128xf32> to vector<2x32xf32>
    %249 = vector.extract_strided_slice %245 {offsets = [0, 96], sizes = [2, 32], strides = [1, 1]} : vector<2x128xf32> to vector<2x32xf32>
    %250 = arith.mulf %247, %214 : vector<2x32xf32>
    %251 = arith.mulf %246, %248 : vector<2x32xf32>
    %252 = arith.addf %250, %251 : vector<2x32xf32>
    %253 = math.tanh %252 : vector<2x32xf32>
    %254 = arith.mulf %249, %253 : vector<2x32xf32>
    %255 = vector.extract_strided_slice %22 {offsets = [12, 0], sizes = [2, 128], strides = [1, 1]} : vector<16x128xf32> to vector<2x128xf32>
    %cst_42 = arith.constant dense<0.000000e+00> : vector<2x128xf32>
    %256 = tpu.matmul %238, %15, %cst_42 {dimension_numbers = #tpu.dot_dimension_numbers<[1], [0], [0], [1], [0, 0, 1, 1], [], []>} : vector<2x32xf32>, vector<32x128xf32>, vector<2x128xf32> -> vector<2x128xf32>
    %257 = arith.addf %255, %256 : vector<2x128xf32>
    %258 = vector.extract_strided_slice %25 {offsets = [2, 0], sizes = [2, 128], strides = [1, 1]} : vector<16x128xf32> to vector<2x128xf32>
    %cst_43 = arith.constant dense<0.000000e+00> : vector<2x128xf32>
    %259 = tpu.matmul %254, %18, %cst_43 {dimension_numbers = #tpu.dot_dimension_numbers<[1], [0], [0], [1], [0, 0, 1, 1], [], []>} : vector<2x32xf32>, vector<32x128xf32>, vector<2x128xf32> -> vector<2x128xf32>
    %260 = arith.addf %258, %259 : vector<2x128xf32>
    %261 = math.tanh %257 : vector<2x128xf32>
    %262 = arith.negf %257 : vector<2x128xf32>
    %263 = math.exp %262 : vector<2x128xf32>
    %cst_44 = arith.constant 1.000000e+00 : f32
    %264 = vector.broadcast %cst_44 : f32 to vector<2x128xf32>
    %265 = arith.addf %264, %263 : vector<2x128xf32>
    %266 = arith.divf %264, %265 : vector<2x128xf32>
    %267 = arith.select %13, %261, %266 : vector<2x128xi1>, vector<2x128xf32>
    %268 = vector.extract_strided_slice %267 {offsets = [0, 0], sizes = [2, 32], strides = [1, 1]} : vector<2x128xf32> to vector<2x32xf32>
    %269 = vector.extract_strided_slice %267 {offsets = [0, 32], sizes = [2, 32], strides = [1, 1]} : vector<2x128xf32> to vector<2x32xf32>
    %270 = vector.extract_strided_slice %267 {offsets = [0, 64], sizes = [2, 32], strides = [1, 1]} : vector<2x128xf32> to vector<2x32xf32>
    %271 = vector.extract_strided_slice %267 {offsets = [0, 96], sizes = [2, 32], strides = [1, 1]} : vector<2x128xf32> to vector<2x32xf32>
    %272 = arith.mulf %269, %236 : vector<2x32xf32>
    %273 = arith.mulf %268, %270 : vector<2x32xf32>
    %274 = arith.addf %272, %273 : vector<2x32xf32>
    %275 = math.tanh %274 : vector<2x32xf32>
    %276 = arith.mulf %271, %275 : vector<2x32xf32>
    %277 = math.tanh %260 : vector<2x128xf32>
    %278 = arith.negf %260 : vector<2x128xf32>
    %279 = math.exp %278 : vector<2x128xf32>
    %cst_45 = arith.constant 1.000000e+00 : f32
    %280 = vector.broadcast %cst_45 : f32 to vector<2x128xf32>
    %281 = arith.addf %280, %279 : vector<2x128xf32>
    %282 = arith.divf %280, %281 : vector<2x128xf32>
    %283 = arith.select %13, %277, %282 : vector<2x128xi1>, vector<2x128xf32>
    %284 = vector.extract_strided_slice %283 {offsets = [0, 0], sizes = [2, 32], strides = [1, 1]} : vector<2x128xf32> to vector<2x32xf32>
    %285 = vector.extract_strided_slice %283 {offsets = [0, 32], sizes = [2, 32], strides = [1, 1]} : vector<2x128xf32> to vector<2x32xf32>
    %286 = vector.extract_strided_slice %283 {offsets = [0, 64], sizes = [2, 32], strides = [1, 1]} : vector<2x128xf32> to vector<2x32xf32>
    %287 = vector.extract_strided_slice %283 {offsets = [0, 96], sizes = [2, 32], strides = [1, 1]} : vector<2x128xf32> to vector<2x32xf32>
    %288 = arith.mulf %285, %252 : vector<2x32xf32>
    %289 = arith.mulf %284, %286 : vector<2x32xf32>
    %290 = arith.addf %288, %289 : vector<2x32xf32>
    %291 = math.tanh %290 : vector<2x32xf32>
    %292 = arith.mulf %287, %291 : vector<2x32xf32>
    %293 = vector.extract_strided_slice %22 {offsets = [14, 0], sizes = [2, 128], strides = [1, 1]} : vector<16x128xf32> to vector<2x128xf32>
    %cst_46 = arith.constant dense<0.000000e+00> : vector<2x128xf32>
    %294 = tpu.matmul %276, %15, %cst_46 {dimension_numbers = #tpu.dot_dimension_numbers<[1], [0], [0], [1], [0, 0, 1, 1], [], []>} : vector<2x32xf32>, vector<32x128xf32>, vector<2x128xf32> -> vector<2x128xf32>
    %295 = arith.addf %293, %294 : vector<2x128xf32>
    %296 = vector.extract_strided_slice %25 {offsets = [0, 0], sizes = [2, 128], strides = [1, 1]} : vector<16x128xf32> to vector<2x128xf32>
    %cst_47 = arith.constant dense<0.000000e+00> : vector<2x128xf32>
    %297 = tpu.matmul %292, %18, %cst_47 {dimension_numbers = #tpu.dot_dimension_numbers<[1], [0], [0], [1], [0, 0, 1, 1], [], []>} : vector<2x32xf32>, vector<32x128xf32>, vector<2x128xf32> -> vector<2x128xf32>
    %298 = arith.addf %296, %297 : vector<2x128xf32>
    %299 = math.tanh %295 : vector<2x128xf32>
    %300 = arith.negf %295 : vector<2x128xf32>
    %301 = math.exp %300 : vector<2x128xf32>
    %cst_48 = arith.constant 1.000000e+00 : f32
    %302 = vector.broadcast %cst_48 : f32 to vector<2x128xf32>
    %303 = arith.addf %302, %301 : vector<2x128xf32>
    %304 = arith.divf %302, %303 : vector<2x128xf32>
    %305 = arith.select %13, %299, %304 : vector<2x128xi1>, vector<2x128xf32>
    %306 = vector.extract_strided_slice %305 {offsets = [0, 0], sizes = [2, 32], strides = [1, 1]} : vector<2x128xf32> to vector<2x32xf32>
    %307 = vector.extract_strided_slice %305 {offsets = [0, 32], sizes = [2, 32], strides = [1, 1]} : vector<2x128xf32> to vector<2x32xf32>
    %308 = vector.extract_strided_slice %305 {offsets = [0, 64], sizes = [2, 32], strides = [1, 1]} : vector<2x128xf32> to vector<2x32xf32>
    %309 = vector.extract_strided_slice %305 {offsets = [0, 96], sizes = [2, 32], strides = [1, 1]} : vector<2x128xf32> to vector<2x32xf32>
    %310 = arith.mulf %307, %274 : vector<2x32xf32>
    %311 = arith.mulf %306, %308 : vector<2x32xf32>
    %312 = arith.addf %310, %311 : vector<2x32xf32>
    %313 = math.tanh %312 : vector<2x32xf32>
    %314 = arith.mulf %309, %313 : vector<2x32xf32>
    %315 = math.tanh %298 : vector<2x128xf32>
    %316 = arith.negf %298 : vector<2x128xf32>
    %317 = math.exp %316 : vector<2x128xf32>
    %cst_49 = arith.constant 1.000000e+00 : f32
    %318 = vector.broadcast %cst_49 : f32 to vector<2x128xf32>
    %319 = arith.addf %318, %317 : vector<2x128xf32>
    %320 = arith.divf %318, %319 : vector<2x128xf32>
    %321 = arith.select %13, %315, %320 : vector<2x128xi1>, vector<2x128xf32>
    %322 = vector.extract_strided_slice %321 {offsets = [0, 0], sizes = [2, 32], strides = [1, 1]} : vector<2x128xf32> to vector<2x32xf32>
    %323 = vector.extract_strided_slice %321 {offsets = [0, 32], sizes = [2, 32], strides = [1, 1]} : vector<2x128xf32> to vector<2x32xf32>
    %324 = vector.extract_strided_slice %321 {offsets = [0, 64], sizes = [2, 32], strides = [1, 1]} : vector<2x128xf32> to vector<2x32xf32>
    %325 = vector.extract_strided_slice %321 {offsets = [0, 96], sizes = [2, 32], strides = [1, 1]} : vector<2x128xf32> to vector<2x32xf32>
    %326 = arith.mulf %323, %290 : vector<2x32xf32>
    %327 = arith.mulf %322, %324 : vector<2x32xf32>
    %328 = arith.addf %326, %327 : vector<2x32xf32>
    %329 = math.tanh %328 : vector<2x32xf32>
    %330 = arith.mulf %325, %329 : vector<2x32xf32>
    %331 = tpu.concatenate %48, %330 in 1 : vector<2x32xf32>, vector<2x32xf32> -> vector<2x64xf32>
    %332 = tpu.concatenate %86, %292 in 1 : vector<2x32xf32>, vector<2x32xf32> -> vector<2x64xf32>
    %333 = tpu.concatenate %124, %254 in 1 : vector<2x32xf32>, vector<2x32xf32> -> vector<2x64xf32>
    %334 = tpu.concatenate %162, %216 in 1 : vector<2x32xf32>, vector<2x32xf32> -> vector<2x64xf32>
    %335 = tpu.concatenate %200, %178 in 1 : vector<2x32xf32>, vector<2x32xf32> -> vector<2x64xf32>
    %336 = tpu.concatenate %238, %140 in 1 : vector<2x32xf32>, vector<2x32xf32> -> vector<2x64xf32>
    %337 = tpu.concatenate %276, %102 in 1 : vector<2x32xf32>, vector<2x32xf32> -> vector<2x64xf32>
    %338 = tpu.concatenate %314, %64 in 1 : vector<2x32xf32>, vector<2x32xf32> -> vector<2x64xf32>
    %339 = tpu.concatenate %331, %332, %333, %334, %335, %336, %337, %338 in 0 : vector<2x64xf32>, vector<2x64xf32>, vector<2x64xf32>, vector<2x64xf32>, vector<2x64xf32>, vector<2x64xf32>, vector<2x64xf32>, vector<2x64xf32> -> vector<16x64xf32>
    %c0_50 = arith.constant 0 : index
    %c0_51 = arith.constant 0 : index
    %340 = vector.load %arg8[%c0_50, %c0_51] : memref<64x128xf32, #tpu.memory_space<vmem>>, vector<64x128xf32>
    %c0_52 = arith.constant 0 : index
    %c0_53 = arith.constant 0 : index
    %341 = vector.load %arg9[%c0_52, %c0_53] : memref<32x128xf32, #tpu.memory_space<vmem>>, vector<32x128xf32>
    %c0_54 = arith.constant 0 : index
    %c0_55 = arith.constant 0 : index
    %342 = vector.load %arg10[%c0_54, %c0_55] : memref<1x128xf32, #tpu.memory_space<vmem>>, vector<1x128xf32>
    %c0_56 = arith.constant 0 : index
    %c0_57 = arith.constant 0 : index
    %343 = vector.load %arg11[%c0_56, %c0_57] : memref<64x128xf32, #tpu.memory_space<vmem>>, vector<64x128xf32>
    %c0_58 = arith.constant 0 : index
    %c0_59 = arith.constant 0 : index
    %344 = vector.load %arg12[%c0_58, %c0_59] : memref<32x128xf32, #tpu.memory_space<vmem>>, vector<32x128xf32>
    %c0_60 = arith.constant 0 : index
    %c0_61 = arith.constant 0 : index
    %345 = vector.load %arg13[%c0_60, %c0_61] : memref<1x128xf32, #tpu.memory_space<vmem>>, vector<1x128xf32>
    %cst_62 = arith.constant dense<0.000000e+00> : vector<16x128xf32>
    %346 = tpu.matmul %339, %340, %cst_62 {dimension_numbers = #tpu.dot_dimension_numbers<[1], [0], [0], [1], [0, 0, 1, 1], [], []>} : vector<16x64xf32>, vector<64x128xf32>, vector<16x128xf32> -> vector<16x128xf32>
    %347 = vector.broadcast %342 : vector<1x128xf32> to vector<16x128xf32>
    %348 = arith.addf %346, %347 : vector<16x128xf32>
    %cst_63 = arith.constant dense<0.000000e+00> : vector<16x128xf32>
    %349 = tpu.matmul %339, %343, %cst_63 {dimension_numbers = #tpu.dot_dimension_numbers<[1], [0], [0], [1], [0, 0, 1, 1], [], []>} : vector<16x64xf32>, vector<64x128xf32>, vector<16x128xf32> -> vector<16x128xf32>
    %350 = vector.broadcast %345 : vector<1x128xf32> to vector<16x128xf32>
    %351 = arith.addf %349, %350 : vector<16x128xf32>
    %cst_64 = arith.constant 0.000000e+00 : f32
    %352 = vector.broadcast %cst_64 : f32 to vector<2x32xf32>
    %353 = vector.extract_strided_slice %348 {offsets = [0, 0], sizes = [2, 128], strides = [1, 1]} : vector<16x128xf32> to vector<2x128xf32>
    %cst_65 = arith.constant dense<0.000000e+00> : vector<2x128xf32>
    %354 = tpu.matmul %352, %341, %cst_65 {dimension_numbers = #tpu.dot_dimension_numbers<[1], [0], [0], [1], [0, 0, 1, 1], [], []>} : vector<2x32xf32>, vector<32x128xf32>, vector<2x128xf32> -> vector<2x128xf32>
    %355 = arith.addf %353, %354 : vector<2x128xf32>
    %356 = vector.extract_strided_slice %351 {offsets = [14, 0], sizes = [2, 128], strides = [1, 1]} : vector<16x128xf32> to vector<2x128xf32>
    %cst_66 = arith.constant dense<0.000000e+00> : vector<2x128xf32>
    %357 = tpu.matmul %352, %344, %cst_66 {dimension_numbers = #tpu.dot_dimension_numbers<[1], [0], [0], [1], [0, 0, 1, 1], [], []>} : vector<2x32xf32>, vector<32x128xf32>, vector<2x128xf32> -> vector<2x128xf32>
    %358 = arith.addf %356, %357 : vector<2x128xf32>
    %359 = math.tanh %355 : vector<2x128xf32>
    %360 = arith.negf %355 : vector<2x128xf32>
    %361 = math.exp %360 : vector<2x128xf32>
    %cst_67 = arith.constant 1.000000e+00 : f32
    %362 = vector.broadcast %cst_67 : f32 to vector<2x128xf32>
    %363 = arith.addf %362, %361 : vector<2x128xf32>
    %364 = arith.divf %362, %363 : vector<2x128xf32>
    %365 = arith.select %13, %359, %364 : vector<2x128xi1>, vector<2x128xf32>
    %366 = vector.extract_strided_slice %365 {offsets = [0, 0], sizes = [2, 32], strides = [1, 1]} : vector<2x128xf32> to vector<2x32xf32>
    %367 = vector.extract_strided_slice %365 {offsets = [0, 32], sizes = [2, 32], strides = [1, 1]} : vector<2x128xf32> to vector<2x32xf32>
    %368 = vector.extract_strided_slice %365 {offsets = [0, 64], sizes = [2, 32], strides = [1, 1]} : vector<2x128xf32> to vector<2x32xf32>
    %369 = vector.extract_strided_slice %365 {offsets = [0, 96], sizes = [2, 32], strides = [1, 1]} : vector<2x128xf32> to vector<2x32xf32>
    %370 = arith.mulf %367, %352 : vector<2x32xf32>
    %371 = arith.mulf %366, %368 : vector<2x32xf32>
    %372 = arith.addf %370, %371 : vector<2x32xf32>
    %373 = math.tanh %372 : vector<2x32xf32>
    %374 = arith.mulf %369, %373 : vector<2x32xf32>
    %375 = math.tanh %358 : vector<2x128xf32>
    %376 = arith.negf %358 : vector<2x128xf32>
    %377 = math.exp %376 : vector<2x128xf32>
    %cst_68 = arith.constant 1.000000e+00 : f32
    %378 = vector.broadcast %cst_68 : f32 to vector<2x128xf32>
    %379 = arith.addf %378, %377 : vector<2x128xf32>
    %380 = arith.divf %378, %379 : vector<2x128xf32>
    %381 = arith.select %13, %375, %380 : vector<2x128xi1>, vector<2x128xf32>
    %382 = vector.extract_strided_slice %381 {offsets = [0, 0], sizes = [2, 32], strides = [1, 1]} : vector<2x128xf32> to vector<2x32xf32>
    %383 = vector.extract_strided_slice %381 {offsets = [0, 32], sizes = [2, 32], strides = [1, 1]} : vector<2x128xf32> to vector<2x32xf32>
    %384 = vector.extract_strided_slice %381 {offsets = [0, 64], sizes = [2, 32], strides = [1, 1]} : vector<2x128xf32> to vector<2x32xf32>
    %385 = vector.extract_strided_slice %381 {offsets = [0, 96], sizes = [2, 32], strides = [1, 1]} : vector<2x128xf32> to vector<2x32xf32>
    %386 = arith.mulf %383, %352 : vector<2x32xf32>
    %387 = arith.mulf %382, %384 : vector<2x32xf32>
    %388 = arith.addf %386, %387 : vector<2x32xf32>
    %389 = math.tanh %388 : vector<2x32xf32>
    %390 = arith.mulf %385, %389 : vector<2x32xf32>
    %391 = vector.extract_strided_slice %348 {offsets = [2, 0], sizes = [2, 128], strides = [1, 1]} : vector<16x128xf32> to vector<2x128xf32>
    %cst_69 = arith.constant dense<0.000000e+00> : vector<2x128xf32>
    %392 = tpu.matmul %374, %341, %cst_69 {dimension_numbers = #tpu.dot_dimension_numbers<[1], [0], [0], [1], [0, 0, 1, 1], [], []>} : vector<2x32xf32>, vector<32x128xf32>, vector<2x128xf32> -> vector<2x128xf32>
    %393 = arith.addf %391, %392 : vector<2x128xf32>
    %394 = vector.extract_strided_slice %351 {offsets = [12, 0], sizes = [2, 128], strides = [1, 1]} : vector<16x128xf32> to vector<2x128xf32>
    %cst_70 = arith.constant dense<0.000000e+00> : vector<2x128xf32>
    %395 = tpu.matmul %390, %344, %cst_70 {dimension_numbers = #tpu.dot_dimension_numbers<[1], [0], [0], [1], [0, 0, 1, 1], [], []>} : vector<2x32xf32>, vector<32x128xf32>, vector<2x128xf32> -> vector<2x128xf32>
    %396 = arith.addf %394, %395 : vector<2x128xf32>
    %397 = math.tanh %393 : vector<2x128xf32>
    %398 = arith.negf %393 : vector<2x128xf32>
    %399 = math.exp %398 : vector<2x128xf32>
    %cst_71 = arith.constant 1.000000e+00 : f32
    %400 = vector.broadcast %cst_71 : f32 to vector<2x128xf32>
    %401 = arith.addf %400, %399 : vector<2x128xf32>
    %402 = arith.divf %400, %401 : vector<2x128xf32>
    %403 = arith.select %13, %397, %402 : vector<2x128xi1>, vector<2x128xf32>
    %404 = vector.extract_strided_slice %403 {offsets = [0, 0], sizes = [2, 32], strides = [1, 1]} : vector<2x128xf32> to vector<2x32xf32>
    %405 = vector.extract_strided_slice %403 {offsets = [0, 32], sizes = [2, 32], strides = [1, 1]} : vector<2x128xf32> to vector<2x32xf32>
    %406 = vector.extract_strided_slice %403 {offsets = [0, 64], sizes = [2, 32], strides = [1, 1]} : vector<2x128xf32> to vector<2x32xf32>
    %407 = vector.extract_strided_slice %403 {offsets = [0, 96], sizes = [2, 32], strides = [1, 1]} : vector<2x128xf32> to vector<2x32xf32>
    %408 = arith.mulf %405, %372 : vector<2x32xf32>
    %409 = arith.mulf %404, %406 : vector<2x32xf32>
    %410 = arith.addf %408, %409 : vector<2x32xf32>
    %411 = math.tanh %410 : vector<2x32xf32>
    %412 = arith.mulf %407, %411 : vector<2x32xf32>
    %413 = math.tanh %396 : vector<2x128xf32>
    %414 = arith.negf %396 : vector<2x128xf32>
    %415 = math.exp %414 : vector<2x128xf32>
    %cst_72 = arith.constant 1.000000e+00 : f32
    %416 = vector.broadcast %cst_72 : f32 to vector<2x128xf32>
    %417 = arith.addf %416, %415 : vector<2x128xf32>
    %418 = arith.divf %416, %417 : vector<2x128xf32>
    %419 = arith.select %13, %413, %418 : vector<2x128xi1>, vector<2x128xf32>
    %420 = vector.extract_strided_slice %419 {offsets = [0, 0], sizes = [2, 32], strides = [1, 1]} : vector<2x128xf32> to vector<2x32xf32>
    %421 = vector.extract_strided_slice %419 {offsets = [0, 32], sizes = [2, 32], strides = [1, 1]} : vector<2x128xf32> to vector<2x32xf32>
    %422 = vector.extract_strided_slice %419 {offsets = [0, 64], sizes = [2, 32], strides = [1, 1]} : vector<2x128xf32> to vector<2x32xf32>
    %423 = vector.extract_strided_slice %419 {offsets = [0, 96], sizes = [2, 32], strides = [1, 1]} : vector<2x128xf32> to vector<2x32xf32>
    %424 = arith.mulf %421, %388 : vector<2x32xf32>
    %425 = arith.mulf %420, %422 : vector<2x32xf32>
    %426 = arith.addf %424, %425 : vector<2x32xf32>
    %427 = math.tanh %426 : vector<2x32xf32>
    %428 = arith.mulf %423, %427 : vector<2x32xf32>
    %429 = vector.extract_strided_slice %348 {offsets = [4, 0], sizes = [2, 128], strides = [1, 1]} : vector<16x128xf32> to vector<2x128xf32>
    %cst_73 = arith.constant dense<0.000000e+00> : vector<2x128xf32>
    %430 = tpu.matmul %412, %341, %cst_73 {dimension_numbers = #tpu.dot_dimension_numbers<[1], [0], [0], [1], [0, 0, 1, 1], [], []>} : vector<2x32xf32>, vector<32x128xf32>, vector<2x128xf32> -> vector<2x128xf32>
    %431 = arith.addf %429, %430 : vector<2x128xf32>
    %432 = vector.extract_strided_slice %351 {offsets = [10, 0], sizes = [2, 128], strides = [1, 1]} : vector<16x128xf32> to vector<2x128xf32>
    %cst_74 = arith.constant dense<0.000000e+00> : vector<2x128xf32>
    %433 = tpu.matmul %428, %344, %cst_74 {dimension_numbers = #tpu.dot_dimension_numbers<[1], [0], [0], [1], [0, 0, 1, 1], [], []>} : vector<2x32xf32>, vector<32x128xf32>, vector<2x128xf32> -> vector<2x128xf32>
    %434 = arith.addf %432, %433 : vector<2x128xf32>
    %435 = math.tanh %431 : vector<2x128xf32>
    %436 = arith.negf %431 : vector<2x128xf32>
    %437 = math.exp %436 : vector<2x128xf32>
    %cst_75 = arith.constant 1.000000e+00 : f32
    %438 = vector.broadcast %cst_75 : f32 to vector<2x128xf32>
    %439 = arith.addf %438, %437 : vector<2x128xf32>
    %440 = arith.divf %438, %439 : vector<2x128xf32>
    %441 = arith.select %13, %435, %440 : vector<2x128xi1>, vector<2x128xf32>
    %442 = vector.extract_strided_slice %441 {offsets = [0, 0], sizes = [2, 32], strides = [1, 1]} : vector<2x128xf32> to vector<2x32xf32>
    %443 = vector.extract_strided_slice %441 {offsets = [0, 32], sizes = [2, 32], strides = [1, 1]} : vector<2x128xf32> to vector<2x32xf32>
    %444 = vector.extract_strided_slice %441 {offsets = [0, 64], sizes = [2, 32], strides = [1, 1]} : vector<2x128xf32> to vector<2x32xf32>
    %445 = vector.extract_strided_slice %441 {offsets = [0, 96], sizes = [2, 32], strides = [1, 1]} : vector<2x128xf32> to vector<2x32xf32>
    %446 = arith.mulf %443, %410 : vector<2x32xf32>
    %447 = arith.mulf %442, %444 : vector<2x32xf32>
    %448 = arith.addf %446, %447 : vector<2x32xf32>
    %449 = math.tanh %448 : vector<2x32xf32>
    %450 = arith.mulf %445, %449 : vector<2x32xf32>
    %451 = math.tanh %434 : vector<2x128xf32>
    %452 = arith.negf %434 : vector<2x128xf32>
    %453 = math.exp %452 : vector<2x128xf32>
    %cst_76 = arith.constant 1.000000e+00 : f32
    %454 = vector.broadcast %cst_76 : f32 to vector<2x128xf32>
    %455 = arith.addf %454, %453 : vector<2x128xf32>
    %456 = arith.divf %454, %455 : vector<2x128xf32>
    %457 = arith.select %13, %451, %456 : vector<2x128xi1>, vector<2x128xf32>
    %458 = vector.extract_strided_slice %457 {offsets = [0, 0], sizes = [2, 32], strides = [1, 1]} : vector<2x128xf32> to vector<2x32xf32>
    %459 = vector.extract_strided_slice %457 {offsets = [0, 32], sizes = [2, 32], strides = [1, 1]} : vector<2x128xf32> to vector<2x32xf32>
    %460 = vector.extract_strided_slice %457 {offsets = [0, 64], sizes = [2, 32], strides = [1, 1]} : vector<2x128xf32> to vector<2x32xf32>
    %461 = vector.extract_strided_slice %457 {offsets = [0, 96], sizes = [2, 32], strides = [1, 1]} : vector<2x128xf32> to vector<2x32xf32>
    %462 = arith.mulf %459, %426 : vector<2x32xf32>
    %463 = arith.mulf %458, %460 : vector<2x32xf32>
    %464 = arith.addf %462, %463 : vector<2x32xf32>
    %465 = math.tanh %464 : vector<2x32xf32>
    %466 = arith.mulf %461, %465 : vector<2x32xf32>
    %467 = vector.extract_strided_slice %348 {offsets = [6, 0], sizes = [2, 128], strides = [1, 1]} : vector<16x128xf32> to vector<2x128xf32>
    %cst_77 = arith.constant dense<0.000000e+00> : vector<2x128xf32>
    %468 = tpu.matmul %450, %341, %cst_77 {dimension_numbers = #tpu.dot_dimension_numbers<[1], [0], [0], [1], [0, 0, 1, 1], [], []>} : vector<2x32xf32>, vector<32x128xf32>, vector<2x128xf32> -> vector<2x128xf32>
    %469 = arith.addf %467, %468 : vector<2x128xf32>
    %470 = vector.extract_strided_slice %351 {offsets = [8, 0], sizes = [2, 128], strides = [1, 1]} : vector<16x128xf32> to vector<2x128xf32>
    %cst_78 = arith.constant dense<0.000000e+00> : vector<2x128xf32>
    %471 = tpu.matmul %466, %344, %cst_78 {dimension_numbers = #tpu.dot_dimension_numbers<[1], [0], [0], [1], [0, 0, 1, 1], [], []>} : vector<2x32xf32>, vector<32x128xf32>, vector<2x128xf32> -> vector<2x128xf32>
    %472 = arith.addf %470, %471 : vector<2x128xf32>
    %473 = math.tanh %469 : vector<2x128xf32>
    %474 = arith.negf %469 : vector<2x128xf32>
    %475 = math.exp %474 : vector<2x128xf32>
    %cst_79 = arith.constant 1.000000e+00 : f32
    %476 = vector.broadcast %cst_79 : f32 to vector<2x128xf32>
    %477 = arith.addf %476, %475 : vector<2x128xf32>
    %478 = arith.divf %476, %477 : vector<2x128xf32>
    %479 = arith.select %13, %473, %478 : vector<2x128xi1>, vector<2x128xf32>
    %480 = vector.extract_strided_slice %479 {offsets = [0, 0], sizes = [2, 32], strides = [1, 1]} : vector<2x128xf32> to vector<2x32xf32>
    %481 = vector.extract_strided_slice %479 {offsets = [0, 32], sizes = [2, 32], strides = [1, 1]} : vector<2x128xf32> to vector<2x32xf32>
    %482 = vector.extract_strided_slice %479 {offsets = [0, 64], sizes = [2, 32], strides = [1, 1]} : vector<2x128xf32> to vector<2x32xf32>
    %483 = vector.extract_strided_slice %479 {offsets = [0, 96], sizes = [2, 32], strides = [1, 1]} : vector<2x128xf32> to vector<2x32xf32>
    %484 = arith.mulf %481, %448 : vector<2x32xf32>
    %485 = arith.mulf %480, %482 : vector<2x32xf32>
    %486 = arith.addf %484, %485 : vector<2x32xf32>
    %487 = math.tanh %486 : vector<2x32xf32>
    %488 = arith.mulf %483, %487 : vector<2x32xf32>
    %489 = math.tanh %472 : vector<2x128xf32>
    %490 = arith.negf %472 : vector<2x128xf32>
    %491 = math.exp %490 : vector<2x128xf32>
    %cst_80 = arith.constant 1.000000e+00 : f32
    %492 = vector.broadcast %cst_80 : f32 to vector<2x128xf32>
    %493 = arith.addf %492, %491 : vector<2x128xf32>
    %494 = arith.divf %492, %493 : vector<2x128xf32>
    %495 = arith.select %13, %489, %494 : vector<2x128xi1>, vector<2x128xf32>
    %496 = vector.extract_strided_slice %495 {offsets = [0, 0], sizes = [2, 32], strides = [1, 1]} : vector<2x128xf32> to vector<2x32xf32>
    %497 = vector.extract_strided_slice %495 {offsets = [0, 32], sizes = [2, 32], strides = [1, 1]} : vector<2x128xf32> to vector<2x32xf32>
    %498 = vector.extract_strided_slice %495 {offsets = [0, 64], sizes = [2, 32], strides = [1, 1]} : vector<2x128xf32> to vector<2x32xf32>
    %499 = vector.extract_strided_slice %495 {offsets = [0, 96], sizes = [2, 32], strides = [1, 1]} : vector<2x128xf32> to vector<2x32xf32>
    %500 = arith.mulf %497, %464 : vector<2x32xf32>
    %501 = arith.mulf %496, %498 : vector<2x32xf32>
    %502 = arith.addf %500, %501 : vector<2x32xf32>
    %503 = math.tanh %502 : vector<2x32xf32>
    %504 = arith.mulf %499, %503 : vector<2x32xf32>
    %505 = vector.extract_strided_slice %348 {offsets = [8, 0], sizes = [2, 128], strides = [1, 1]} : vector<16x128xf32> to vector<2x128xf32>
    %cst_81 = arith.constant dense<0.000000e+00> : vector<2x128xf32>
    %506 = tpu.matmul %488, %341, %cst_81 {dimension_numbers = #tpu.dot_dimension_numbers<[1], [0], [0], [1], [0, 0, 1, 1], [], []>} : vector<2x32xf32>, vector<32x128xf32>, vector<2x128xf32> -> vector<2x128xf32>
    %507 = arith.addf %505, %506 : vector<2x128xf32>
    %508 = vector.extract_strided_slice %351 {offsets = [6, 0], sizes = [2, 128], strides = [1, 1]} : vector<16x128xf32> to vector<2x128xf32>
    %cst_82 = arith.constant dense<0.000000e+00> : vector<2x128xf32>
    %509 = tpu.matmul %504, %344, %cst_82 {dimension_numbers = #tpu.dot_dimension_numbers<[1], [0], [0], [1], [0, 0, 1, 1], [], []>} : vector<2x32xf32>, vector<32x128xf32>, vector<2x128xf32> -> vector<2x128xf32>
    %510 = arith.addf %508, %509 : vector<2x128xf32>
    %511 = math.tanh %507 : vector<2x128xf32>
    %512 = arith.negf %507 : vector<2x128xf32>
    %513 = math.exp %512 : vector<2x128xf32>
    %cst_83 = arith.constant 1.000000e+00 : f32
    %514 = vector.broadcast %cst_83 : f32 to vector<2x128xf32>
    %515 = arith.addf %514, %513 : vector<2x128xf32>
    %516 = arith.divf %514, %515 : vector<2x128xf32>
    %517 = arith.select %13, %511, %516 : vector<2x128xi1>, vector<2x128xf32>
    %518 = vector.extract_strided_slice %517 {offsets = [0, 0], sizes = [2, 32], strides = [1, 1]} : vector<2x128xf32> to vector<2x32xf32>
    %519 = vector.extract_strided_slice %517 {offsets = [0, 32], sizes = [2, 32], strides = [1, 1]} : vector<2x128xf32> to vector<2x32xf32>
    %520 = vector.extract_strided_slice %517 {offsets = [0, 64], sizes = [2, 32], strides = [1, 1]} : vector<2x128xf32> to vector<2x32xf32>
    %521 = vector.extract_strided_slice %517 {offsets = [0, 96], sizes = [2, 32], strides = [1, 1]} : vector<2x128xf32> to vector<2x32xf32>
    %522 = arith.mulf %519, %486 : vector<2x32xf32>
    %523 = arith.mulf %518, %520 : vector<2x32xf32>
    %524 = arith.addf %522, %523 : vector<2x32xf32>
    %525 = math.tanh %524 : vector<2x32xf32>
    %526 = arith.mulf %521, %525 : vector<2x32xf32>
    %527 = math.tanh %510 : vector<2x128xf32>
    %528 = arith.negf %510 : vector<2x128xf32>
    %529 = math.exp %528 : vector<2x128xf32>
    %cst_84 = arith.constant 1.000000e+00 : f32
    %530 = vector.broadcast %cst_84 : f32 to vector<2x128xf32>
    %531 = arith.addf %530, %529 : vector<2x128xf32>
    %532 = arith.divf %530, %531 : vector<2x128xf32>
    %533 = arith.select %13, %527, %532 : vector<2x128xi1>, vector<2x128xf32>
    %534 = vector.extract_strided_slice %533 {offsets = [0, 0], sizes = [2, 32], strides = [1, 1]} : vector<2x128xf32> to vector<2x32xf32>
    %535 = vector.extract_strided_slice %533 {offsets = [0, 32], sizes = [2, 32], strides = [1, 1]} : vector<2x128xf32> to vector<2x32xf32>
    %536 = vector.extract_strided_slice %533 {offsets = [0, 64], sizes = [2, 32], strides = [1, 1]} : vector<2x128xf32> to vector<2x32xf32>
    %537 = vector.extract_strided_slice %533 {offsets = [0, 96], sizes = [2, 32], strides = [1, 1]} : vector<2x128xf32> to vector<2x32xf32>
    %538 = arith.mulf %535, %502 : vector<2x32xf32>
    %539 = arith.mulf %534, %536 : vector<2x32xf32>
    %540 = arith.addf %538, %539 : vector<2x32xf32>
    %541 = math.tanh %540 : vector<2x32xf32>
    %542 = arith.mulf %537, %541 : vector<2x32xf32>
    %543 = vector.extract_strided_slice %348 {offsets = [10, 0], sizes = [2, 128], strides = [1, 1]} : vector<16x128xf32> to vector<2x128xf32>
    %cst_85 = arith.constant dense<0.000000e+00> : vector<2x128xf32>
    %544 = tpu.matmul %526, %341, %cst_85 {dimension_numbers = #tpu.dot_dimension_numbers<[1], [0], [0], [1], [0, 0, 1, 1], [], []>} : vector<2x32xf32>, vector<32x128xf32>, vector<2x128xf32> -> vector<2x128xf32>
    %545 = arith.addf %543, %544 : vector<2x128xf32>
    %546 = vector.extract_strided_slice %351 {offsets = [4, 0], sizes = [2, 128], strides = [1, 1]} : vector<16x128xf32> to vector<2x128xf32>
    %cst_86 = arith.constant dense<0.000000e+00> : vector<2x128xf32>
    %547 = tpu.matmul %542, %344, %cst_86 {dimension_numbers = #tpu.dot_dimension_numbers<[1], [0], [0], [1], [0, 0, 1, 1], [], []>} : vector<2x32xf32>, vector<32x128xf32>, vector<2x128xf32> -> vector<2x128xf32>
    %548 = arith.addf %546, %547 : vector<2x128xf32>
    %549 = math.tanh %545 : vector<2x128xf32>
    %550 = arith.negf %545 : vector<2x128xf32>
    %551 = math.exp %550 : vector<2x128xf32>
    %cst_87 = arith.constant 1.000000e+00 : f32
    %552 = vector.broadcast %cst_87 : f32 to vector<2x128xf32>
    %553 = arith.addf %552, %551 : vector<2x128xf32>
    %554 = arith.divf %552, %553 : vector<2x128xf32>
    %555 = arith.select %13, %549, %554 : vector<2x128xi1>, vector<2x128xf32>
    %556 = vector.extract_strided_slice %555 {offsets = [0, 0], sizes = [2, 32], strides = [1, 1]} : vector<2x128xf32> to vector<2x32xf32>
    %557 = vector.extract_strided_slice %555 {offsets = [0, 32], sizes = [2, 32], strides = [1, 1]} : vector<2x128xf32> to vector<2x32xf32>
    %558 = vector.extract_strided_slice %555 {offsets = [0, 64], sizes = [2, 32], strides = [1, 1]} : vector<2x128xf32> to vector<2x32xf32>
    %559 = vector.extract_strided_slice %555 {offsets = [0, 96], sizes = [2, 32], strides = [1, 1]} : vector<2x128xf32> to vector<2x32xf32>
    %560 = arith.mulf %557, %524 : vector<2x32xf32>
    %561 = arith.mulf %556, %558 : vector<2x32xf32>
    %562 = arith.addf %560, %561 : vector<2x32xf32>
    %563 = math.tanh %562 : vector<2x32xf32>
    %564 = arith.mulf %559, %563 : vector<2x32xf32>
    %565 = math.tanh %548 : vector<2x128xf32>
    %566 = arith.negf %548 : vector<2x128xf32>
    %567 = math.exp %566 : vector<2x128xf32>
    %cst_88 = arith.constant 1.000000e+00 : f32
    %568 = vector.broadcast %cst_88 : f32 to vector<2x128xf32>
    %569 = arith.addf %568, %567 : vector<2x128xf32>
    %570 = arith.divf %568, %569 : vector<2x128xf32>
    %571 = arith.select %13, %565, %570 : vector<2x128xi1>, vector<2x128xf32>
    %572 = vector.extract_strided_slice %571 {offsets = [0, 0], sizes = [2, 32], strides = [1, 1]} : vector<2x128xf32> to vector<2x32xf32>
    %573 = vector.extract_strided_slice %571 {offsets = [0, 32], sizes = [2, 32], strides = [1, 1]} : vector<2x128xf32> to vector<2x32xf32>
    %574 = vector.extract_strided_slice %571 {offsets = [0, 64], sizes = [2, 32], strides = [1, 1]} : vector<2x128xf32> to vector<2x32xf32>
    %575 = vector.extract_strided_slice %571 {offsets = [0, 96], sizes = [2, 32], strides = [1, 1]} : vector<2x128xf32> to vector<2x32xf32>
    %576 = arith.mulf %573, %540 : vector<2x32xf32>
    %577 = arith.mulf %572, %574 : vector<2x32xf32>
    %578 = arith.addf %576, %577 : vector<2x32xf32>
    %579 = math.tanh %578 : vector<2x32xf32>
    %580 = arith.mulf %575, %579 : vector<2x32xf32>
    %581 = vector.extract_strided_slice %348 {offsets = [12, 0], sizes = [2, 128], strides = [1, 1]} : vector<16x128xf32> to vector<2x128xf32>
    %cst_89 = arith.constant dense<0.000000e+00> : vector<2x128xf32>
    %582 = tpu.matmul %564, %341, %cst_89 {dimension_numbers = #tpu.dot_dimension_numbers<[1], [0], [0], [1], [0, 0, 1, 1], [], []>} : vector<2x32xf32>, vector<32x128xf32>, vector<2x128xf32> -> vector<2x128xf32>
    %583 = arith.addf %581, %582 : vector<2x128xf32>
    %584 = vector.extract_strided_slice %351 {offsets = [2, 0], sizes = [2, 128], strides = [1, 1]} : vector<16x128xf32> to vector<2x128xf32>
    %cst_90 = arith.constant dense<0.000000e+00> : vector<2x128xf32>
    %585 = tpu.matmul %580, %344, %cst_90 {dimension_numbers = #tpu.dot_dimension_numbers<[1], [0], [0], [1], [0, 0, 1, 1], [], []>} : vector<2x32xf32>, vector<32x128xf32>, vector<2x128xf32> -> vector<2x128xf32>
    %586 = arith.addf %584, %585 : vector<2x128xf32>
    %587 = math.tanh %583 : vector<2x128xf32>
    %588 = arith.negf %583 : vector<2x128xf32>
    %589 = math.exp %588 : vector<2x128xf32>
    %cst_91 = arith.constant 1.000000e+00 : f32
    %590 = vector.broadcast %cst_91 : f32 to vector<2x128xf32>
    %591 = arith.addf %590, %589 : vector<2x128xf32>
    %592 = arith.divf %590, %591 : vector<2x128xf32>
    %593 = arith.select %13, %587, %592 : vector<2x128xi1>, vector<2x128xf32>
    %594 = vector.extract_strided_slice %593 {offsets = [0, 0], sizes = [2, 32], strides = [1, 1]} : vector<2x128xf32> to vector<2x32xf32>
    %595 = vector.extract_strided_slice %593 {offsets = [0, 32], sizes = [2, 32], strides = [1, 1]} : vector<2x128xf32> to vector<2x32xf32>
    %596 = vector.extract_strided_slice %593 {offsets = [0, 64], sizes = [2, 32], strides = [1, 1]} : vector<2x128xf32> to vector<2x32xf32>
    %597 = vector.extract_strided_slice %593 {offsets = [0, 96], sizes = [2, 32], strides = [1, 1]} : vector<2x128xf32> to vector<2x32xf32>
    %598 = arith.mulf %595, %562 : vector<2x32xf32>
    %599 = arith.mulf %594, %596 : vector<2x32xf32>
    %600 = arith.addf %598, %599 : vector<2x32xf32>
    %601 = math.tanh %600 : vector<2x32xf32>
    %602 = arith.mulf %597, %601 : vector<2x32xf32>
    %603 = math.tanh %586 : vector<2x128xf32>
    %604 = arith.negf %586 : vector<2x128xf32>
    %605 = math.exp %604 : vector<2x128xf32>
    %cst_92 = arith.constant 1.000000e+00 : f32
    %606 = vector.broadcast %cst_92 : f32 to vector<2x128xf32>
    %607 = arith.addf %606, %605 : vector<2x128xf32>
    %608 = arith.divf %606, %607 : vector<2x128xf32>
    %609 = arith.select %13, %603, %608 : vector<2x128xi1>, vector<2x128xf32>
    %610 = vector.extract_strided_slice %609 {offsets = [0, 0], sizes = [2, 32], strides = [1, 1]} : vector<2x128xf32> to vector<2x32xf32>
    %611 = vector.extract_strided_slice %609 {offsets = [0, 32], sizes = [2, 32], strides = [1, 1]} : vector<2x128xf32> to vector<2x32xf32>
    %612 = vector.extract_strided_slice %609 {offsets = [0, 64], sizes = [2, 32], strides = [1, 1]} : vector<2x128xf32> to vector<2x32xf32>
    %613 = vector.extract_strided_slice %609 {offsets = [0, 96], sizes = [2, 32], strides = [1, 1]} : vector<2x128xf32> to vector<2x32xf32>
    %614 = arith.mulf %611, %578 : vector<2x32xf32>
    %615 = arith.mulf %610, %612 : vector<2x32xf32>
    %616 = arith.addf %614, %615 : vector<2x32xf32>
    %617 = math.tanh %616 : vector<2x32xf32>
    %618 = arith.mulf %613, %617 : vector<2x32xf32>
    %619 = vector.extract_strided_slice %348 {offsets = [14, 0], sizes = [2, 128], strides = [1, 1]} : vector<16x128xf32> to vector<2x128xf32>
    %cst_93 = arith.constant dense<0.000000e+00> : vector<2x128xf32>
    %620 = tpu.matmul %602, %341, %cst_93 {dimension_numbers = #tpu.dot_dimension_numbers<[1], [0], [0], [1], [0, 0, 1, 1], [], []>} : vector<2x32xf32>, vector<32x128xf32>, vector<2x128xf32> -> vector<2x128xf32>
    %621 = arith.addf %619, %620 : vector<2x128xf32>
    %622 = vector.extract_strided_slice %351 {offsets = [0, 0], sizes = [2, 128], strides = [1, 1]} : vector<16x128xf32> to vector<2x128xf32>
    %cst_94 = arith.constant dense<0.000000e+00> : vector<2x128xf32>
    %623 = tpu.matmul %618, %344, %cst_94 {dimension_numbers = #tpu.dot_dimension_numbers<[1], [0], [0], [1], [0, 0, 1, 1], [], []>} : vector<2x32xf32>, vector<32x128xf32>, vector<2x128xf32> -> vector<2x128xf32>
    %624 = arith.addf %622, %623 : vector<2x128xf32>
    %625 = math.tanh %621 : vector<2x128xf32>
    %626 = arith.negf %621 : vector<2x128xf32>
    %627 = math.exp %626 : vector<2x128xf32>
    %cst_95 = arith.constant 1.000000e+00 : f32
    %628 = vector.broadcast %cst_95 : f32 to vector<2x128xf32>
    %629 = arith.addf %628, %627 : vector<2x128xf32>
    %630 = arith.divf %628, %629 : vector<2x128xf32>
    %631 = arith.select %13, %625, %630 : vector<2x128xi1>, vector<2x128xf32>
    %632 = vector.extract_strided_slice %631 {offsets = [0, 0], sizes = [2, 32], strides = [1, 1]} : vector<2x128xf32> to vector<2x32xf32>
    %633 = vector.extract_strided_slice %631 {offsets = [0, 32], sizes = [2, 32], strides = [1, 1]} : vector<2x128xf32> to vector<2x32xf32>
    %634 = vector.extract_strided_slice %631 {offsets = [0, 64], sizes = [2, 32], strides = [1, 1]} : vector<2x128xf32> to vector<2x32xf32>
    %635 = vector.extract_strided_slice %631 {offsets = [0, 96], sizes = [2, 32], strides = [1, 1]} : vector<2x128xf32> to vector<2x32xf32>
    %636 = arith.mulf %633, %600 : vector<2x32xf32>
    %637 = arith.mulf %632, %634 : vector<2x32xf32>
    %638 = arith.addf %636, %637 : vector<2x32xf32>
    %639 = math.tanh %638 : vector<2x32xf32>
    %640 = arith.mulf %635, %639 : vector<2x32xf32>
    %641 = math.tanh %624 : vector<2x128xf32>
    %642 = arith.negf %624 : vector<2x128xf32>
    %643 = math.exp %642 : vector<2x128xf32>
    %cst_96 = arith.constant 1.000000e+00 : f32
    %644 = vector.broadcast %cst_96 : f32 to vector<2x128xf32>
    %645 = arith.addf %644, %643 : vector<2x128xf32>
    %646 = arith.divf %644, %645 : vector<2x128xf32>
    %647 = arith.select %13, %641, %646 : vector<2x128xi1>, vector<2x128xf32>
    %648 = vector.extract_strided_slice %647 {offsets = [0, 0], sizes = [2, 32], strides = [1, 1]} : vector<2x128xf32> to vector<2x32xf32>
    %649 = vector.extract_strided_slice %647 {offsets = [0, 32], sizes = [2, 32], strides = [1, 1]} : vector<2x128xf32> to vector<2x32xf32>
    %650 = vector.extract_strided_slice %647 {offsets = [0, 64], sizes = [2, 32], strides = [1, 1]} : vector<2x128xf32> to vector<2x32xf32>
    %651 = vector.extract_strided_slice %647 {offsets = [0, 96], sizes = [2, 32], strides = [1, 1]} : vector<2x128xf32> to vector<2x32xf32>
    %652 = arith.mulf %649, %616 : vector<2x32xf32>
    %653 = arith.mulf %648, %650 : vector<2x32xf32>
    %654 = arith.addf %652, %653 : vector<2x32xf32>
    %655 = math.tanh %654 : vector<2x32xf32>
    %656 = arith.mulf %651, %655 : vector<2x32xf32>
    %657 = tpu.concatenate %640, %656 in 1 : vector<2x32xf32>, vector<2x32xf32> -> vector<2x64xf32>
    %c0_97 = arith.constant 0 : index
    %c0_98 = arith.constant 0 : index
    %658 = vector.load %arg14[%c0_97, %c0_98] : memref<64x4xf32, #tpu.memory_space<vmem>>, vector<64x4xf32>
    %cst_99 = arith.constant dense<0.000000e+00> : vector<2x4xf32>
    %659 = tpu.matmul %657, %658, %cst_99 {dimension_numbers = #tpu.dot_dimension_numbers<[1], [0], [0], [1], [0, 0, 1, 1], [], []>} : vector<2x64xf32>, vector<64x4xf32>, vector<2x4xf32> -> vector<2x4xf32>
    %c0_100 = arith.constant 0 : index
    %c0_101 = arith.constant 0 : index
    %660 = vector.load %arg15[%c0_100, %c0_101] : memref<1x4xf32, #tpu.memory_space<vmem>>, vector<1x4xf32>
    %661 = vector.broadcast %660 : vector<1x4xf32> to vector<2x4xf32>
    %662 = arith.addf %659, %661 : vector<2x4xf32>
    %c0_102 = arith.constant 0 : index
    %c0_103 = arith.constant 0 : index
    %663 = vector.load %arg16[%c0_102, %c0_103] : memref<2x4xf32, #tpu.memory_space<vmem>>, vector<2x4xf32>
    tpu.vector_store %arg16[%c0_102, %c0_103], %662 {strides = array<i32>} : memref<2x4xf32, #tpu.memory_space<vmem>>, vector<2x4xf32>,
    return
  }
}

</mosaic_0001>

<bundles_post_ra>
// kernel: bilstm_forward.1
= control target key start
LH: loop header
LB: loop body
LE: loop exit
PB: predicated region body
PF: predicated region fallthrough
CT: control target
= control target key end

     0   :  { %s6601_s0 = inlined_call_operand.vmem [shape: s32[16,1], index: 0, kind: input, shape index: {}]   ;;  %s6602_s1 = inlined_call_operand.vmem [shape: f32[64,16], index: 1, kind: input, shape index: {}]   ;;  %s6603_s2 = inlined_call_operand.hbm [shape: f32[16,128], index: 2, kind: input, shape index: {}]   ;;  %s6604_s3 = inlined_call_operand.vmem [shape: f32[32,128], index: 3, kind: input, shape index: {}]   ;;  %s6605_s4 = inlined_call_operand.vmem [shape: f32[1,128], index: 4, kind: input, shape index: {}]   ;;  %s6606_s5 = inlined_call_operand.hbm [shape: f32[16,128], index: 5, kind: input, shape index: {}]   ;;  %s6607_s6 = inlined_call_operand.vmem [shape: f32[32,128], index: 6, kind: input, shape index: {}]   ;;  %s6608_s7 = inlined_call_operand.hbm [shape: f32[1,128], index: 7, kind: input, shape index: {}]   ;;  %s6609_s8 = inlined_call_operand.vmem [shape: f32[64,128], index: 8, kind: input, shape index: {}]   ;;  %s6610_s9 = inlined_call_operand.hbm [shape: f32[32,128], index: 9, kind: input, shape index: {}]   ;;  %s6611_s10 = inlined_call_operand.vmem [shape: f32[1,128], index: 10, kind: input, shape index: {}]   ;;  %s6612_s11 = inlined_call_operand.vmem [shape: f32[64,128], index: 11, kind: input, shape index: {}]   ;;  %s6613_s12 = inlined_call_operand.vmem [shape: f32[32,128], index: 12, kind: input, shape index: {}]   ;;  %s6614_s13 = inlined_call_operand.vmem [shape: f32[1,128], index: 13, kind: input, shape index: {}]   ;;  %s6615_s14 = inlined_call_operand.vmem [shape: f32[64,4], index: 14, kind: input, shape index: {}]   ;;  %s6616_s15 = inlined_call_operand.hbm [shape: f32[1,4], index: 15, kind: input, shape index: {}]   ;;  %s6617_s16 = inlined_call_operand.hbm [shape: f32[2,4], index: 16, kind: output, shape index: {}]  }
   0x1   :  { %6619 = sst [smem:[#allocation16_spill]] %s6601_s0 }
   0x2   :  { %21 = vsyncpa [#allocation3], 0 }
   0x3   :  { %22 = vsyncpa [#allocation6], 0 }
   0x4   :  { %23 = vsyncpa [#allocation9], 0 }
   0x5   :  { %24 = vsyncpa [#allocation4], 0  ;;  %s5577_s21 = smov [#allocation5]   ;;  %s5578_s23 = smov [#allocation8]  }
   0x6   :  { %s50_s22 = sshll.u32 %s5577_s21, 4  ;;  %s76_s24 = sshll.u32 %s5578_s23, 4  ;;  %s51_s22 = int_to_ptr.vmem [resolvable:$true] %s50_s22  ;;  %s5676_s24 = int_to_ptr.vmem [resolvable:$true] %s76_s24 }
   0x7   :  { %s5437_s27 = scalar_lea.hbm %s6606_s5, 256 }
   0x8   :  { %p5438_p0 = scmp.ne.s32.totalorder %s6606_s5, %s5437_s27  ;;  %p5441_p1 = scmp.lt.u32.totalorder %s5437_s27, %s6606_s5 }
   0xa   :  { %p5443_p2 = pnand %p5441_p1, %p5438_p0 }
   0xc   :  { %5446 = shalt.err (!%p5443_p2)
}
   0xd   :  { %s5447_s17 = scalar_lea.vmem %s51_s22, 256  ;;  %p5452_p4 = scmp.lt.s32.totalorder %s51_s22, %s51_s22 }
   0xe   :  { %p5448_p3 = scmp.ne.s32.totalorder %s51_s22, %s5447_s17  ;;  %p5453_p5 = scmp.lt.s32.totalorder %s5447_s17, %s5447_s17 }
  0x10   :  { %p5454_p6 = por %p5453_p5, %p5452_p4 }
  0x12   :  { %p5455_p7 = pnand %p5454_p6, %p5448_p3 }
  0x14   :  { %5458 = shalt.err (!%p5455_p7)
}
  0x15   :  { %s5579_s18 = smov 128   ;;  %s5580_s19 = smov 8  }
  0x16   :  { %56 = dma.hbm_to_vmem [thread:$0]  %s6606_s5, 256, %s51_s22, [#allocation6], %s5579_s18, %s5579_s18, %s5580_s19  }
  0x17   :  { %s5459_s26 = scalar_lea.hbm %s6610_s9, 512 }
  0x18   :  { %p5460_p8 = scmp.ne.s32.totalorder %s6610_s9, %s5459_s26  ;;  %p5463_p9 = scmp.lt.u32.totalorder %s5459_s26, %s6610_s9 }
  0x1a   :  { %p5465_p10 = pnand %p5463_p9, %p5460_p8 }
  0x1c   :  { %5468 = shalt.err (!%p5465_p10)
}
  0x1d   :  { %s5469_s0 = scalar_lea.vmem %s5676_s24, 512  ;;  %p5474_p12 = scmp.lt.s32.totalorder %s5676_s24, %s5676_s24 }
  0x1e   :  { %p5470_p11 = scmp.ne.s32.totalorder %s5676_s24, %s5469_s0  ;;  %p5475_p13 = scmp.lt.s32.totalorder %s5469_s0, %s5469_s0 }
  0x20   :  { %p5476_p0 = por %p5475_p13, %p5474_p12 }
  0x22   :  { %p5477_p1 = pnand %p5476_p0, %p5470_p11 }
  0x24   :  { %5480 = shalt.err (!%p5477_p1)
}
  0x25   :  { %82 = dma.hbm_to_vmem [thread:$0]  %s6610_s9, 512, %s5676_s24, [#allocation9], %s5579_s18, %s5579_s18, %s5580_s19  }
  0x26   :  { %s5581_s17 = smov [#allocation2]   ;;  %s5582_s21 = smov [#allocation7]  }
  0x27   :  { %s34_s20 = sshll.u32 %s5581_s17, 4  ;;  %s65_s23 = sshll.u32 %s5582_s21, 4  ;;  %s35_s20 = int_to_ptr.vmem [resolvable:$true] %s34_s20  ;;  %s66_s23 = int_to_ptr.vmem [resolvable:$true] %s65_s23 }
  0x28   :  { %s5481_s27 = scalar_lea.hbm %s6603_s2, 256 }
  0x29   :  { %p5482_p2 = scmp.ne.s32.totalorder %s6603_s2, %s5481_s27  ;;  %p5485_p3 = scmp.lt.u32.totalorder %s5481_s27, %s6603_s2 }
  0x2b   :  { %p5487_p4 = pnand %p5485_p3, %p5482_p2 }
  0x2d   :  { %5490 = shalt.err (!%p5487_p4)
}
  0x2e   :  { %s5491_s9 = scalar_lea.vmem %s35_s20, 256  ;;  %p5496_p6 = scmp.lt.s32.totalorder %s35_s20, %s35_s20 }
  0x2f   :  { %p5492_p5 = scmp.ne.s32.totalorder %s35_s20, %s5491_s9  ;;  %p5497_p7 = scmp.lt.s32.totalorder %s5491_s9, %s5491_s9 }
  0x31   :  { %p5498_p8 = por %p5497_p7, %p5496_p6 }
  0x33   :  { %p5499_p9 = pnand %p5498_p8, %p5492_p5 }
  0x35   :  { %5502 = shalt.err (!%p5499_p9)
}
  0x36   :  { %40 = dma.hbm_to_vmem [thread:$0]  %s6603_s2, 256, %s35_s20, [#allocation3], %s5579_s18, %s5579_s18, %s5580_s19  }
  0x37   :  { %s5503_s21 = scalar_lea.hbm %s6608_s7, 16 }
  0x38   :  { %p5504_p10 = scmp.ne.s32.totalorder %s6608_s7, %s5503_s21  ;;  %p5507_p11 = scmp.lt.u32.totalorder %s5503_s21, %s6608_s7 }
  0x3a   :  { %p5509_p12 = pnand %p5507_p11, %p5504_p10 }
  0x3c   :  { %5512 = shalt.err (!%p5509_p12)
}
  0x3d   :  { %s5513_s29 = scalar_lea.vmem %s66_s23, 16  ;;  %s5517_s30 = scalar_lea.vmem %s66_s23, 32 }
  0x3e   :  { %p5514_p13 = scmp.ne.s32.totalorder %s66_s23, %s5513_s29  ;;  %p5518_p0 = scmp.lt.s32.totalorder %s66_s23, %s66_s23 }
  0x3f   :  { %p5519_p1 = scmp.lt.s32.totalorder %s5517_s30, %s5513_s29 }
  0x41   :  { %p5520_p2 = por %p5519_p1, %p5518_p0 }
  0x43   :  { %p5521_p3 = pnand %p5520_p2, %p5514_p13 }
  0x45   :  { %5524 = shalt.err (!%p5521_p3)
}
  0x46   :  { %68 = dma.hbm_to_vmem [thread:$0]  %s6608_s7, 16, %s66_s23, [#allocation6]  }
  0x47   :  { %s5583_s19 = smov [#allocation10]   ;;  %s5525_s24 = scalar_lea.hbm %s6616_s15, 16 }
  0x48   :  { %s99_s20 = sshll.u32 %s5583_s19, 4  ;;  %p5526_p4 = scmp.ne.s32.totalorder %s6616_s15, %s5525_s24  ;;  %s100_s20 = int_to_ptr.vmem [resolvable:$true] %s99_s20 }
  0x49   :  { %p5529_p5 = scmp.lt.u32.totalorder %s5525_s24, %s6616_s15 }
  0x4b   :  { %p5531_p6 = pnand %p5529_p5, %p5526_p4 }
  0x4d   :  { %5534 = shalt.err (!%p5531_p6)
}
  0x4e   :  { %s5535_s25 = scalar_lea.vmem %s100_s20, 16  ;;  %s5539_s7 = scalar_lea.vmem %s100_s20, 32 }
  0x4f   :  { %p5536_p7 = scmp.ne.s32.totalorder %s100_s20, %s5535_s25  ;;  %p5540_p8 = scmp.lt.s32.totalorder %s100_s20, %s100_s20 }
  0x50   :  { %p5541_p9 = scmp.lt.s32.totalorder %s5539_s7, %s5535_s25 }
  0x52   :  { %p5542_p10 = por %p5541_p9, %p5540_p8 }
  0x54   :  { %p5543_p11 = pnand %p5542_p10, %p5536_p7 }
  0x56   :  { %5546 = shalt.err (!%p5543_p11)
}
  0x57   :  { %102 = dma.hbm_to_vmem [thread:$0]  %s6616_s15, 16, %s100_s20, [#allocation9]  }
  0x58   :  { %5569 = dma.done.wait [#allocation3], 256  }
  0x59   :  { %5570 = vsyncadd [#allocation3], 4294967040 }
  0x5a   :  { %5571 = dma.done.wait [#allocation6], 272  }
  0x5b   :  { %5572 = vsyncadd [#allocation6], 4294967024 }
  0x5c   :  { %5573 = dma.done.wait [#allocation9], 528  }
  0x5d   :  { %5574 = vsyncadd [#allocation9], 4294966768  ;;  %v5584_v0 = vmov 0   ;;  %s6620_s29 = sld [smem:[#allocation16_spill]]  ;;  %v134_v2 = vld [vmem:[%s6602_s1] sm:$0xff]  ;;  %v135_v3 = vld [vmem:[%s6602_s1 + $0x8] sm:$0xff]  ;;  %v120_v21 = vlaneseq }
  0x5e   :  { %5180 = vset.pattern.permute.xlu0 %v5584_v0  ;;  %v136_v4 = vld [vmem:[%s6602_s1 + $0x10] sm:$0xff]  ;;  %v137_v5 = vld [vmem:[%s6602_s1 + $0x18] sm:$0xff]  ;;  %v4906_v7 = vpack.c.bf16 %v135_v3, %v134_v2  ;;  %v138_v9 = vld [vmem:[%s6602_s1 + $0x20] sm:$0xff]  ;;  %vm142_vm0 = vcmask 523264   ;;  %v5585_v24 = vmov 0.0   ;;  %v5586_v28 = vmov 0.0|0.0  }
  0x5f   :  { %v4910_v8 = vpack.c.bf16 %v137_v5, %v136_v4  ;;  %v139_v10 = vld [vmem:[%s6602_s1 + $0x28] sm:$0xff]  ;;  %v140_v12 = vld [vmem:[%s6602_s1 + $0x30] sm:$0xff]  ;;  %v141_v13 = vld [vmem:[%s6602_s1 + $0x38] sm:$0xff]  ;;  %v5782_v22 = vand.u32 127, %v120_v21  ;;  %vm247_vm3 = vcmask 130048   ;;  %vm5587_vm4 = vmmov 0  }
  0x60   :  { %4907 = vmatprep.subr.bf16.mxu0 %v4906_v7  ;;  %v4914_v11 = vpack.c.bf16 %v139_v10, %v138_v9  ;;  %v234_v14 = vld [vmem:[#allocation5] sm:$0xff]  ;;  %v235_v15 = vld [vmem:[#allocation5 + $0x8] sm:$0xff]  ;;  %v4918_v17 = vpack.c.bf16 %v141_v13, %v140_v12  ;;  %v227_v18 = vld [vmem:[#allocation2] sm:$0xff]  ;;  %s5589_s25 = smov 32   ;;  %vm410_vm8 = vcmask 261120   ;;  %vm2163_vm9 = vcmask 1041408  }
  0x61   :  { %4909 = vmatpush3.bf16.msra.mxu0 %v4906_v7  ;;  %v4926_v16 = vpack.c.bf16 %v235_v15, %v234_v14  ;;  %v228_v19 = vld [vmem:[#allocation2 + $0x8] sm:$0xff]  ;;  %v229_v29 = vld [vmem:[%s6604_s3] sm:$0xff]  ;;  %v231_v36 = vld [vmem:[%s6604_s3 + $0x10] sm:$0xff]  ;;  %vm224_vm5 = vcmp.ge.s32.totalorder %v5782_v22, 64  ;;  %vm225_vm6 = vcmp.lt.s32.totalorder %v5782_v22, 96  ;;  %vm2167_vm10 = vcmask 1045504  }
  0x62   :  { %4911 = vmatprep.subr.bf16.mxu0 %v4910_v8  ;;  %v4922_v20 = vpack.c.bf16 %v228_v19, %v227_v18  ;;  %v230_v30 = vld [vmem:[%s6604_s3 + $0x8] sm:$0xff]  ;;  %v236_v31 = vld [vmem:[%s6607_s6] sm:$0xff]  ;;  %v232_v38 = vld [vmem:[%s6604_s3 + $0x18] sm:$0xff]  ;;  %vm2165_vm11 = vcmask 1043456   ;;  %vm4160_vm12 = vcmask 25600  }
  0x63   :  { %v118_v1 = vld [vmem:[%s6620_s29] sm:$0xff]  ;;  %v119_v6 = vld [vmem:[%s6620_s29 + $0x8] sm:$0xff]  ;;  %4927 = vmatprep.subr.bf16.mxu1 %v4926_v16  ;;  %v5804_v34 = vpack.c.bf16 %v230_v30, %v229_v29  ;;  %v238_v39 = vld [vmem:[%s6607_s6 + $0x10] sm:$0xff]  ;;  %v5822_v41 = vpack.c.bf16 %v232_v38, %v231_v36 }
  0x64   :  { %123 = vperm.xlu0 %5180, %v118_v1   ;;  %4929 = vmatpush3.bf16.msra.mxu1 %v4926_v16  ;;  %v237_v32 = vld [vmem:[%s6607_s6 + $0x8] sm:$0xff]  ;;  %v239_v40 = vld [vmem:[%s6607_s6 + $0x18] sm:$0xff]  ;;  %v4183_v43 = vld [vmem:[%s6605_s4] ss:$0 sm:$0xff]  ;;  %s5588_s4 = smov 64  }
  0x65   :  { %4913 = vmatpush3.bf16.msra.mxu0 %v4910_v8  ;;  %4930 = vmatprep.subr.bf16.mxu1 %v5586_v28  ;;  %v5806_v35 = vpack.c.bf16 %v237_v32, %v236_v31  ;;  %v5824_v42 = vpack.c.bf16 %v239_v40, %v238_v39  ;;  %v4186_v44 = vld [vmem:[#allocation7] ss:$0 sm:$0xff]  ;;  %vm5865_vm7 = vmand %vm224_vm5, %vm225_vm6 }
  0x66   :  { %4915 = vmatprep.subr.bf16.mxu0 %v4914_v11 }
  0x68   :  { %126 = vperm.xlu0 %5180, %v119_v6  }
  0x69   :  { %4917 = vmatpush3.bf16.msra.mxu0 %v4914_v11 }
  0x6a   :  { %4919 = vmatprep.subr.bf16.mxu0 %v4918_v17 }
  0x6d   :  { %4921 = vmatpush3.bf16.msra.mxu0 %v4918_v17 }
  0x6e   :  { %4923 = vmatprep.subr.bf16.mxu0 %v4922_v20 }
  0xe3   :  { %v124_v23 = vpop.permute.xlu0 %123 }
  0xe4   :  { %vm128_vm1 = vcmp.eq.s32.totalorder %v124_v23, %v5782_v22 }
  0xe5   :  { %v4179_v25 = vsel %vm128_vm1, 1.0, %v5585_v24 }
  0xe6   :  { %4480 = vmatprep.mubr.msk.f32.mxu0 %vm142_vm0, %v4179_v25 }
  0xe7   :  { %v127_v26 = vpop.permute.xlu0 %126 }
  0xe8   :  { %vm129_vm2 = vcmp.eq.s32.totalorder %v127_v26, %v5782_v22 }
  0xe9   :  { %v4180_v27 = vsel %vm129_vm2, 1.0, %v5585_v24 }
  0xea   :  { %4481 = vmatmul.mubr.msk.f32.vlgmr.msra.gmra.mrb[0].mxu0 %vm142_vm0, %v4180_v27 }
  0xeb   :  { %4925 = vmatpush3.bf16.msra.mxu0 %v4922_v20 }
  0xec   :  { %4936 = vmatprep.subr.bf16.mxu0 %v5586_v28 }
 0x1bd   :  { %v4482_v33 = vpop.f32.mrb[0].mxu0 }
 0x1be   :  { %v215_v37 = vpop.f32.mrb[1].mxu0 }
 0x1bf   :  { %4487 = vmatprep.mubr.msk.f32.mxu0 %vm247_vm3, %v215_v37  ;;  %4494 = vmatprep.mubr.msk.f32.mxu1 %vm247_vm3, %v215_v37 }
 0x1c0   :  { %4488 = vmatmul.mubr.msk.f32.vlgmr.msra.gmra.mrb[2].mxu0 %vm247_vm3, %v4482_v33  ;;  %4495 = vmatmul.mubr.msk.f32.vlgmr.msra.gmra.mrb[0].mxu1 %vm247_vm3, %v4482_v33 }
 0x1c1   :  { %4932 = vmatpush3.bf16.msra.mxu1 %v5804_v34  ;;  %4938 = vmatpush3.bf16.msra.mxu0 %v5806_v35 }
 0x1c2   :  { %4933 = vmatprep.subr.bf16.mxu1 %v5586_v28  ;;  %4939 = vmatprep.subr.bf16.mxu0 %v5586_v28 }
 0x1c3   :  { %4505 = vmatprep.mubr.msk.f32.mxu1 %vm5587_vm4, %v5585_v24  ;;  %4516 = vmatprep.mubr.msk.f32.mxu0 %vm5587_vm4, %v5585_v24 }
 0x1c5   :  { %4935 = vmatpush3.bf16.msra.mxu1 %v5822_v41  ;;  %4941 = vmatpush3.bf16.msra.mxu0 %v5824_v42 }
 0x1c6   :  { %4948 = vmatprep.subr.bf16.mxu0 %v5586_v28  ;;  %4942 = vmatprep.subr.bf16.mxu1 %v5586_v28 }
 0x1c8   :  { %4506 = vmatmul.mubr.f32.vlgmr.msra.gmra.mrb[2].mxu1 %v5585_v24  ;;  %4517 = vmatmul.mubr.f32.vlgmr.msra.gmra.mrb[4].mxu0 %v5585_v24 }
 0x1c9   :  { %4950 = vmatpush3.bf16.msra.mxu0 %v5806_v35  ;;  %4944 = vmatpush3.bf16.msra.mxu1 %v5804_v34 }
 0x1ca   :  { %4951 = vmatprep.subr.bf16.mxu0 %v5586_v28  ;;  %4945 = vmatprep.subr.bf16.mxu1 %v5586_v28 }
 0x1cb   :  { %4538 = vmatprep.mubr.msk.f32.mxu0 %vm5587_vm4, %v5585_v24  ;;  %4527 = vmatprep.mubr.msk.f32.mxu1 %vm5587_vm4, %v5585_v24 }
 0x1cd   :  { %4953 = vmatpush3.bf16.msra.mxu0 %v5824_v42  ;;  %4947 = vmatpush3.bf16.msra.mxu1 %v5822_v41 }
 0x1ce   :  { %4960 = vmatprep.subr.bf16.mxu0 %v5586_v28  ;;  %4954 = vmatprep.subr.bf16.mxu1 %v5586_v28 }
 0x293   :  { %v4489_v45 = vpop.f32.mrb[2].mxu0  ;;  %v4496_v46 = vpop.f32.mrb[0].mxu1 }
 0x294   :  { %v5853_v47 = vadd.f32 %v4489_v45, %v4183_v43  ;;  %v320_v48 = vpop.f32.mrb[3].mxu0  ;;  %v401_v49 = vpop.f32.mrb[1].mxu1  ;;  %v5859_v54 = vadd.f32 %v4496_v46, %v4186_v44 }
 0x295   :  { %v5855_v50 = vadd.f32 %v4186_v44, %v401_v49  ;;  %v5857_v51 = vadd.f32 %v4183_v43, %v320_v48 }
 0x29b   :  { %v480_v52 = vpop.f32.mrb[2].mxu1  ;;  %v551_v53 = vpop.f32.mrb[4].mxu0 }
 0x29c   :  { %v484_v55 = vadd.f32 %v480_v52, %v5857_v51  ;;  %v556_v56 = vrot.slane %v551_v53, 2  ;;  %v4518_v57 = vpop.f32.mrb[5].mxu0  ;;  %v4507_v58 = vpop.f32.mrb[3].mxu1 }
 0x29e   :  { %v4189_v59 = vmul.f32 -1.442695, %v484_v55  ;;  %v558_v60 = vadd.f32 %v556_v56, %v5859_v54 }
 0x2a0   :  { %5181 = vpow2.f32 %v4189_v59  ;;  %v4190_v61 = vmul.f32 -1.442695, %v558_v60 }
 0x2a2   :  { %5183 = vpow2.f32 %v4190_v61 }
 0x2a3   :  { %5185 = vtanh.f32 %v558_v60 }
 0x2aa   :  { %v5182_v62 = vpop.eup %5181 }
 0x2ab   :  { %v563_v0 = vadd.f32 1.0, %v5182_v62 }
 0x2ac   :  { %v5184_v63 = vpop.eup %5183 }
 0x2ad   :  { %v588_v1 = vadd.f32 1.0, %v5184_v63  ;;  %v5186_v2 = vpop.eup %5185 }
 0x2af   :  { %5187 = vrcp.f32 %v588_v1 }
 0x2b0   :  { %5189 = vrcp.f32 %v563_v0 }
 0x2b1   :  { %5191 = vtanh.f32 %v484_v55 }
 0x2b9   :  { %v5188_v3 = vpop.eup %5187 }
 0x2ba   :  { %v591_v5 = vsel %vm5865_vm7, %v5186_v2, %v5188_v3  ;;  %v5190_v6 = vpop.eup %5189 }
 0x2bb   :  { %594 = vrot.lane.b32.xlu1 %v591_v5, %s5588_s4  ;;  %v5192_v7 = vpop.eup %5191  ;;  %v592_v13 = vmul.f32 0.0, %v591_v5 }
 0x2bc   :  { %v566_v8 = vsel %vm5865_vm7, %v5192_v7, %v5190_v6 }
 0x2bd   :  { %v567_v16 = vmul.f32 0.0, %v566_v8 }
 0x2bf   :  { %569 = vrot.lane.b32.xlu1 %v566_v8, %s5588_s4 }
 0x32d   :  { %v595_v9 = vpop.permute.xlu1 %594 }
 0x32e   :  { %v597_v10 = vmul.f32 %v595_v9, %v591_v5 }
 0x330   :  { %599 = vrot.lane.b32.xlu0 %v597_v10, %s5589_s25 }
 0x331   :  { %v570_v11 = vpop.permute.xlu1 %569 }
 0x332   :  { %v572_v12 = vmul.f32 %v570_v11, %v566_v8 }
 0x334   :  { %574 = vrot.lane.b32.xlu1 %v572_v12, %s5589_s25 }
 0x3a2   :  { %v600_v14 = vpop.permute.xlu0 %599 }
 0x3a3   :  { %v5877_v15 = vadd.f32 %v600_v14, %v592_v13 }
 0x3a5   :  { %5193 = vtanh.f32 %v5877_v15  ;;  %v805_v62 = vrot.slane %v5877_v15, 2 }
 0x3a6   :  { %v575_v17 = vpop.permute.xlu1 %574 }
 0x3a7   :  { %v5880_v18 = vadd.f32 %v575_v17, %v567_v16 }
 0x3a9   :  { %5195 = vtanh.f32 %v5880_v18  ;;  %v777_v63 = vrot.slane %v5880_v18, 6 }
 0x3af   :  { %v5194_v19 = vpop.eup %5193 }
 0x3b0   :  { %605 = vrot.lane.b32.xlu0 %v5194_v19, %s5588_s4 }
 0x3b3   :  { %v5196_v20 = vpop.eup %5195 }
 0x3b4   :  { %580 = vrot.lane.b32.xlu1 %v5196_v20, %s5588_s4 }
 0x422   :  { %v606_v21 = vpop.permute.xlu0 %605 }
 0x423   :  { %v5885_v22 = vmul.f32 %v606_v21, %v591_v5 }
 0x425   :  { %v689_v23 = vrot.slane %v5885_v22, 6 }
 0x426   :  { %v581_v25 = vpop.permute.xlu1 %580 }
 0x427   :  { %v583_v26 = vmul.f32 %v581_v25, %v566_v8  ;;  %690 = vrot.lane.b32.xlu0 %v689_v23, %s5589_s25 }
 0x429   :  { %610 = vrot.lane.b32.xlu1 %v583_v26, %s5589_s25 }
 0x499   :  { %v691_v27 = vpop.permute.xlu0 %690 }
 0x49a   :  { %4539 = vmatmul.mubr.msk.f32.vlgmr.msra.gmra.mrb[6].mxu0 %vm410_vm8, %v691_v27 }
 0x49b   :  { %v5891_v29 = vpop.permute.xlu1 %610  ;;  %4962 = vmatpush3.bf16.msra.mxu0 %v5806_v35  ;;  %4560 = vmatprep.mubr.msk.f32.mxu0 %vm5587_vm4, %v5585_v24 }
 0x49c   :  { %4528 = vmatmul.mubr.msk.f32.vlgmr.msra.gmra.mrb[4].mxu1 %vm410_vm8, %v5891_v29  ;;  %4963 = vmatprep.subr.bf16.mxu0 %v5586_v28 }
 0x49d   :  { %4956 = vmatpush3.bf16.msra.mxu1 %v5804_v34  ;;  %4549 = vmatprep.mubr.msk.f32.mxu1 %vm5587_vm4, %v5585_v24 }
 0x49e   :  { %4957 = vmatprep.subr.bf16.mxu1 %v5586_v28 }
 0x49f   :  { %4965 = vmatpush3.bf16.msra.mxu0 %v5824_v42 }
 0x4a0   :  { %4972 = vmatprep.subr.bf16.mxu0 %v5586_v28 }
 0x4a1   :  { %4959 = vmatpush3.bf16.msra.mxu1 %v5822_v41 }
 0x4a2   :  { %4966 = vmatprep.subr.bf16.mxu1 %v5586_v28 }
 0x56d   :  { %v760_v30 = vpop.f32.mrb[6].mxu0 }
 0x56e   :  { %v765_v31 = vrot.slane %v760_v30, 4  ;;  %v4540_v32 = vpop.f32.mrb[7].mxu0 }
 0x56f   :  { %v680_v33 = vpop.f32.mrb[4].mxu1 }
 0x570   :  { %v767_v36 = vadd.f32 %v765_v31, %v5859_v54  ;;  %v685_v37 = vrot.slane %v680_v33, 6  ;;  %v4529_v38 = vpop.f32.mrb[5].mxu1 }
 0x572   :  { %v4194_v39 = vmul.f32 -1.442695, %v767_v36  ;;  %v687_v40 = vadd.f32 %v685_v37, %v5857_v51 }
 0x574   :  { %5197 = vpow2.f32 %v4194_v39  ;;  %v4193_v43 = vmul.f32 -1.442695, %v687_v40 }
 0x576   :  { %5199 = vpow2.f32 %v4193_v43 }
 0x577   :  { %5201 = vtanh.f32 %v767_v36 }
 0x57e   :  { %v5198_v44 = vpop.eup %5197 }
 0x57f   :  { %v800_v45 = vadd.f32 1.0, %v5198_v44 }
 0x580   :  { %v5200_v46 = vpop.eup %5199 }
 0x581   :  { %5203 = vrcp.f32 %v800_v45  ;;  %v772_v48 = vadd.f32 1.0, %v5200_v46  ;;  %v5202_v49 = vpop.eup %5201 }
 0x582   :  { %5205 = vtanh.f32 %v687_v40 }
 0x583   :  { %5207 = vrcp.f32 %v772_v48 }
 0x58b   :  { %v5204_v52 = vpop.eup %5203 }
 0x58c   :  { %v5206_v53 = vpop.eup %5205  ;;  %v803_v55 = vsel %vm5865_vm7, %v5202_v49, %v5204_v52 }
 0x58d   :  { %v5208_v56 = vpop.eup %5207  ;;  %809 = vrot.lane.b32.xlu0 %v803_v55, %s5588_s4  ;;  %v807_v0 = vmul.f32 %v805_v62, %v803_v55 }
 0x58e   :  { %v775_v57 = vsel %vm5865_vm7, %v5206_v53, %v5208_v56 }
 0x58f   :  { %781 = vrot.lane.b32.xlu1 %v775_v57, %s5588_s4  ;;  %v779_v3 = vmul.f32 %v777_v63, %v775_v57 }
 0x5ff   :  { %v810_v58 = vpop.permute.xlu0 %809 }
 0x600   :  { %v812_v59 = vmul.f32 %v810_v58, %v803_v55 }
 0x601   :  { %v782_v60 = vpop.permute.xlu1 %781 }
 0x602   :  { %v784_v61 = vmul.f32 %v782_v60, %v775_v57  ;;  %814 = vrot.lane.b32.xlu0 %v812_v59, %s5589_s25 }
 0x604   :  { %786 = vrot.lane.b32.xlu1 %v784_v61, %s5589_s25 }
 0x674   :  { %v815_v1 = vpop.permute.xlu0 %814 }
 0x675   :  { %v5919_v2 = vadd.f32 %v815_v1, %v807_v0 }
 0x676   :  { %v787_v5 = vpop.permute.xlu1 %786 }
 0x677   :  { %5209 = vtanh.f32 %v5919_v2  ;;  %v5922_v6 = vadd.f32 %v787_v5, %v779_v3  ;;  %v1021_v52 = vrot.slane %v5919_v2, 2 }
 0x679   :  { %5211 = vtanh.f32 %v5922_v6  ;;  %v993_v53 = vrot.slane %v5922_v6, 6 }
 0x681   :  { %v5210_v7 = vpop.eup %5209 }
 0x682   :  { %820 = vrot.lane.b32.xlu0 %v5210_v7, %s5588_s4 }
 0x683   :  { %v5212_v8 = vpop.eup %5211 }
 0x684   :  { %792 = vrot.lane.b32.xlu1 %v5212_v8, %s5588_s4 }
 0x6f4   :  { %v821_v9 = vpop.permute.xlu0 %820 }
 0x6f5   :  { %v5927_v10 = vmul.f32 %v821_v9, %v803_v55 }
 0x6f6   :  { %v793_v11 = vpop.permute.xlu1 %792 }
 0x6f7   :  { %v905_v12 = vrot.slane %v5927_v10, 4  ;;  %v5930_v13 = vmul.f32 %v793_v11, %v775_v57 }
 0x6f9   :  { %v825_v14 = vrot.slane %v5930_v13, 2  ;;  %906 = vrot.lane.b32.xlu0 %v905_v12, %s5589_s25 }
 0x6fb   :  { %826 = vrot.lane.b32.xlu1 %v825_v14, %s5589_s25 }
 0x76b   :  { %v907_v15 = vpop.permute.xlu0 %906 }
 0x76c   :  { %4561 = vmatmul.mubr.msk.f32.vlgmr.msra.gmra.mrb[8].mxu0 %vm410_vm8, %v907_v15 }
 0x76d   :  { %v827_v16 = vpop.permute.xlu1 %826  ;;  %4974 = vmatpush3.bf16.msra.mxu0 %v5806_v35  ;;  %4582 = vmatprep.mubr.msk.f32.mxu0 %vm5587_vm4, %v5585_v24 }
 0x76e   :  { %4550 = vmatmul.mubr.msk.f32.vlgmr.msra.gmra.mrb[6].mxu1 %vm410_vm8, %v827_v16  ;;  %4975 = vmatprep.subr.bf16.mxu0 %v5586_v28 }
 0x76f   :  { %4968 = vmatpush3.bf16.msra.mxu1 %v5804_v34  ;;  %4571 = vmatprep.mubr.msk.f32.mxu1 %vm5587_vm4, %v5585_v24 }
 0x770   :  { %4969 = vmatprep.subr.bf16.mxu1 %v5586_v28 }
 0x771   :  { %4977 = vmatpush3.bf16.msra.mxu0 %v5824_v42 }
 0x772   :  { %4984 = vmatprep.subr.bf16.mxu0 %v5586_v28 }
 0x773   :  { %4971 = vmatpush3.bf16.msra.mxu1 %v5822_v41 }
 0x774   :  { %4978 = vmatprep.subr.bf16.mxu1 %v5586_v28 }
 0x83f   :  { %v976_v17 = vpop.f32.mrb[8].mxu0 }
 0x840   :  { %v981_v18 = vrot.slane %v976_v17, 6  ;;  %v4562_v19 = vpop.f32.mrb[9].mxu0 }
 0x841   :  { %v896_v20 = vpop.f32.mrb[6].mxu1 }
 0x842   :  { %v983_v21 = vadd.f32 %v981_v18, %v5859_v54  ;;  %v901_v23 = vrot.slane %v896_v20, 4  ;;  %v4551_v25 = vpop.f32.mrb[7].mxu1 }
 0x844   :  { %v4198_v26 = vmul.f32 -1.442695, %v983_v21  ;;  %v903_v27 = vadd.f32 %v901_v23, %v5857_v51 }
 0x846   :  { %5213 = vpow2.f32 %v4198_v26  ;;  %v4197_v30 = vmul.f32 -1.442695, %v903_v27 }
 0x848   :  { %5215 = vpow2.f32 %v4197_v30 }
 0x849   :  { %5217 = vtanh.f32 %v983_v21 }
 0x850   :  { %v5214_v31 = vpop.eup %5213 }
 0x851   :  { %v1016_v32 = vadd.f32 1.0, %v5214_v31 }
 0x852   :  { %v5216_v33 = vpop.eup %5215 }
 0x853   :  { %5219 = vrcp.f32 %v1016_v32  ;;  %v988_v36 = vadd.f32 1.0, %v5216_v33  ;;  %v5218_v37 = vpop.eup %5217 }
 0x854   :  { %5221 = vtanh.f32 %v903_v27 }
 0x855   :  { %5223 = vrcp.f32 %v988_v36 }
 0x85d   :  { %v5220_v38 = vpop.eup %5219 }
 0x85e   :  { %v5222_v39 = vpop.eup %5221  ;;  %v1019_v40 = vsel %vm5865_vm7, %v5218_v37, %v5220_v38 }
 0x85f   :  { %v5224_v43 = vpop.eup %5223  ;;  %1025 = vrot.lane.b32.xlu0 %v1019_v40, %s5588_s4  ;;  %v1023_v55 = vmul.f32 %v1021_v52, %v1019_v40 }
 0x860   :  { %v991_v44 = vsel %vm5865_vm7, %v5222_v39, %v5224_v43 }
 0x861   :  { %997 = vrot.lane.b32.xlu1 %v991_v44, %s5588_s4  ;;  %v995_v58 = vmul.f32 %v993_v53, %v991_v44 }
 0x8d1   :  { %v1026_v45 = vpop.permute.xlu0 %1025 }
 0x8d2   :  { %v1028_v46 = vmul.f32 %v1026_v45, %v1019_v40 }
 0x8d3   :  { %v998_v48 = vpop.permute.xlu1 %997 }
 0x8d4   :  { %v1000_v49 = vmul.f32 %v998_v48, %v991_v44  ;;  %1030 = vrot.lane.b32.xlu0 %v1028_v46, %s5589_s25 }
 0x8d6   :  { %1002 = vrot.lane.b32.xlu1 %v1000_v49, %s5589_s25 }
 0x946   :  { %v1031_v56 = vpop.permute.xlu0 %1030 }
 0x947   :  { %v5961_v57 = vadd.f32 %v1031_v56, %v1023_v55 }
 0x948   :  { %v1003_v59 = vpop.permute.xlu1 %1002 }
 0x949   :  { %5225 = vtanh.f32 %v5961_v57  ;;  %v5964_v60 = vadd.f32 %v1003_v59, %v995_v58  ;;  %v1234_v37 = vrot.slane %v5961_v57, 2 }
 0x94b   :  { %5227 = vtanh.f32 %v5964_v60 }
 0x953   :  { %v5226_v61 = vpop.eup %5225 }
 0x954   :  { %1036 = vrot.lane.b32.xlu0 %v5226_v61, %s5588_s4 }
 0x955   :  { %v5228_v62 = vpop.eup %5227 }
 0x956   :  { %1008 = vrot.lane.b32.xlu1 %v5228_v62, %s5588_s4 }
 0x9c6   :  { %v1037_v63 = vpop.permute.xlu0 %1036 }
 0x9c7   :  { %v5969_v0 = vmul.f32 %v1037_v63, %v1019_v40  ;;  %v1206_v40 = vrot.slane %v5964_v60, 6 }
 0x9c8   :  { %v1009_v1 = vpop.permute.xlu1 %1008 }
 0x9c9   :  { %v1121_v2 = vrot.slane %v5969_v0, 2  ;;  %v5972_v3 = vmul.f32 %v1009_v1, %v991_v44 }
 0x9cb   :  { %v1041_v5 = vrot.slane %v5972_v3, 4  ;;  %1122 = vrot.lane.b32.xlu0 %v1121_v2, %s5589_s25 }
 0x9cd   :  { %1042 = vrot.lane.b32.xlu1 %v1041_v5, %s5589_s25 }
 0xa3d   :  { %v1123_v6 = vpop.permute.xlu0 %1122 }
 0xa3e   :  { %4583 = vmatmul.mubr.msk.f32.vlgmr.msra.gmra.mrb[10].mxu0 %vm410_vm8, %v1123_v6 }
 0xa3f   :  { %v1043_v7 = vpop.permute.xlu1 %1042  ;;  %4986 = vmatpush3.bf16.msra.mxu0 %v5806_v35  ;;  %4604 = vmatprep.mubr.msk.f32.mxu0 %vm5587_vm4, %v5585_v24 }
 0xa40   :  { %4572 = vmatmul.mubr.msk.f32.vlgmr.msra.gmra.mrb[8].mxu1 %vm410_vm8, %v1043_v7  ;;  %4987 = vmatprep.subr.bf16.mxu0 %v5586_v28 }
 0xa41   :  { %4980 = vmatpush3.bf16.msra.mxu1 %v5804_v34  ;;  %4593 = vmatprep.mubr.msk.f32.mxu1 %vm5587_vm4, %v5585_v24 }
 0xa42   :  { %4981 = vmatprep.subr.bf16.mxu1 %v5586_v28 }
 0xa43   :  { %4989 = vmatpush3.bf16.msra.mxu0 %v5824_v42 }
 0xa44   :  { %4996 = vmatprep.subr.bf16.mxu0 %v5586_v28 }
 0xa45   :  { %4983 = vmatpush3.bf16.msra.mxu1 %v5822_v41 }
 0xa46   :  { %4990 = vmatprep.subr.bf16.mxu1 %v5586_v28 }
 0xb11   :  { %v1192_v8 = vpop.f32.mrb[10].mxu0 }
 0xb12   :  { %v1196_v9 = vadd.f32 %v1192_v8, %v5859_v54  ;;  %v4584_v11 = vpop.f32.mrb[11].mxu0 }
 0xb13   :  { %v1112_v12 = vpop.f32.mrb[8].mxu1 }
 0xb14   :  { %v4202_v14 = vmul.f32 -1.442695, %v1196_v9  ;;  %v1117_v15 = vrot.slane %v1112_v12, 2  ;;  %v4573_v16 = vpop.f32.mrb[9].mxu1 }
 0xb16   :  { %5229 = vpow2.f32 %v4202_v14  ;;  %v1119_v17 = vadd.f32 %v1117_v15, %v5857_v51 }
 0xb18   :  { %v4201_v18 = vmul.f32 -1.442695, %v1119_v17 }
 0xb1a   :  { %5231 = vpow2.f32 %v4201_v18 }
 0xb1b   :  { %5233 = vtanh.f32 %v1196_v9 }
 0xb20   :  { %v5230_v19 = vpop.eup %5229 }
 0xb21   :  { %v1229_v20 = vadd.f32 1.0, %v5230_v19 }
 0xb23   :  { %5235 = vrcp.f32 %v1229_v20 }
 0xb24   :  { %v5232_v21 = vpop.eup %5231  ;;  %5237 = vtanh.f32 %v1119_v17 }
 0xb25   :  { %v1201_v23 = vadd.f32 1.0, %v5232_v21  ;;  %v5234_v25 = vpop.eup %5233 }
 0xb27   :  { %5239 = vrcp.f32 %v1201_v23 }
 0xb2d   :  { %v5236_v54 = vpop.eup %5235 }
 0xb2e   :  { %v1232_v26 = vsel %vm5865_vm7, %v5234_v25, %v5236_v54  ;;  %v5238_v27 = vpop.eup %5237 }
 0xb2f   :  { %1238 = vrot.lane.b32.xlu0 %v1232_v26, %s5588_s4  ;;  %v1236_v38 = vmul.f32 %v1234_v37, %v1232_v26 }
 0xb31   :  { %v5240_v30 = vpop.eup %5239 }
 0xb32   :  { %v1204_v51 = vsel %vm5865_vm7, %v5238_v27, %v5240_v30 }
 0xb33   :  { %1210 = vrot.lane.b32.xlu1 %v1204_v51, %s5588_s4  ;;  %v1208_v44 = vmul.f32 %v1206_v40, %v1204_v51 }
 0xba1   :  { %v1239_v31 = vpop.permute.xlu0 %1238 }
 0xba2   :  { %v1241_v32 = vmul.f32 %v1239_v31, %v1232_v26 }
 0xba4   :  { %1243 = vrot.lane.b32.xlu0 %v1241_v32, %s5589_s25 }
 0xba5   :  { %v1211_v33 = vpop.permute.xlu1 %1210 }
 0xba6   :  { %v1213_v36 = vmul.f32 %v1211_v33, %v1204_v51 }
 0xba8   :  { %1215 = vrot.lane.b32.xlu1 %v1213_v36, %s5589_s25 }
 0xc16   :  { %v1244_v39 = vpop.permute.xlu0 %1243 }
 0xc17   :  { %v6003_v43 = vadd.f32 %v1244_v39, %v1236_v38 }
 0xc19   :  { %5241 = vtanh.f32 %v6003_v43  ;;  %v1446_v54 = vrot.slane %v6003_v43, 2 }
 0xc1a   :  { %v1216_v45 = vpop.permute.xlu1 %1215 }
 0xc1b   :  { %v6006_v46 = vadd.f32 %v1216_v45, %v1208_v44 }
 0xc1d   :  { %5243 = vtanh.f32 %v6006_v46  ;;  %v1418_v30 = vrot.slane %v6006_v46, 6 }
 0xc23   :  { %v5242_v48 = vpop.eup %5241 }
 0xc24   :  { %1249 = vrot.lane.b32.xlu0 %v5242_v48, %s5588_s4 }
 0xc27   :  { %v5244_v49 = vpop.eup %5243 }
 0xc28   :  { %1221 = vrot.lane.b32.xlu1 %v5244_v49, %s5588_s4 }
 0xc96   :  { %v1250_v52 = vpop.permute.xlu0 %1249 }
 0xc97   :  { %v6011_v53 = vmul.f32 %v1250_v52, %v1232_v26 }
 0xc99   :  { %1331 = vrot.lane.b32.xlu0 %v6011_v53, %s5589_s25 }
 0xc9a   :  { %v1222_v55 = vpop.permute.xlu1 %1221 }
 0xc9b   :  { %v6015_v56 = vmul.f32 %v1222_v55, %v1204_v51 }
 0xc9d   :  { %v1254_v57 = vrot.slane %v6015_v56, 6 }
 0xc9f   :  { %1255 = vrot.lane.b32.xlu1 %v1254_v57, %s5589_s25 }
 0xd0b   :  { %v1332_v58 = vpop.permute.xlu0 %1331 }
 0xd0c   :  { %4605 = vmatmul.mubr.msk.f32.vlgmr.msra.gmra.mrb[12].mxu0 %vm410_vm8, %v1332_v58 }
 0xd0d   :  { %4998 = vmatpush3.bf16.msra.mxu0 %v5806_v35  ;;  %4626 = vmatprep.mubr.msk.f32.mxu0 %vm5587_vm4, %v5585_v24 }
 0xd0e   :  { %4999 = vmatprep.subr.bf16.mxu0 %v5586_v28 }
 0xd11   :  { %v1256_v59 = vpop.permute.xlu1 %1255  ;;  %5001 = vmatpush3.bf16.msra.mxu0 %v5824_v42 }
 0xd12   :  { %4594 = vmatmul.mubr.msk.f32.vlgmr.msra.gmra.mrb[10].mxu1 %vm410_vm8, %v1256_v59  ;;  %5008 = vmatprep.subr.bf16.mxu0 %v5586_v28 }
 0xd13   :  { %4992 = vmatpush3.bf16.msra.mxu1 %v5804_v34  ;;  %4615 = vmatprep.mubr.msk.f32.mxu1 %vm5587_vm4, %v5585_v24 }
 0xd14   :  { %4993 = vmatprep.subr.bf16.mxu1 %v5586_v28 }
 0xd17   :  { %4995 = vmatpush3.bf16.msra.mxu1 %v5822_v41 }
 0xd18   :  { %5002 = vmatprep.subr.bf16.mxu1 %v5586_v28 }
 0xddf   :  { %v1401_v60 = vpop.f32.mrb[12].mxu0 }
 0xde0   :  { %v1406_v61 = vrot.slane %v1401_v60, 2  ;;  %v4606_v62 = vpop.f32.mrb[13].mxu0 }
 0xde2   :  { %v1408_v63 = vadd.f32 %v1406_v61, %v5855_v50 }
 0xde4   :  { %v4206_v1 = vmul.f32 -1.442695, %v1408_v63 }
 0xde5   :  { %v1325_v2 = vpop.f32.mrb[10].mxu1 }
 0xde6   :  { %5245 = vpow2.f32 %v4206_v1  ;;  %v1329_v5 = vadd.f32 %v1325_v2, %v5853_v47  ;;  %v4595_v6 = vpop.f32.mrb[11].mxu1 }
 0xde8   :  { %v4205_v7 = vmul.f32 -1.442695, %v1329_v5 }
 0xdea   :  { %5247 = vpow2.f32 %v4205_v7 }
 0xdeb   :  { %5249 = vtanh.f32 %v1408_v63 }
 0xdf0   :  { %v5246_v8 = vpop.eup %5245 }
 0xdf1   :  { %v1441_v9 = vadd.f32 1.0, %v5246_v8 }
 0xdf3   :  { %5251 = vrcp.f32 %v1441_v9 }
 0xdf4   :  { %v5248_v11 = vpop.eup %5247  ;;  %5253 = vtanh.f32 %v1329_v5 }
 0xdf5   :  { %v1413_v12 = vadd.f32 1.0, %v5248_v11  ;;  %v5250_v14 = vpop.eup %5249 }
 0xdf7   :  { %5255 = vrcp.f32 %v1413_v12 }
 0xdfd   :  { %v5252_v15 = vpop.eup %5251 }
 0xdfe   :  { %v1444_v16 = vsel %vm5865_vm7, %v5250_v14, %v5252_v15  ;;  %v5254_v17 = vpop.eup %5253 }
 0xdff   :  { %1450 = vrot.lane.b32.xlu0 %v1444_v16, %s5588_s4  ;;  %v1448_v26 = vmul.f32 %v1446_v54, %v1444_v16 }
 0xe01   :  { %v5256_v18 = vpop.eup %5255 }
 0xe02   :  { %v1416_v19 = vsel %vm5865_vm7, %v5254_v17, %v5256_v18 }
 0xe03   :  { %1422 = vrot.lane.b32.xlu1 %v1416_v19, %s5588_s4  ;;  %v1420_v31 = vmul.f32 %v1418_v30, %v1416_v19 }
 0xe71   :  { %v1451_v20 = vpop.permute.xlu0 %1450 }
 0xe72   :  { %v1453_v21 = vmul.f32 %v1451_v20, %v1444_v16 }
 0xe74   :  { %1455 = vrot.lane.b32.xlu0 %v1453_v21, %s5589_s25 }
 0xe75   :  { %v1423_v23 = vpop.permute.xlu1 %1422 }
 0xe76   :  { %v1425_v25 = vmul.f32 %v1423_v23, %v1416_v19 }
 0xe78   :  { %1427 = vrot.lane.b32.xlu1 %v1425_v25, %s5589_s25 }
 0xee6   :  { %v1456_v27 = vpop.permute.xlu0 %1455 }
 0xee7   :  { %v6045_v51 = vadd.f32 %v1456_v27, %v1448_v26 }
 0xee9   :  { %5257 = vtanh.f32 %v6045_v51  ;;  %v1661_v18 = vrot.slane %v6045_v51, 2 }
 0xeea   :  { %v1428_v32 = vpop.permute.xlu1 %1427 }
 0xeeb   :  { %v6048_v33 = vadd.f32 %v1428_v32, %v1420_v31 }
 0xeed   :  { %5259 = vtanh.f32 %v6048_v33 }
 0xef3   :  { %v5258_v36 = vpop.eup %5257 }
 0xef4   :  { %1461 = vrot.lane.b32.xlu0 %v5258_v36, %s5588_s4 }
 0xef7   :  { %v5260_v37 = vpop.eup %5259 }
 0xef8   :  { %1433 = vrot.lane.b32.xlu1 %v5260_v37, %s5588_s4 }
 0xf66   :  { %v1462_v38 = vpop.permute.xlu0 %1461 }
 0xf67   :  { %v6053_v39 = vmul.f32 %v1462_v38, %v1444_v16 }
 0xf69   :  { %v1545_v40 = vrot.slane %v6053_v39, 6 }
 0xf6a   :  { %v1434_v43 = vpop.permute.xlu1 %1433 }
 0xf6b   :  { %v1436_v44 = vmul.f32 %v1434_v43, %v1416_v19  ;;  %1546 = vrot.lane.b32.xlu0 %v1545_v40, %s5589_s25  ;;  %v1633_v19 = vrot.slane %v6048_v33, 6 }
 0xf6d   :  { %1466 = vrot.lane.b32.xlu1 %v1436_v44, %s5589_s25 }
 0xfdd   :  { %v1547_v45 = vpop.permute.xlu0 %1546 }
 0xfde   :  { %4627 = vmatmul.mubr.msk.f32.vlgmr.msra.gmra.mrb[14].mxu0 %vm410_vm8, %v1547_v45 }
 0xfdf   :  { %v6059_v46 = vpop.permute.xlu1 %1466  ;;  %5010 = vmatpush3.bf16.msra.mxu0 %v5806_v35  ;;  %4648 = vmatprep.mubr.msk.f32.mxu0 %vm5587_vm4, %v5585_v24 }
 0xfe0   :  { %4616 = vmatmul.mubr.msk.f32.vlgmr.msra.gmra.mrb[12].mxu1 %vm410_vm8, %v6059_v46  ;;  %5011 = vmatprep.subr.bf16.mxu0 %v5586_v28 }
 0xfe1   :  { %5004 = vmatpush3.bf16.msra.mxu1 %v5804_v34  ;;  %4637 = vmatprep.mubr.msk.f32.mxu1 %vm5587_vm4, %v5585_v24 }
 0xfe2   :  { %5005 = vmatprep.subr.bf16.mxu1 %v5586_v28 }
 0xfe3   :  { %5013 = vmatpush3.bf16.msra.mxu0 %v5824_v42 }
 0xfe4   :  { %5020 = vmatprep.subr.bf16.mxu0 %v5586_v28 }
 0xfe5   :  { %5007 = vmatpush3.bf16.msra.mxu1 %v5822_v41 }
 0xfe6   :  { %5014 = vmatprep.subr.bf16.mxu1 %v5586_v28 }
0x10b1   :  { %v1616_v48 = vpop.f32.mrb[14].mxu0 }
0x10b2   :  { %v1621_v49 = vrot.slane %v1616_v48, 4  ;;  %v4628_v52 = vpop.f32.mrb[15].mxu0 }
0x10b3   :  { %v1536_v55 = vpop.f32.mrb[12].mxu1 }
0x10b4   :  { %v1623_v57 = vadd.f32 %v1621_v49, %v5855_v50  ;;  %v1541_v58 = vrot.slane %v1536_v55, 6  ;;  %v4617_v59 = vpop.f32.mrb[13].mxu1 }
0x10b6   :  { %v4210_v60 = vmul.f32 -1.442695, %v1623_v57  ;;  %v1543_v61 = vadd.f32 %v1541_v58, %v5853_v47 }
0x10b8   :  { %5261 = vpow2.f32 %v4210_v60  ;;  %v4209_v62 = vmul.f32 -1.442695, %v1543_v61 }
0x10ba   :  { %5263 = vpow2.f32 %v4209_v62 }
0x10bb   :  { %5265 = vtanh.f32 %v1623_v57 }
0x10c2   :  { %v5262_v63 = vpop.eup %5261 }
0x10c3   :  { %v1656_v1 = vadd.f32 1.0, %v5262_v63 }
0x10c4   :  { %v5264_v2 = vpop.eup %5263 }
0x10c5   :  { %5267 = vrcp.f32 %v1656_v1  ;;  %v1628_v5 = vadd.f32 1.0, %v5264_v2  ;;  %v5266_v6 = vpop.eup %5265 }
0x10c6   :  { %5269 = vtanh.f32 %v1543_v61 }
0x10c7   :  { %5271 = vrcp.f32 %v1628_v5 }
0x10cf   :  { %v5268_v7 = vpop.eup %5267 }
0x10d0   :  { %v5270_v8 = vpop.eup %5269  ;;  %v1659_v9 = vsel %vm5865_vm7, %v5266_v6, %v5268_v7 }
0x10d1   :  { %v5272_v11 = vpop.eup %5271  ;;  %1665 = vrot.lane.b32.xlu0 %v1659_v9, %s5588_s4  ;;  %v1663_v20 = vmul.f32 %v1661_v18, %v1659_v9 }
0x10d2   :  { %v1631_v12 = vsel %vm5865_vm7, %v5270_v8, %v5272_v11 }
0x10d3   :  { %1637 = vrot.lane.b32.xlu1 %v1631_v12, %s5588_s4  ;;  %v1635_v25 = vmul.f32 %v1633_v19, %v1631_v12 }
0x1143   :  { %v1666_v14 = vpop.permute.xlu0 %1665 }
0x1144   :  { %v1668_v15 = vmul.f32 %v1666_v14, %v1659_v9 }
0x1145   :  { %v1638_v16 = vpop.permute.xlu1 %1637 }
0x1146   :  { %v1640_v17 = vmul.f32 %v1638_v16, %v1631_v12  ;;  %1670 = vrot.lane.b32.xlu0 %v1668_v15, %s5589_s25 }
0x1148   :  { %1642 = vrot.lane.b32.xlu1 %v1640_v17, %s5589_s25 }
0x11b8   :  { %v1671_v21 = vpop.permute.xlu0 %1670 }
0x11b9   :  { %v6087_v23 = vadd.f32 %v1671_v21, %v1663_v20 }
0x11ba   :  { %v1643_v54 = vpop.permute.xlu1 %1642 }
0x11bb   :  { %5273 = vtanh.f32 %v6087_v23  ;;  %v6090_v26 = vadd.f32 %v1643_v54, %v1635_v25 }
0x11bd   :  { %5275 = vtanh.f32 %v6090_v26  ;;  %v1849_v11 = vrot.slane %v6090_v26, 6 }
0x11c5   :  { %v5274_v27 = vpop.eup %5273 }
0x11c6   :  { %1676 = vrot.lane.b32.xlu0 %v5274_v27, %s5588_s4 }
0x11c7   :  { %v5276_v30 = vpop.eup %5275 }
0x11c8   :  { %1648 = vrot.lane.b32.xlu1 %v5276_v30, %s5588_s4 }
0x1238   :  { %v1677_v51 = vpop.permute.xlu0 %1676 }
0x1239   :  { %v6095_v31 = vmul.f32 %v1677_v51, %v1659_v9  ;;  %v1877_v9 = vrot.slane %v6087_v23, 2 }
0x123a   :  { %v1649_v32 = vpop.permute.xlu1 %1648 }
0x123b   :  { %v1761_v33 = vrot.slane %v6095_v31, 4  ;;  %v6098_v36 = vmul.f32 %v1649_v32, %v1631_v12 }
0x123d   :  { %v1681_v37 = vrot.slane %v6098_v36, 2  ;;  %1762 = vrot.lane.b32.xlu0 %v1761_v33, %s5589_s25 }
0x123f   :  { %1682 = vrot.lane.b32.xlu1 %v1681_v37, %s5589_s25 }
0x12af   :  { %v1763_v38 = vpop.permute.xlu0 %1762 }
0x12b0   :  { %4649 = vmatmul.mubr.msk.f32.vlgmr.msra.gmra.mrb[16].mxu0 %vm410_vm8, %v1763_v38 }
0x12b1   :  { %v1683_v40 = vpop.permute.xlu1 %1682  ;;  %5022 = vmatpush3.bf16.msra.mxu0 %v5806_v35  ;;  %4670 = vmatprep.mubr.msk.f32.mxu0 %vm5587_vm4, %v5585_v24 }
0x12b2   :  { %4638 = vmatmul.mubr.msk.f32.vlgmr.msra.gmra.mrb[14].mxu1 %vm410_vm8, %v1683_v40  ;;  %5023 = vmatprep.subr.bf16.mxu0 %v5586_v28 }
0x12b3   :  { %5016 = vmatpush3.bf16.msra.mxu1 %v5804_v34  ;;  %4659 = vmatprep.mubr.msk.f32.mxu1 %vm5587_vm4, %v5585_v24 }
0x12b4   :  { %5017 = vmatprep.subr.bf16.mxu1 %v5586_v28 }
0x12b5   :  { %5025 = vmatpush3.bf16.msra.mxu0 %v5824_v42 }
0x12b7   :  { %5019 = vmatpush3.bf16.msra.mxu1 %v5822_v41 }
0x1383   :  { %v1832_v43 = vpop.f32.mrb[16].mxu0 }
0x1384   :  { %v1837_v35 = vrot.slane %v1832_v43, 6  ;;  %v4650_v44 = vpop.f32.mrb[17].mxu0 }
0x1385   :  { %v1752_v45 = vpop.f32.mrb[14].mxu1 }
0x1386   :  { %v1839_v48 = vadd.f32 %v1837_v35, %v5855_v50  ;;  %v1757_v49 = vrot.slane %v1752_v45, 4  ;;  %v4639_v52 = vpop.f32.mrb[15].mxu1 }
0x1388   :  { %v4214_v55 = vmul.f32 -1.442695, %v1839_v48  ;;  %v1759_v34 = vadd.f32 %v1757_v49, %v5853_v47 }
0x138a   :  { %5277 = vpow2.f32 %v4214_v55  ;;  %v4213_v57 = vmul.f32 -1.442695, %v1759_v34 }
0x138c   :  { %5279 = vpow2.f32 %v4213_v57 }
0x138d   :  { %5281 = vtanh.f32 %v1839_v48 }
0x1394   :  { %v5278_v58 = vpop.eup %5277 }
0x1395   :  { %v1872_v59 = vadd.f32 1.0, %v5278_v58 }
0x1396   :  { %v5280_v60 = vpop.eup %5279 }
0x1397   :  { %5283 = vrcp.f32 %v1872_v59  ;;  %v1844_v41 = vadd.f32 1.0, %v5280_v60  ;;  %v5282_v42 = vpop.eup %5281 }
0x1398   :  { %5285 = vtanh.f32 %v1759_v34 }
0x1399   :  { %5287 = vrcp.f32 %v1844_v41 }
0x13a1   :  { %v5284_v61 = vpop.eup %5283 }
0x13a2   :  { %v5286_v62 = vpop.eup %5285  ;;  %v1875_v63 = vsel %vm5865_vm7, %v5282_v42, %v5284_v61 }
0x13a3   :  { %v5288_v1 = vpop.eup %5287  ;;  %1881 = vrot.lane.b32.xlu0 %v1875_v63, %s5588_s4  ;;  %v1879_v12 = vmul.f32 %v1877_v9, %v1875_v63 }
0x13a4   :  { %v1847_v2 = vsel %vm5865_vm7, %v5286_v62, %v5288_v1 }
0x13a5   :  { %1853 = vrot.lane.b32.xlu1 %v1847_v2, %s5588_s4  ;;  %v1851_v16 = vmul.f32 %v1849_v11, %v1847_v2 }
0x1415   :  { %v1882_v5 = vpop.permute.xlu0 %1881 }
0x1416   :  { %v1884_v6 = vmul.f32 %v1882_v5, %v1875_v63 }
0x1417   :  { %v1854_v7 = vpop.permute.xlu1 %1853 }
0x1418   :  { %v1856_v8 = vmul.f32 %v1854_v7, %v1847_v2  ;;  %1886 = vrot.lane.b32.xlu0 %v1884_v6, %s5589_s25 }
0x141a   :  { %1858 = vrot.lane.b32.xlu1 %v1856_v8, %s5589_s25 }
0x148a   :  { %v1887_v14 = vpop.permute.xlu0 %1886 }
0x148b   :  { %v1889_v15 = vadd.f32 %v1887_v14, %v1879_v12  ;;  %v2172_v12 = vld [vmem:[%s6609_s8] sm:$0xff] }
0x148c   :  { %v1859_v17 = vpop.permute.xlu1 %1858 }
0x148d   :  { %5289 = vtanh.f32 %v1889_v15  ;;  %v1861_v18 = vadd.f32 %v1859_v17, %v1851_v16  ;;  %v2090_v62 = vrot.slane %v1889_v15, 2  ;;  %v2187_v16 = vld [vmem:[%s6612_s11 + $0x10] sm:$0xff]  ;;  %v2188_v17 = vld [vmem:[%s6612_s11 + $0x18] sm:$0xff] }
0x148f   :  { %5291 = vtanh.f32 %v1861_v18 }
0x1497   :  { %v5290_v19 = vpop.eup %5289 }
0x1498   :  { %1892 = vrot.lane.b32.xlu0 %v5290_v19, %s5588_s4  ;;  %v2176_v19 = vld [vmem:[%s6609_s8 + $0x20] sm:$0xff] }
0x1499   :  { %v5292_v20 = vpop.eup %5291 }
0x149a   :  { %1864 = vrot.lane.b32.xlu1 %v5292_v20, %s5588_s4  ;;  %v2189_v20 = vld [vmem:[%s6612_s11 + $0x20] sm:$0xff] }
0x150a   :  { %v1893_v21 = vpop.permute.xlu0 %1892 }
0x150b   :  { %v1895_v25 = vmul.f32 %v1893_v21, %v1875_v63  ;;  %v2190_v21 = vld [vmem:[%s6612_s11 + $0x28] sm:$0xff] }
0x150c   :  { %v1865_v54 = vpop.permute.xlu1 %1864 }
0x150d   :  { %v1977_v23 = vrot.slane %v1895_v25, 2  ;;  %v6129_v27 = vmul.f32 %v1865_v54, %v1847_v2  ;;  %v2062_v2 = vrot.slane %v1861_v18, 6  ;;  %v5046_v18 = vpack.c.bf16 %v2188_v17, %v2187_v16 }
0x150e   :  { %v5050_v54 = vpack.c.bf16 %v2190_v21, %v2189_v20 }
0x150f   :  { %v1897_v26 = vrot.slane %v6129_v27, 4  ;;  %1978 = vrot.lane.b32.xlu0 %v1977_v23, %s5589_s25  ;;  %v2178_v23 = vld [vmem:[%s6609_s8 + $0x30] sm:$0xff] }
0x1511   :  { %1898 = vrot.lane.b32.xlu1 %v1897_v26, %s5589_s25 }
0x1581   :  { %v1979_v30 = vpop.permute.xlu0 %1978 }
0x1582   :  { %4671 = vmatmul.mubr.msk.f32.vlgmr.msra.gmra.mrb[18].mxu0 %vm410_vm8, %v1979_v30 }
0x1583   :  { %v1899_v51 = vpop.permute.xlu1 %1898 }
0x1584   :  { %4660 = vmatmul.mubr.msk.f32.vlgmr.msra.gmra.mrb[16].mxu1 %vm410_vm8, %v1899_v51 }
0x1655   :  { %v2048_v32 = vpop.f32.mrb[18].mxu0 }
0x1656   :  { %v2052_v33 = vadd.f32 %v2048_v32, %v5855_v50  ;;  %v4672_v37 = vpop.f32.mrb[19].mxu0 }
0x1657   :  { %v1968_v38 = vpop.f32.mrb[16].mxu1 }
0x1658   :  { %v4218_v40 = vmul.f32 -1.442695, %v2052_v33  ;;  %v1973_v43 = vrot.slane %v1968_v38, 2  ;;  %v4661_v35 = vpop.f32.mrb[17].mxu1 }
0x165a   :  { %5293 = vpow2.f32 %v4218_v40  ;;  %v1975_v44 = vadd.f32 %v1973_v43, %v5853_v47 }
0x165c   :  { %v4217_v45 = vmul.f32 -1.442695, %v1975_v44 }
0x165e   :  { %5295 = vpow2.f32 %v4217_v45 }
0x165f   :  { %5297 = vtanh.f32 %v2052_v33 }
0x1664   :  { %v5294_v48 = vpop.eup %5293 }
0x1665   :  { %v2085_v49 = vadd.f32 1.0, %v5294_v48 }
0x1667   :  { %5299 = vrcp.f32 %v2085_v49 }
0x1668   :  { %v5296_v52 = vpop.eup %5295  ;;  %5301 = vtanh.f32 %v1975_v44 }
0x1669   :  { %v2057_v55 = vadd.f32 1.0, %v5296_v52  ;;  %v5298_v34 = vpop.eup %5297 }
0x166b   :  { %5303 = vrcp.f32 %v2057_v55 }
0x1671   :  { %v5300_v50 = vpop.eup %5299 }
0x1672   :  { %v6140_v57 = vsel %vm5865_vm7, %v5298_v34, %v5300_v50  ;;  %v5302_v47 = vpop.eup %5301  ;;  %v2180_v50 = vld [vmem:[#allocation8] sm:$0xff] }
0x1673   :  { %2094 = vrot.lane.b32.xlu0 %v6140_v57, %s5588_s4  ;;  %v2092_v63 = vmul.f32 %v2090_v62, %v6140_v57 }
0x1675   :  { %v5304_v58 = vpop.eup %5303 }
0x1676   :  { %v6146_v59 = vsel %vm5865_vm7, %v5302_v47, %v5304_v58 }
0x1677   :  { %2066 = vrot.lane.b32.xlu1 %v6146_v59, %s5588_s4  ;;  %v2064_v6 = vmul.f32 %v2062_v2, %v6146_v59 }
0x16e5   :  { %v2095_v60 = vpop.permute.xlu0 %2094 }
0x16e6   :  { %v2097_v41 = vmul.f32 %v2095_v60, %v6140_v57  ;;  %v2193_v60 = vld [vmem:[%s6613_s12] sm:$0xff] }
0x16e8   :  { %2099 = vrot.lane.b32.xlu0 %v2097_v41, %s5589_s25  ;;  %v2194_v41 = vld [vmem:[%s6613_s12 + $0x8] sm:$0xff] }
0x16e9   :  { %v2067_v42 = vpop.permute.xlu1 %2066 }
0x16ea   :  { %v2069_v61 = vmul.f32 %v2067_v42, %v6146_v59 }
0x16ec   :  { %2071 = vrot.lane.b32.xlu1 %v2069_v61, %s5589_s25 }
0x175a   :  { %v2100_v1 = vpop.permute.xlu0 %2099 }
0x175b   :  { %v2102_v5 = vadd.f32 %v2100_v1, %v2092_v63 }
0x175d   :  { %5305 = vtanh.f32 %v2102_v5 }
0x175e   :  { %v2072_v7 = vpop.permute.xlu1 %2071 }
0x175f   :  { %v2074_v8 = vadd.f32 %v2072_v7, %v2064_v6 }
0x1761   :  { %5307 = vtanh.f32 %v2074_v8 }
0x1767   :  { %v5306_v9 = vpop.eup %5305 }
0x1768   :  { %2105 = vrot.lane.b32.xlu0 %v5306_v9, %s5588_s4  ;;  %v6255_v9 = vpack.c.bf16 %v2194_v41, %v2193_v60 }
0x176b   :  { %v5308_v11 = vpop.eup %5307 }
0x176c   :  { %2118 = vrot.lane.b32.xlu0 %v1895_v25, %s5588_s4  ;;  %2077 = vrot.lane.b32.xlu1 %v5308_v11, %s5588_s4  ;;  %v2182_v11 = vld [vmem:[#allocation8 + $0x10] sm:$0xff] }
0x1770   :  { %2125 = vrot.lane.b32.xlu0 %v6095_v31, %s5588_s4  ;;  %2115 = vrot.lane.b32.xlu1 %v5930_v13, %s5589_s25  ;;  %v2173_v13 = vld [vmem:[%s6609_s8 + $0x8] sm:$0xff]  ;;  %v2185_v31 = vld [vmem:[%s6612_s11] sm:$0xff] }
0x1774   :  { %2141 = vrot.lane.b32.xlu0 %v6098_v36, %s5589_s25  ;;  %2122 = vrot.lane.b32.xlu1 %v5972_v3, %s5589_s25  ;;  %v5026_v36 = vpack.c.bf16 %v2173_v13, %v2172_v12  ;;  %v2186_v3 = vld [vmem:[%s6612_s11 + $0x8] sm:$0xff] }
0x1775   :  { %v5042_v14 = vpack.c.bf16 %v2186_v3, %v2185_v31  ;;  %v2195_v31 = vld [vmem:[%s6613_s12 + $0x10] sm:$0xff] }
0x1776   :  { %5027 = vmatprep.subr.bf16.mxu1 %v5026_v36 }
0x1777   :  { %5043 = vmatprep.subr.bf16.mxu0 %v5042_v14  ;;  %5029 = vmatpush3.bf16.msra.mxu1 %v5026_v36  ;;  %v2196_v36 = vld [vmem:[%s6613_s12 + $0x18] sm:$0xff] }
0x1778   :  { %2129 = vrot.lane.b32.xlu0 %v6015_v56, %s5589_s25  ;;  %2137 = vrot.lane.b32.xlu1 %v6011_v53, %s5588_s4  ;;  %v2174_v53 = vld [vmem:[%s6609_s8 + $0x10] sm:$0xff]  ;;  %v2175_v56 = vld [vmem:[%s6609_s8 + $0x18] sm:$0xff] }
0x1779   :  { %v5030_v15 = vpack.c.bf16 %v2175_v56, %v2174_v53  ;;  %5045 = vmatpush3.bf16.msra.mxu0 %v5042_v14  ;;  %v6273_v56 = vpack.c.bf16 %v2196_v36, %v2195_v31  ;;  %v4219_v14 = vld [vmem:[%s6611_s10] ss:$0 sm:$0xff] }
0x177a   :  { %5047 = vmatprep.subr.bf16.mxu0 %v5046_v18 }
0x177b   :  { %5031 = vmatprep.subr.bf16.mxu1 %v5030_v15 }
0x177c   :  { %2148 = vrot.lane.b32.xlu0 %v6129_v27, %s5589_s25  ;;  %2144 = vrot.lane.b32.xlu1 %v5969_v0, %s5588_s4  ;;  %v2177_v0 = vld [vmem:[%s6609_s8 + $0x28] sm:$0xff]  ;;  %v2191_v27 = vld [vmem:[%s6612_s11 + $0x30] sm:$0xff] }
0x177d   :  { %v5034_v25 = vpack.c.bf16 %v2177_v0, %v2176_v19  ;;  %5033 = vmatpush3.bf16.msra.mxu1 %v5030_v15  ;;  %5049 = vmatpush3.bf16.msra.mxu0 %v5046_v18  ;;  %v4222_v15 = vld [vmem:[%s6614_s13] ss:$0 sm:$0xff] }
0x177e   :  { %5051 = vmatprep.subr.bf16.mxu0 %v5050_v54 }
0x177f   :  { %5035 = vmatprep.subr.bf16.mxu1 %v5034_v25 }
0x1780   :  { %2132 = vrot.lane.b32.xlu1 %v6053_v39, %s5588_s4  ;;  %v2179_v39 = vld [vmem:[%s6609_s8 + $0x38] sm:$0xff] }
0x1781   :  { %5037 = vmatpush3.bf16.msra.mxu1 %v5034_v25  ;;  %5053 = vmatpush3.bf16.msra.mxu0 %v5050_v54  ;;  %v5038_v26 = vpack.c.bf16 %v2179_v39, %v2178_v23 }
0x1783   :  { %5039 = vmatprep.subr.bf16.mxu1 %v5038_v26 }
0x1784   :  { %2151 = vrot.lane.b32.xlu1 %v5927_v10, %s5588_s4  ;;  %v2192_v10 = vld [vmem:[%s6612_s11 + $0x38] sm:$0xff] }
0x1785   :  { %v5054_v30 = vpack.c.bf16 %v2192_v10, %v2191_v27  ;;  %5041 = vmatpush3.bf16.msra.mxu1 %v5038_v26 }
0x1786   :  { %5058 = vmatprep.subr.bf16.mxu1 %v5586_v28 }
0x1787   :  { %5055 = vmatprep.subr.bf16.mxu0 %v5054_v30 }
0x1788   :  { %2159 = vrot.lane.b32.xlu1 %v5885_v22, %s5588_s4  ;;  %5057 = vmatpush3.bf16.msra.mxu0 %v5054_v30 }
0x1789   :  { %5064 = vmatprep.subr.bf16.mxu0 %v5586_v28 }
0x17da   :  { %v2106_v22 = vpop.permute.xlu0 %2105 }
0x17db   :  { %v2108_v51 = vmul.f32 %v2106_v22, %v6140_v57 }
0x17dd   :  { %2111 = vrot.lane.b32.xlu0 %v2108_v51, %s5588_s4 }
0x17de   :  { %v2078_v32 = vpop.permute.xlu1 %2077  ;;  %v2119_v38 = vpop.permute.xlu0 %2118 }
0x17df   :  { %v2080_v33 = vmul.f32 %v2078_v32, %v6146_v59  ;;  %v2181_v59 = vld [vmem:[#allocation8 + $0x8] sm:$0xff] }
0x17e0   :  { %v6253_v8 = vpack.c.bf16 %v2181_v59, %v2180_v50 }
0x17e1   :  { %2156 = vrot.lane.b32.xlu0 %v2080_v33, %s5589_s25 }
0x17e2   :  { %v2116_v37 = vpop.permute.xlu1 %2115  ;;  %v2126_v43 = vpop.permute.xlu0 %2125 }
0x17e3   :  { %v2121_v57 = vsel %vm410_vm8, %v2116_v37, %v2119_v38 }
0x17e6   :  { %v2123_v40 = vpop.permute.xlu1 %2122  ;;  %v2142_v44 = vpop.permute.xlu0 %2141 }
0x17e7   :  { %v2128_v42 = vsel %vm410_vm8, %v2123_v40, %v2126_v43 }
0x17ea   :  { %v2138_v35 = vpop.permute.xlu1 %2137  ;;  %v2130_v48 = vpop.permute.xlu0 %2129 }
0x17ee   :  { %v2145_v45 = vpop.permute.xlu1 %2144  ;;  %v2149_v52 = vpop.permute.xlu0 %2148 }
0x17ef   :  { %v2147_v47 = vsel %vm410_vm8, %v2142_v44, %v2145_v45 }
0x17f2   :  { %v2133_v49 = vpop.permute.xlu1 %2132 }
0x17f3   :  { %v2135_v63 = vsel %vm410_vm8, %v2130_v48, %v2133_v49 }
0x17f6   :  { %v2152_v55 = vpop.permute.xlu1 %2151 }
0x17f7   :  { %v2154_v61 = vsel %vm410_vm8, %v2149_v52, %v2152_v55 }
0x17fa   :  { %v2160_v5 = vpop.permute.xlu1 %2159 }
0x184f   :  { %v2112_v34 = vpop.permute.xlu0 %2111 }
0x1850   :  { %v2114_v58 = vsel %vm410_vm8, %v5891_v29, %v2112_v34  ;;  %v2140_v29 = vsel %vm410_vm8, %v6059_v46, %v2138_v35  ;;  %v2183_v46 = vld [vmem:[#allocation8 + $0x18] sm:$0xff] }
0x1851   :  { %v2164_v62 = vsel %vm2163_vm9, %v2114_v58, %v2121_v57  ;;  %v2169_v2 = vsel %vm2163_vm9, %v2140_v29, %v2147_v47  ;;  %v6271_v53 = vpack.c.bf16 %v2183_v46, %v2182_v11 }
0x1852   :  { %v2166_v1 = vsel %vm2165_vm11, %v2164_v62, %v2128_v42  ;;  %v2170_v12 = vsel %vm2165_vm11, %v2169_v2, %v2154_v61 }
0x1853   :  { %v2157_v6 = vpop.permute.xlu0 %2156  ;;  %v2168_v7 = vsel %vm2167_vm10, %v2166_v1, %v2135_v63 }
0x1854   :  { %v2162_v13 = vsel %vm410_vm8, %v2157_v6, %v2160_v5  ;;  %4689 = vmatprep.mubr.msk.f32.mxu1 %vm142_vm0, %v2168_v7  ;;  %4708 = vmatprep.mubr.msk.f32.mxu0 %vm142_vm0, %v2168_v7 }
0x1855   :  { %v2171_v3 = vsel %vm2167_vm10, %v2170_v12, %v2162_v13 }
0x1856   :  { %4690 = vmatmul.mubr.msk.f32.vlgmr.msra.gmra.mrb[18].mxu1 %vm142_vm0, %v2171_v3  ;;  %4709 = vmatmul.mubr.msk.f32.vlgmr.msra.gmra.mrb[20].mxu0 %vm142_vm0, %v2171_v3 }
0x1857   :  { %5060 = vmatpush3.bf16.msra.mxu1 %v6253_v8  ;;  %5066 = vmatpush3.bf16.msra.mxu0 %v6255_v9 }
0x1858   :  { %5061 = vmatprep.subr.bf16.mxu1 %v5586_v28  ;;  %5067 = vmatprep.subr.bf16.mxu0 %v5586_v28 }
0x1859   :  { %4719 = vmatprep.mubr.msk.f32.mxu1 %vm5587_vm4, %v5585_v24  ;;  %4730 = vmatprep.mubr.msk.f32.mxu0 %vm5587_vm4, %v5585_v24 }
0x185b   :  { %5063 = vmatpush3.bf16.msra.mxu1 %v6271_v53  ;;  %5069 = vmatpush3.bf16.msra.mxu0 %v6273_v56 }
0x185c   :  { %5070 = vmatprep.subr.bf16.mxu1 %v5586_v28  ;;  %5076 = vmatprep.subr.bf16.mxu0 %v5586_v28 }
0x185e   :  { %4720 = vmatmul.mubr.f32.vlgmr.msra.gmra.mrb[20].mxu1 %v5585_v24  ;;  %4731 = vmatmul.mubr.f32.vlgmr.msra.gmra.mrb[22].mxu0 %v5585_v24 }
0x185f   :  { %5072 = vmatpush3.bf16.msra.mxu1 %v6253_v8  ;;  %5078 = vmatpush3.bf16.msra.mxu0 %v6255_v9 }
0x1860   :  { %5073 = vmatprep.subr.bf16.mxu1 %v5586_v28  ;;  %4741 = vmatprep.mubr.msk.f32.mxu1 %vm5587_vm4, %v5585_v24 }
0x1861   :  { %5079 = vmatprep.subr.bf16.mxu0 %v5586_v28  ;;  %4752 = vmatprep.mubr.msk.f32.mxu0 %vm5587_vm4, %v5585_v24 }
0x1863   :  { %5075 = vmatpush3.bf16.msra.mxu1 %v6271_v53  ;;  %5081 = vmatpush3.bf16.msra.mxu0 %v6273_v56 }
0x1864   :  { %5082 = vmatprep.subr.bf16.mxu1 %v5586_v28  ;;  %5088 = vmatprep.subr.bf16.mxu0 %v5586_v28 }
0x1929   :  { %v4691_v16 = vpop.f32.mrb[18].mxu1  ;;  %v4710_v17 = vpop.f32.mrb[20].mxu0 }
0x192a   :  { %v6305_v18 = vadd.f32 %v4691_v16, %v4219_v14  ;;  %v2276_v19 = vpop.f32.mrb[19].mxu1  ;;  %v2357_v0 = vpop.f32.mrb[21].mxu0  ;;  %v6311_v23 = vadd.f32 %v4710_v17, %v4222_v15 }
0x192b   :  { %v6307_v20 = vadd.f32 %v4222_v15, %v2357_v0  ;;  %v6309_v21 = vadd.f32 %v4219_v14, %v2276_v19 }
0x1931   :  { %v2432_v25 = vpop.f32.mrb[20].mxu1  ;;  %v2503_v54 = vpop.f32.mrb[22].mxu0 }
0x1932   :  { %v2436_v39 = vadd.f32 %v2432_v25, %v6309_v21  ;;  %v2508_v27 = vrot.slane %v2503_v54, 2  ;;  %v4732_v26 = vpop.f32.mrb[23].mxu0  ;;  %v4721_v10 = vpop.f32.mrb[21].mxu1 }
0x1934   :  { %v4225_v30 = vmul.f32 -1.442695, %v2436_v39  ;;  %v2510_v22 = vadd.f32 %v2508_v27, %v6311_v23 }
0x1936   :  { %5309 = vpow2.f32 %v4225_v30  ;;  %v4226_v51 = vmul.f32 -1.442695, %v2510_v22 }
0x1938   :  { %5311 = vpow2.f32 %v4226_v51 }
0x1939   :  { %5313 = vtanh.f32 %v2436_v39 }
0x1940   :  { %v5310_v32 = vpop.eup %5309 }
0x1941   :  { %v2515_v33 = vadd.f32 1.0, %v5310_v32 }
0x1942   :  { %v5312_v37 = vpop.eup %5311 }
0x1943   :  { %5315 = vrcp.f32 %v2515_v33  ;;  %v2540_v38 = vadd.f32 1.0, %v5312_v37  ;;  %v5314_v40 = vpop.eup %5313 }
0x1944   :  { %5317 = vtanh.f32 %v2510_v22 }
0x1945   :  { %5319 = vrcp.f32 %v2540_v38 }
0x194d   :  { %v5316_v43 = vpop.eup %5315 }
0x194e   :  { %v5318_v35 = vpop.eup %5317  ;;  %v2518_v44 = vsel %vm5865_vm7, %v5314_v40, %v5316_v43 }
0x194f   :  { %v5320_v45 = vpop.eup %5319  ;;  %2521 = vrot.lane.b32.xlu1 %v2518_v44, %s5588_s4  ;;  %v2519_v50 = vmul.f32 0.0, %v2518_v44 }
0x1950   :  { %v2543_v48 = vsel %vm5865_vm7, %v5318_v35, %v5320_v45 }
0x1951   :  { %2546 = vrot.lane.b32.xlu0 %v2543_v48, %s5588_s4  ;;  %v2544_v58 = vmul.f32 0.0, %v2543_v48 }
0x19c1   :  { %v2522_v49 = vpop.permute.xlu1 %2521 }
0x19c2   :  { %v2524_v52 = vmul.f32 %v2522_v49, %v2518_v44 }
0x19c3   :  { %v2547_v55 = vpop.permute.xlu0 %2546 }
0x19c4   :  { %v2549_v34 = vmul.f32 %v2547_v55, %v2543_v48  ;;  %2526 = vrot.lane.b32.xlu1 %v2524_v52, %s5589_s25 }
0x19c6   :  { %2551 = vrot.lane.b32.xlu0 %v2549_v34, %s5589_s25 }
0x1a36   :  { %v2527_v57 = vpop.permute.xlu1 %2526 }
0x1a37   :  { %v6323_v47 = vadd.f32 %v2527_v57, %v2519_v50 }
0x1a38   :  { %v2552_v59 = vpop.permute.xlu0 %2551 }
0x1a39   :  { %5321 = vtanh.f32 %v6323_v47  ;;  %v6326_v60 = vadd.f32 %v2552_v59, %v2544_v58  ;;  %v2729_v32 = vrot.slane %v6323_v47, 6 }
0x1a3b   :  { %5323 = vtanh.f32 %v6326_v60  ;;  %v2757_v38 = vrot.slane %v6326_v60, 2 }
0x1a43   :  { %v5322_v41 = vpop.eup %5321 }
0x1a44   :  { %2532 = vrot.lane.b32.xlu1 %v5322_v41, %s5588_s4 }
0x1a45   :  { %v5324_v42 = vpop.eup %5323 }
0x1a46   :  { %2557 = vrot.lane.b32.xlu0 %v5324_v42, %s5588_s4 }
0x1ab6   :  { %v2533_v61 = vpop.permute.xlu1 %2532 }
0x1ab7   :  { %v2535_v62 = vmul.f32 %v2533_v61, %v2518_v44 }
0x1ab8   :  { %v2558_v29 = vpop.permute.xlu0 %2557 }
0x1ab9   :  { %v2560_v63 = vmul.f32 %v2558_v29, %v2543_v48  ;;  %2562 = vrot.lane.b32.xlu0 %v2535_v62, %s5589_s25 }
0x1abb   :  { %v2641_v1 = vrot.slane %v2560_v63, 6 }
0x1abd   :  { %2642 = vrot.lane.b32.xlu1 %v2641_v1, %s5589_s25 }
0x1b2b   :  { %v2563_v2 = vpop.permute.xlu0 %2562 }
0x1b2c   :  { %4742 = vmatmul.mubr.msk.f32.vlgmr.msra.gmra.mrb[22].mxu1 %vm410_vm8, %v2563_v2 }
0x1b2d   :  { %5084 = vmatpush3.bf16.msra.mxu1 %v6253_v8  ;;  %4763 = vmatprep.mubr.msk.f32.mxu1 %vm5587_vm4, %v5585_v24 }
0x1b2e   :  { %5085 = vmatprep.subr.bf16.mxu1 %v5586_v28 }
0x1b2f   :  { %v2643_v5 = vpop.permute.xlu1 %2642 }
0x1b30   :  { %4753 = vmatmul.mubr.msk.f32.vlgmr.msra.gmra.mrb[24].mxu0 %vm410_vm8, %v2643_v5 }
0x1b31   :  { %5087 = vmatpush3.bf16.msra.mxu1 %v6271_v53  ;;  %5090 = vmatpush3.bf16.msra.mxu0 %v6255_v9 }
0x1b32   :  { %5091 = vmatprep.subr.bf16.mxu0 %v5586_v28  ;;  %4774 = vmatprep.mubr.msk.f32.mxu0 %vm5587_vm4, %v5585_v24 }
0x1b33   :  { %5094 = vmatprep.subr.bf16.mxu1 %v5586_v28 }
0x1b35   :  { %5093 = vmatpush3.bf16.msra.mxu0 %v6273_v56 }
0x1b36   :  { %5100 = vmatprep.subr.bf16.mxu0 %v5586_v28 }
0x1bff   :  { %v2632_v6 = vpop.f32.mrb[22].mxu1 }
0x1c00   :  { %v2637_v7 = vrot.slane %v2632_v6, 6  ;;  %v4743_v11 = vpop.f32.mrb[23].mxu1 }
0x1c02   :  { %v2639_v12 = vadd.f32 %v2637_v7, %v6309_v21 }
0x1c03   :  { %v2712_v13 = vpop.f32.mrb[24].mxu0 }
0x1c04   :  { %v4229_v46 = vmul.f32 -1.442695, %v2639_v12  ;;  %v2717_v31 = vrot.slane %v2712_v13, 4  ;;  %v4754_v36 = vpop.f32.mrb[25].mxu0 }
0x1c06   :  { %5325 = vpow2.f32 %v4229_v46  ;;  %v2719_v3 = vadd.f32 %v2717_v31, %v6311_v23 }
0x1c08   :  { %v4230_v14 = vmul.f32 -1.442695, %v2719_v3 }
0x1c0a   :  { %5327 = vpow2.f32 %v4230_v14 }
0x1c0b   :  { %5329 = vtanh.f32 %v2639_v12 }
0x1c10   :  { %v5326_v15 = vpop.eup %5325 }
0x1c11   :  { %v2724_v16 = vadd.f32 1.0, %v5326_v15 }
0x1c13   :  { %5331 = vrcp.f32 %v2724_v16 }
0x1c14   :  { %v5328_v17 = vpop.eup %5327  ;;  %5333 = vtanh.f32 %v2719_v3 }
0x1c15   :  { %v2752_v19 = vadd.f32 1.0, %v5328_v17  ;;  %v5330_v0 = vpop.eup %5329 }
0x1c17   :  { %5335 = vrcp.f32 %v2752_v19 }
0x1c1d   :  { %v5332_v25 = vpop.eup %5331 }
0x1c1e   :  { %v2727_v54 = vsel %vm5865_vm7, %v5330_v0, %v5332_v25  ;;  %v5334_v39 = vpop.eup %5333 }
0x1c1f   :  { %2733 = vrot.lane.b32.xlu0 %v2727_v54, %s5588_s4  ;;  %v2731_v33 = vmul.f32 %v2729_v32, %v2727_v54 }
0x1c21   :  { %v5336_v27 = vpop.eup %5335 }
0x1c22   :  { %v2755_v26 = vsel %vm5865_vm7, %v5334_v39, %v5336_v27 }
0x1c23   :  { %2761 = vrot.lane.b32.xlu1 %v2755_v26, %s5588_s4  ;;  %v2759_v43 = vmul.f32 %v2757_v38, %v2755_v26 }
0x1c91   :  { %v2734_v10 = vpop.permute.xlu0 %2733 }
0x1c92   :  { %v2736_v30 = vmul.f32 %v2734_v10, %v2727_v54 }
0x1c94   :  { %2738 = vrot.lane.b32.xlu0 %v2736_v30, %s5589_s25 }
0x1c95   :  { %v2762_v22 = vpop.permute.xlu1 %2761 }
0x1c96   :  { %v2764_v51 = vmul.f32 %v2762_v22, %v2755_v26 }
0x1c98   :  { %2766 = vrot.lane.b32.xlu1 %v2764_v51, %s5589_s25 }
0x1d06   :  { %v2739_v37 = vpop.permute.xlu0 %2738 }
0x1d07   :  { %v6359_v40 = vadd.f32 %v2739_v37, %v2731_v33 }
0x1d09   :  { %5337 = vtanh.f32 %v6359_v40  ;;  %v2945_v19 = vrot.slane %v6359_v40, 6 }
0x1d0a   :  { %v2767_v35 = vpop.permute.xlu1 %2766 }
0x1d0b   :  { %v6362_v44 = vadd.f32 %v2767_v35, %v2759_v43 }
0x1d0d   :  { %5339 = vtanh.f32 %v6362_v44 }
0x1d13   :  { %v5338_v45 = vpop.eup %5337 }
0x1d14   :  { %2744 = vrot.lane.b32.xlu0 %v5338_v45, %s5588_s4 }
0x1d17   :  { %v5340_v48 = vpop.eup %5339 }
0x1d18   :  { %2772 = vrot.lane.b32.xlu1 %v5340_v48, %s5588_s4 }
0x1d86   :  { %v2745_v49 = vpop.permute.xlu0 %2744 }
0x1d87   :  { %v2747_v52 = vmul.f32 %v2745_v49, %v2727_v54  ;;  %v2973_v54 = vrot.slane %v6362_v44, 2 }
0x1d89   :  { %v2777_v55 = vrot.slane %v2747_v52, 2 }
0x1d8a   :  { %v2773_v34 = vpop.permute.xlu1 %2772 }
0x1d8b   :  { %v2775_v50 = vmul.f32 %v2773_v34, %v2755_v26  ;;  %2778 = vrot.lane.b32.xlu0 %v2777_v55, %s5589_s25 }
0x1d8d   :  { %v2857_v57 = vrot.slane %v2775_v50, 4 }
0x1d8f   :  { %2858 = vrot.lane.b32.xlu1 %v2857_v57, %s5589_s25 }
0x1dfd   :  { %v2779_v47 = vpop.permute.xlu0 %2778 }
0x1dfe   :  { %4764 = vmatmul.mubr.msk.f32.vlgmr.msra.gmra.mrb[24].mxu1 %vm410_vm8, %v2779_v47 }
0x1dff   :  { %5096 = vmatpush3.bf16.msra.mxu1 %v6253_v8  ;;  %4785 = vmatprep.mubr.msk.f32.mxu1 %vm5587_vm4, %v5585_v24 }
0x1e00   :  { %5097 = vmatprep.subr.bf16.mxu1 %v5586_v28 }
0x1e01   :  { %v2859_v58 = vpop.permute.xlu1 %2858 }
0x1e02   :  { %4775 = vmatmul.mubr.msk.f32.vlgmr.msra.gmra.mrb[26].mxu0 %vm410_vm8, %v2859_v58 }
0x1e03   :  { %5099 = vmatpush3.bf16.msra.mxu1 %v6271_v53  ;;  %5102 = vmatpush3.bf16.msra.mxu0 %v6255_v9 }
0x1e04   :  { %5103 = vmatprep.subr.bf16.mxu0 %v5586_v28  ;;  %4796 = vmatprep.mubr.msk.f32.mxu0 %vm5587_vm4, %v5585_v24 }
0x1e05   :  { %5106 = vmatprep.subr.bf16.mxu1 %v5586_v28 }
0x1e07   :  { %5105 = vmatpush3.bf16.msra.mxu0 %v6273_v56 }
0x1e08   :  { %5112 = vmatprep.subr.bf16.mxu0 %v5586_v28 }
0x1ed1   :  { %v2848_v59 = vpop.f32.mrb[24].mxu1 }
0x1ed2   :  { %v2853_v60 = vrot.slane %v2848_v59, 4  ;;  %v4765_v41 = vpop.f32.mrb[25].mxu1 }
0x1ed4   :  { %v2855_v42 = vadd.f32 %v2853_v60, %v6309_v21 }
0x1ed5   :  { %v2928_v61 = vpop.f32.mrb[26].mxu0 }
0x1ed6   :  { %v4233_v62 = vmul.f32 -1.442695, %v2855_v42  ;;  %v2933_v29 = vrot.slane %v2928_v61, 6  ;;  %v4776_v63 = vpop.f32.mrb[27].mxu0 }
0x1ed8   :  { %5341 = vpow2.f32 %v4233_v62  ;;  %v2935_v1 = vadd.f32 %v2933_v29, %v6311_v23 }
0x1eda   :  { %v4234_v2 = vmul.f32 -1.442695, %v2935_v1 }
0x1edc   :  { %5343 = vpow2.f32 %v4234_v2 }
0x1edd   :  { %5345 = vtanh.f32 %v2855_v42 }
0x1ee2   :  { %v5342_v5 = vpop.eup %5341 }
0x1ee3   :  { %v2940_v6 = vadd.f32 1.0, %v5342_v5 }
0x1ee5   :  { %5347 = vrcp.f32 %v2940_v6 }
0x1ee6   :  { %v5344_v7 = vpop.eup %5343  ;;  %5349 = vtanh.f32 %v2935_v1 }
0x1ee7   :  { %v2968_v11 = vadd.f32 1.0, %v5344_v7  ;;  %v5346_v12 = vpop.eup %5345 }
0x1ee9   :  { %5351 = vrcp.f32 %v2968_v11 }
0x1eef   :  { %v5348_v13 = vpop.eup %5347 }
0x1ef0   :  { %v2943_v46 = vsel %vm5865_vm7, %v5346_v12, %v5348_v13  ;;  %v5350_v31 = vpop.eup %5349 }
0x1ef1   :  { %2949 = vrot.lane.b32.xlu0 %v2943_v46, %s5588_s4  ;;  %v2947_v0 = vmul.f32 %v2945_v19, %v2943_v46 }
0x1ef3   :  { %v5352_v36 = vpop.eup %5351 }
0x1ef4   :  { %v2971_v3 = vsel %vm5865_vm7, %v5350_v31, %v5352_v36 }
0x1ef5   :  { %2977 = vrot.lane.b32.xlu1 %v2971_v3, %s5588_s4  ;;  %v2975_v27 = vmul.f32 %v2973_v54, %v2971_v3 }
0x1f63   :  { %v2950_v14 = vpop.permute.xlu0 %2949 }
0x1f64   :  { %v2952_v15 = vmul.f32 %v2950_v14, %v2943_v46 }
0x1f66   :  { %2954 = vrot.lane.b32.xlu0 %v2952_v15, %s5589_s25 }
0x1f67   :  { %v2978_v16 = vpop.permute.xlu1 %2977 }
0x1f68   :  { %v2980_v17 = vmul.f32 %v2978_v16, %v2971_v3 }
0x1f6a   :  { %2982 = vrot.lane.b32.xlu1 %v2980_v17, %s5589_s25 }
0x1fd8   :  { %v2955_v25 = vpop.permute.xlu0 %2954 }
0x1fd9   :  { %v6395_v39 = vadd.f32 %v2955_v25, %v2947_v0 }
0x1fdb   :  { %5353 = vtanh.f32 %v6395_v39  ;;  %v3158_v5 = vrot.slane %v6395_v39, 6 }
0x1fdc   :  { %v2983_v26 = vpop.permute.xlu1 %2982 }
0x1fdd   :  { %v6398_v10 = vadd.f32 %v2983_v26, %v2975_v27 }
0x1fdf   :  { %5355 = vtanh.f32 %v6398_v10  ;;  %v3186_v6 = vrot.slane %v6398_v10, 2 }
0x1fe5   :  { %v5354_v30 = vpop.eup %5353 }
0x1fe6   :  { %2960 = vrot.lane.b32.xlu0 %v5354_v30, %s5588_s4 }
0x1fe9   :  { %v5356_v22 = vpop.eup %5355 }
0x1fea   :  { %2988 = vrot.lane.b32.xlu1 %v5356_v22, %s5588_s4 }
0x2058   :  { %v2961_v51 = vpop.permute.xlu0 %2960 }
0x2059   :  { %v2963_v32 = vmul.f32 %v2961_v51, %v2943_v46 }
0x205b   :  { %v2993_v33 = vrot.slane %v2963_v32, 4 }
0x205c   :  { %v2989_v37 = vpop.permute.xlu1 %2988 }
0x205d   :  { %v2991_v38 = vmul.f32 %v2989_v37, %v2971_v3  ;;  %2994 = vrot.lane.b32.xlu0 %v2993_v33, %s5589_s25 }
0x205f   :  { %v3073_v40 = vrot.slane %v2991_v38, 2 }
0x2061   :  { %3074 = vrot.lane.b32.xlu1 %v3073_v40, %s5589_s25 }
0x20cf   :  { %v2995_v43 = vpop.permute.xlu0 %2994 }
0x20d0   :  { %4786 = vmatmul.mubr.msk.f32.vlgmr.msra.gmra.mrb[26].mxu1 %vm410_vm8, %v2995_v43 }
0x20d1   :  { %5108 = vmatpush3.bf16.msra.mxu1 %v6253_v8  ;;  %4807 = vmatprep.mubr.msk.f32.mxu1 %vm5587_vm4, %v5585_v24 }
0x20d2   :  { %5109 = vmatprep.subr.bf16.mxu1 %v5586_v28 }
0x20d3   :  { %v3075_v35 = vpop.permute.xlu1 %3074 }
0x20d4   :  { %4797 = vmatmul.mubr.msk.f32.vlgmr.msra.gmra.mrb[28].mxu0 %vm410_vm8, %v3075_v35 }
0x20d5   :  { %5114 = vmatpush3.bf16.msra.mxu0 %v6255_v9  ;;  %5111 = vmatpush3.bf16.msra.mxu1 %v6271_v53 }
0x20d6   :  { %5115 = vmatprep.subr.bf16.mxu0 %v5586_v28  ;;  %4818 = vmatprep.mubr.msk.f32.mxu0 %vm5587_vm4, %v5585_v24 }
0x20d7   :  { %5118 = vmatprep.subr.bf16.mxu1 %v5586_v28 }
0x20d9   :  { %5117 = vmatpush3.bf16.msra.mxu0 %v6273_v56 }
0x20da   :  { %5124 = vmatprep.subr.bf16.mxu0 %v5586_v28 }
0x21a3   :  { %v3064_v44 = vpop.f32.mrb[26].mxu1 }
0x21a4   :  { %v3069_v45 = vrot.slane %v3064_v44, 2  ;;  %v4787_v48 = vpop.f32.mrb[27].mxu1 }
0x21a6   :  { %v3071_v49 = vadd.f32 %v3069_v45, %v6309_v21 }
0x21a7   :  { %v3144_v52 = vpop.f32.mrb[28].mxu0 }
0x21a8   :  { %v4237_v55 = vmul.f32 -1.442695, %v3071_v49  ;;  %v3148_v34 = vadd.f32 %v3144_v52, %v6311_v23  ;;  %v4798_v50 = vpop.f32.mrb[29].mxu0 }
0x21aa   :  { %5357 = vpow2.f32 %v4237_v55  ;;  %v4238_v57 = vmul.f32 -1.442695, %v3148_v34 }
0x21ac   :  { %5359 = vpow2.f32 %v4238_v57 }
0x21ad   :  { %5361 = vtanh.f32 %v3071_v49 }
0x21b4   :  { %v5358_v47 = vpop.eup %5357 }
0x21b5   :  { %v3153_v58 = vadd.f32 1.0, %v5358_v47 }
0x21b6   :  { %v5360_v59 = vpop.eup %5359 }
0x21b7   :  { %5363 = vrcp.f32 %v3153_v58  ;;  %v3181_v60 = vadd.f32 1.0, %v5360_v59  ;;  %v5362_v41 = vpop.eup %5361 }
0x21b8   :  { %5365 = vtanh.f32 %v3148_v34 }
0x21b9   :  { %5367 = vrcp.f32 %v3181_v60 }
0x21c1   :  { %v5364_v42 = vpop.eup %5363 }
0x21c2   :  { %v5366_v61 = vpop.eup %5365  ;;  %v3156_v21 = vsel %vm5865_vm7, %v5362_v41, %v5364_v42 }
0x21c3   :  { %v5368_v62 = vpop.eup %5367  ;;  %3162 = vrot.lane.b32.xlu1 %v3156_v21, %s5588_s4  ;;  %v3160_v7 = vmul.f32 %v3158_v5, %v3156_v21 }
0x21c4   :  { %v3184_v23 = vsel %vm5865_vm7, %v5366_v61, %v5368_v62 }
0x21c5   :  { %3190 = vrot.lane.b32.xlu0 %v3184_v23, %s5588_s4  ;;  %v3188_v13 = vmul.f32 %v3186_v6, %v3184_v23 }
0x2235   :  { %v3163_v29 = vpop.permute.xlu1 %3162 }
0x2236   :  { %v3165_v63 = vmul.f32 %v3163_v29, %v3156_v21 }
0x2237   :  { %v3191_v1 = vpop.permute.xlu0 %3190 }
0x2238   :  { %v3193_v2 = vmul.f32 %v3191_v1, %v3184_v23  ;;  %3167 = vrot.lane.b32.xlu1 %v3165_v63, %s5589_s25 }
0x223a   :  { %3195 = vrot.lane.b32.xlu0 %v3193_v2, %s5589_s25 }
0x22aa   :  { %v3168_v11 = vpop.permute.xlu1 %3167 }
0x22ab   :  { %v6431_v12 = vadd.f32 %v3168_v11, %v3160_v7 }
0x22ac   :  { %v3196_v46 = vpop.permute.xlu0 %3195 }
0x22ad   :  { %5369 = vtanh.f32 %v6431_v12  ;;  %v6434_v31 = vadd.f32 %v3196_v46, %v3188_v13  ;;  %v3370_v57 = vrot.slane %v6431_v12, 6 }
0x22af   :  { %5371 = vtanh.f32 %v6434_v31  ;;  %v3398_v47 = vrot.slane %v6434_v31, 2 }
0x22b7   :  { %v5370_v36 = vpop.eup %5369 }
0x22b8   :  { %3173 = vrot.lane.b32.xlu1 %v5370_v36, %s5588_s4 }
0x22b9   :  { %v5372_v3 = vpop.eup %5371 }
0x22ba   :  { %3201 = vrot.lane.b32.xlu0 %v5372_v3, %s5588_s4 }
0x232a   :  { %v3174_v14 = vpop.permute.xlu1 %3173 }
0x232b   :  { %v3176_v15 = vmul.f32 %v3174_v14, %v3156_v21 }
0x232c   :  { %v3202_v16 = vpop.permute.xlu0 %3201 }
0x232d   :  { %v3206_v17 = vrot.slane %v3176_v15, 6  ;;  %v3204_v19 = vmul.f32 %v3202_v16, %v3184_v23 }
0x232f   :  { %3207 = vrot.lane.b32.xlu1 %v3206_v17, %s5589_s25  ;;  %3283 = vrot.lane.b32.xlu0 %v3204_v19, %s5589_s25 }
0x23a1   :  { %v3208_v0 = vpop.permute.xlu1 %3207  ;;  %v3284_v25 = vpop.permute.xlu0 %3283 }
0x23a2   :  { %4808 = vmatmul.mubr.msk.f32.vlgmr.msra.gmra.mrb[28].mxu1 %vm410_vm8, %v3208_v0  ;;  %4819 = vmatmul.mubr.msk.f32.vlgmr.msra.gmra.mrb[30].mxu0 %vm410_vm8, %v3284_v25 }
0x23a3   :  { %5120 = vmatpush3.bf16.msra.mxu1 %v6253_v8  ;;  %5126 = vmatpush3.bf16.msra.mxu0 %v6255_v9 }
0x23a4   :  { %5121 = vmatprep.subr.bf16.mxu1 %v5586_v28  ;;  %4829 = vmatprep.mubr.msk.f32.mxu1 %vm5587_vm4, %v5585_v24 }
0x23a5   :  { %5127 = vmatprep.subr.bf16.mxu0 %v5586_v28  ;;  %4840 = vmatprep.mubr.msk.f32.mxu0 %vm5587_vm4, %v5585_v24 }
0x23a7   :  { %5123 = vmatpush3.bf16.msra.mxu1 %v6271_v53  ;;  %5129 = vmatpush3.bf16.msra.mxu0 %v6273_v56 }
0x23a8   :  { %5130 = vmatprep.subr.bf16.mxu1 %v5586_v28  ;;  %5136 = vmatprep.subr.bf16.mxu0 %v5586_v28 }
0x2475   :  { %v3277_v54 = vpop.f32.mrb[28].mxu1  ;;  %v3353_v39 = vpop.f32.mrb[30].mxu0 }
0x2476   :  { %v3281_v27 = vadd.f32 %v3277_v54, %v6305_v18  ;;  %v3358_v26 = vrot.slane %v3353_v39, 2  ;;  %v4809_v10 = vpop.f32.mrb[29].mxu1  ;;  %v4820_v30 = vpop.f32.mrb[31].mxu0 }
0x2478   :  { %v4241_v22 = vmul.f32 -1.442695, %v3281_v27  ;;  %v3360_v51 = vadd.f32 %v3358_v26, %v6307_v20 }
0x247a   :  { %5373 = vpow2.f32 %v4241_v22  ;;  %v4242_v32 = vmul.f32 -1.442695, %v3360_v51 }
0x247c   :  { %5375 = vpow2.f32 %v4242_v32 }
0x247d   :  { %5377 = vtanh.f32 %v3281_v27 }
0x2484   :  { %v5374_v33 = vpop.eup %5373 }
0x2485   :  { %v3365_v37 = vadd.f32 1.0, %v5374_v33 }
0x2486   :  { %v5376_v38 = vpop.eup %5375 }
0x2487   :  { %5379 = vrcp.f32 %v3365_v37  ;;  %v3393_v40 = vadd.f32 1.0, %v5376_v38  ;;  %v5378_v43 = vpop.eup %5377 }
0x2488   :  { %5381 = vtanh.f32 %v3360_v51 }
0x2489   :  { %5383 = vrcp.f32 %v3393_v40 }
0x2491   :  { %v5380_v35 = vpop.eup %5379 }
0x2492   :  { %v5382_v44 = vpop.eup %5381  ;;  %v3368_v45 = vsel %vm5865_vm7, %v5378_v43, %v5380_v35 }
0x2493   :  { %v5384_v48 = vpop.eup %5383  ;;  %3374 = vrot.lane.b32.xlu1 %v3368_v45, %s5588_s4  ;;  %v3372_v58 = vmul.f32 %v3370_v57, %v3368_v45 }
0x2494   :  { %v3396_v49 = vsel %vm5865_vm7, %v5382_v44, %v5384_v48 }
0x2495   :  { %3402 = vrot.lane.b32.xlu0 %v3396_v49, %s5588_s4  ;;  %v3400_v41 = vmul.f32 %v3398_v47, %v3396_v49 }
0x2505   :  { %v3375_v52 = vpop.permute.xlu1 %3374 }
0x2506   :  { %v3377_v55 = vmul.f32 %v3375_v52, %v3368_v45 }
0x2507   :  { %v3403_v34 = vpop.permute.xlu0 %3402 }
0x2508   :  { %v3405_v50 = vmul.f32 %v3403_v34, %v3396_v49  ;;  %3379 = vrot.lane.b32.xlu1 %v3377_v55, %s5589_s25 }
0x250a   :  { %3407 = vrot.lane.b32.xlu0 %v3405_v50, %s5589_s25 }
0x257a   :  { %v3380_v59 = vpop.permute.xlu1 %3379 }
0x257b   :  { %v6467_v60 = vadd.f32 %v3380_v59, %v3372_v58 }
0x257c   :  { %v3408_v42 = vpop.permute.xlu0 %3407 }
0x257d   :  { %5385 = vtanh.f32 %v6467_v60  ;;  %v6470_v61 = vadd.f32 %v3408_v42, %v3400_v41  ;;  %v3585_v33 = vrot.slane %v6467_v60, 6 }
0x257f   :  { %5387 = vtanh.f32 %v6470_v61  ;;  %v3613_v40 = vrot.slane %v6470_v61, 2 }
0x2587   :  { %v5386_v21 = vpop.eup %5385 }
0x2588   :  { %3385 = vrot.lane.b32.xlu1 %v5386_v21, %s5588_s4 }
0x2589   :  { %v5388_v62 = vpop.eup %5387 }
0x258a   :  { %3413 = vrot.lane.b32.xlu0 %v5388_v62, %s5588_s4 }
0x25fa   :  { %v3386_v23 = vpop.permute.xlu1 %3385 }
0x25fb   :  { %v3388_v29 = vmul.f32 %v3386_v23, %v3368_v45 }
0x25fc   :  { %v3414_v63 = vpop.permute.xlu0 %3413 }
0x25fd   :  { %v3416_v1 = vmul.f32 %v3414_v63, %v3396_v49  ;;  %3418 = vrot.lane.b32.xlu0 %v3388_v29, %s5589_s25 }
0x25ff   :  { %v3497_v2 = vrot.slane %v3416_v1, 6 }
0x2601   :  { %3498 = vrot.lane.b32.xlu1 %v3497_v2, %s5589_s25 }
0x266f   :  { %v3419_v5 = vpop.permute.xlu0 %3418 }
0x2670   :  { %4830 = vmatmul.mubr.msk.f32.vlgmr.msra.gmra.mrb[30].mxu1 %vm410_vm8, %v3419_v5 }
0x2671   :  { %5132 = vmatpush3.bf16.msra.mxu1 %v6253_v8  ;;  %4851 = vmatprep.mubr.msk.f32.mxu1 %vm5587_vm4, %v5585_v24 }
0x2672   :  { %5133 = vmatprep.subr.bf16.mxu1 %v5586_v28 }
0x2673   :  { %v3499_v6 = vpop.permute.xlu1 %3498 }
0x2674   :  { %4841 = vmatmul.mubr.msk.f32.vlgmr.msra.gmra.mrb[32].mxu0 %vm410_vm8, %v3499_v6 }
0x2675   :  { %5135 = vmatpush3.bf16.msra.mxu1 %v6271_v53  ;;  %5138 = vmatpush3.bf16.msra.mxu0 %v6255_v9 }
0x2676   :  { %5139 = vmatprep.subr.bf16.mxu0 %v5586_v28  ;;  %4862 = vmatprep.mubr.msk.f32.mxu0 %vm5587_vm4, %v5585_v24 }
0x2677   :  { %5142 = vmatprep.subr.bf16.mxu1 %v5586_v28 }
0x2679   :  { %5141 = vmatpush3.bf16.msra.mxu0 %v6273_v56 }
0x267a   :  { %5148 = vmatprep.subr.bf16.mxu0 %v5586_v28 }
0x2743   :  { %v3488_v7 = vpop.f32.mrb[30].mxu1 }
0x2744   :  { %v3493_v11 = vrot.slane %v3488_v7, 6  ;;  %v4831_v12 = vpop.f32.mrb[31].mxu1 }
0x2746   :  { %v3495_v13 = vadd.f32 %v3493_v11, %v6305_v18 }
0x2747   :  { %v3568_v46 = vpop.f32.mrb[32].mxu0 }
0x2748   :  { %v4245_v31 = vmul.f32 -1.442695, %v3495_v13  ;;  %v3573_v36 = vrot.slane %v3568_v46, 4  ;;  %v4842_v3 = vpop.f32.mrb[33].mxu0 }
0x274a   :  { %5389 = vpow2.f32 %v4245_v31  ;;  %v3575_v14 = vadd.f32 %v3573_v36, %v6307_v20 }
0x274c   :  { %v4246_v15 = vmul.f32 -1.442695, %v3575_v14 }
0x274e   :  { %5391 = vpow2.f32 %v4246_v15 }
0x274f   :  { %5393 = vtanh.f32 %v3495_v13 }
0x2754   :  { %v5390_v16 = vpop.eup %5389 }
0x2755   :  { %v3580_v17 = vadd.f32 1.0, %v5390_v16 }
0x2757   :  { %5395 = vrcp.f32 %v3580_v17 }
0x2758   :  { %v5392_v19 = vpop.eup %5391  ;;  %5397 = vtanh.f32 %v3575_v14 }
0x2759   :  { %v3608_v0 = vadd.f32 1.0, %v5392_v19  ;;  %v5394_v25 = vpop.eup %5393 }
0x275b   :  { %5399 = vrcp.f32 %v3608_v0 }
0x2761   :  { %v5396_v54 = vpop.eup %5395 }
0x2762   :  { %v3583_v39 = vsel %vm5865_vm7, %v5394_v25, %v5396_v54  ;;  %v5398_v27 = vpop.eup %5397 }
0x2763   :  { %3589 = vrot.lane.b32.xlu0 %v3583_v39, %s5588_s4  ;;  %v3587_v37 = vmul.f32 %v3585_v33, %v3583_v39 }
0x2765   :  { %v5400_v26 = vpop.eup %5399 }
0x2766   :  { %v3611_v10 = vsel %vm5865_vm7, %v5398_v27, %v5400_v26 }
0x2767   :  { %3617 = vrot.lane.b32.xlu1 %v3611_v10, %s5588_s4  ;;  %v3615_v35 = vmul.f32 %v3613_v40, %v3611_v10 }
0x27d5   :  { %v3590_v30 = vpop.permute.xlu0 %3589 }
0x27d6   :  { %v3592_v22 = vmul.f32 %v3590_v30, %v3583_v39 }
0x27d8   :  { %3594 = vrot.lane.b32.xlu0 %v3592_v22, %s5589_s25 }
0x27d9   :  { %v3618_v51 = vpop.permute.xlu1 %3617 }
0x27da   :  { %v3620_v32 = vmul.f32 %v3618_v51, %v3611_v10 }
0x27dc   :  { %3622 = vrot.lane.b32.xlu1 %v3620_v32, %s5589_s25 }
0x284a   :  { %v3595_v38 = vpop.permute.xlu0 %3594 }
0x284b   :  { %v6503_v43 = vadd.f32 %v3595_v38, %v3587_v37 }
0x284d   :  { %5401 = vtanh.f32 %v6503_v43  ;;  %v3801_v3 = vrot.slane %v6503_v43, 6 }
0x284e   :  { %v3623_v44 = vpop.permute.xlu1 %3622 }
0x284f   :  { %v6506_v45 = vadd.f32 %v3623_v44, %v3615_v35 }
0x2851   :  { %5403 = vtanh.f32 %v6506_v45  ;;  %v3829_v16 = vrot.slane %v6506_v45, 2 }
0x2857   :  { %v5402_v48 = vpop.eup %5401 }
0x2858   :  { %3600 = vrot.lane.b32.xlu0 %v5402_v48, %s5588_s4 }
0x285b   :  { %v5404_v49 = vpop.eup %5403 }
0x285c   :  { %3628 = vrot.lane.b32.xlu1 %v5404_v49, %s5588_s4 }
0x28ca   :  { %v3601_v52 = vpop.permute.xlu0 %3600 }
0x28cb   :  { %v3603_v55 = vmul.f32 %v3601_v52, %v3583_v39 }
0x28cd   :  { %v3633_v34 = vrot.slane %v3603_v55, 2 }
0x28ce   :  { %v3629_v50 = vpop.permute.xlu1 %3628 }
0x28cf   :  { %v3631_v57 = vmul.f32 %v3629_v50, %v3611_v10  ;;  %3634 = vrot.lane.b32.xlu0 %v3633_v34, %s5589_s25 }
0x28d1   :  { %v3713_v47 = vrot.slane %v3631_v57, 4 }
0x28d3   :  { %3714 = vrot.lane.b32.xlu1 %v3713_v47, %s5589_s25 }
0x2941   :  { %v3635_v58 = vpop.permute.xlu0 %3634 }
0x2942   :  { %4852 = vmatmul.mubr.msk.f32.vlgmr.msra.gmra.mrb[32].mxu1 %vm410_vm8, %v3635_v58 }
0x2943   :  { %5144 = vmatpush3.bf16.msra.mxu1 %v6253_v8  ;;  %4873 = vmatprep.mubr.msk.f32.mxu1 %vm5587_vm4, %v5585_v24 }
0x2944   :  { %5145 = vmatprep.subr.bf16.mxu1 %v5586_v28 }
0x2945   :  { %v3715_v59 = vpop.permute.xlu1 %3714 }
0x2946   :  { %4863 = vmatmul.mubr.msk.f32.vlgmr.msra.gmra.mrb[34].mxu0 %vm410_vm8, %v3715_v59 }
0x2947   :  { %5147 = vmatpush3.bf16.msra.mxu1 %v6271_v53  ;;  %5150 = vmatpush3.bf16.msra.mxu0 %v6255_v9 }
0x2948   :  { %5151 = vmatprep.subr.bf16.mxu0 %v5586_v28  ;;  %4884 = vmatprep.mubr.msk.f32.mxu0 %vm5587_vm4, %v5585_v24 }
0x2949   :  { %5154 = vmatprep.subr.bf16.mxu1 %v5586_v28 }
0x294b   :  { %5153 = vmatpush3.bf16.msra.mxu0 %v6273_v56 }
0x2a15   :  { %v3704_v8 = vpop.f32.mrb[32].mxu1 }
0x2a16   :  { %v3709_v60 = vrot.slane %v3704_v8, 4  ;;  %v4853_v41 = vpop.f32.mrb[33].mxu1 }
0x2a18   :  { %v3711_v42 = vadd.f32 %v3709_v60, %v6305_v18 }
0x2a19   :  { %v3784_v61 = vpop.f32.mrb[34].mxu0 }
0x2a1a   :  { %v4249_v21 = vmul.f32 -1.442695, %v3711_v42  ;;  %v3789_v62 = vrot.slane %v3784_v61, 6  ;;  %v4864_v53 = vpop.f32.mrb[35].mxu0 }
0x2a1c   :  { %5405 = vpow2.f32 %v4249_v21  ;;  %v3791_v9 = vadd.f32 %v3789_v62, %v6307_v20 }
0x2a1e   :  { %v4250_v23 = vmul.f32 -1.442695, %v3791_v9 }
0x2a20   :  { %5407 = vpow2.f32 %v4250_v23 }
0x2a21   :  { %5409 = vtanh.f32 %v3711_v42 }
0x2a26   :  { %v5406_v29 = vpop.eup %5405 }
0x2a27   :  { %v3796_v63 = vadd.f32 1.0, %v5406_v29  ;;  %v4071_v29 = vld [vmem:[%s6615_s14] sm:$0xff] }
0x2a29   :  { %5411 = vrcp.f32 %v3796_v63  ;;  %v4072_v63 = vld [vmem:[%s6615_s14 + $0x8] sm:$0xff] }
0x2a2a   :  { %v5408_v1 = vpop.eup %5407  ;;  %5413 = vtanh.f32 %v3791_v9 }
0x2a2b   :  { %v3824_v56 = vadd.f32 1.0, %v5408_v1  ;;  %v5410_v2 = vpop.eup %5409  ;;  %v4073_v1 = vld [vmem:[%s6615_s14 + $0x10] sm:$0xff] }
0x2a2d   :  { %5415 = vrcp.f32 %v3824_v56  ;;  %v5155_v56 = vpack.c.bf16 %v4072_v63, %v4071_v29 }
0x2a33   :  { %v5412_v5 = vpop.eup %5411 }
0x2a34   :  { %v3799_v6 = vsel %vm5865_vm7, %v5410_v2, %v5412_v5  ;;  %v5414_v7 = vpop.eup %5413  ;;  %v4074_v2 = vld [vmem:[%s6615_s14 + $0x18] sm:$0xff] }
0x2a35   :  { %3805 = vrot.lane.b32.xlu0 %v3799_v6, %s5588_s4  ;;  %v3803_v14 = vmul.f32 %v3801_v3, %v3799_v6  ;;  %v5158_v5 = vpack.c.bf16 %v4074_v2, %v4073_v1 }
0x2a37   :  { %v5416_v11 = vpop.eup %5415 }
0x2a38   :  { %v3827_v12 = vsel %vm5865_vm7, %v5414_v7, %v5416_v11  ;;  %v4075_v11 = vld [vmem:[%s6615_s14 + $0x20] sm:$0xff] }
0x2a39   :  { %3833 = vrot.lane.b32.xlu1 %v3827_v12, %s5588_s4  ;;  %v3831_v19 = vmul.f32 %v3829_v16, %v3827_v12 }
0x2aa7   :  { %v3806_v13 = vpop.permute.xlu0 %3805 }
0x2aa8   :  { %v3808_v46 = vmul.f32 %v3806_v13, %v3799_v6 }
0x2aaa   :  { %3810 = vrot.lane.b32.xlu0 %v3808_v46, %s5589_s25  ;;  %v4077_v46 = vld [vmem:[%s6615_s14 + $0x30] sm:$0xff] }
0x2aab   :  { %v3834_v31 = vpop.permute.xlu1 %3833 }
0x2aac   :  { %v3836_v36 = vmul.f32 %v3834_v31, %v3827_v12  ;;  %v4078_v31 = vld [vmem:[%s6615_s14 + $0x38] sm:$0xff] }
0x2aae   :  { %3838 = vrot.lane.b32.xlu1 %v3836_v36, %s5589_s25  ;;  %v5164_v36 = vpack.c.bf16 %v4078_v31, %v4077_v46 }
0x2b1c   :  { %v3811_v15 = vpop.permute.xlu0 %3810 }
0x2b1d   :  { %v3813_v17 = vadd.f32 %v3811_v15, %v3803_v14 }
0x2b1f   :  { %5417 = vtanh.f32 %v3813_v17  ;;  %v4014_v42 = vrot.slane %v3813_v17, 6 }
0x2b20   :  { %v3839_v0 = vpop.permute.xlu1 %3838 }
0x2b21   :  { %v3841_v25 = vadd.f32 %v3839_v0, %v3831_v19 }
0x2b23   :  { %5419 = vtanh.f32 %v3841_v25  ;;  %v4042_v61 = vrot.slane %v3841_v25, 2 }
0x2b29   :  { %v5418_v54 = vpop.eup %5417 }
0x2b2a   :  { %3816 = vrot.lane.b32.xlu0 %v5418_v54, %s5588_s4  ;;  %v4255_v54 = vld [vmem:[#allocation10] ss:$0 sm:$0xff] }
0x2b2d   :  { %v5420_v39 = vpop.eup %5419 }
0x2b2e   :  { %3844 = vrot.lane.b32.xlu1 %v5420_v39, %s5588_s4 }
0x2b9c   :  { %v3817_v27 = vpop.permute.xlu0 %3816 }
0x2b9d   :  { %v3819_v26 = vmul.f32 %v3817_v27, %v3799_v6 }
0x2b9f   :  { %v3849_v10 = vrot.slane %v3819_v26, 4 }
0x2ba0   :  { %v3845_v30 = vpop.permute.xlu1 %3844 }
0x2ba1   :  { %v3847_v22 = vmul.f32 %v3845_v30, %v3827_v12  ;;  %3850 = vrot.lane.b32.xlu0 %v3849_v10, %s5589_s25  ;;  %v4076_v12 = vld [vmem:[%s6615_s14 + $0x28] sm:$0xff]  ;;  %s5590_s14 = smov [#allocation11]  }
0x2ba2   :  { %v5161_v13 = vpack.c.bf16 %v4076_v12, %v4075_v11  ;;  %s4168_s11 = sshll.u32 %s5590_s14, 4  ;;  %s4169_s11 = int_to_ptr.vmem [resolvable:$true] %s4168_s11 }
0x2ba3   :  { %v3929_v51 = vrot.slane %v3847_v22, 2  ;;  %p5552_p13 = scmp.lt.s32.totalorder %s4169_s11, %s4169_s11 }
0x2ba5   :  { %3930 = vrot.lane.b32.xlu1 %v3929_v51, %s5589_s25 }
0x2c13   :  { %v3851_v32 = vpop.permute.xlu0 %3850 }
0x2c14   :  { %4874 = vmatmul.mubr.msk.f32.vlgmr.msra.gmra.mrb[34].mxu1 %vm410_vm8, %v3851_v32 }
0x2c15   :  { %4903 = vmatprep.mubr.msk.f32.mxu1 %vm5587_vm4, %v5585_v24  ;;  %5156 = vmatpush3.bf16.msra.mxu1 %v5155_v56 }
0x2c16   :  { %5157 = vmatprep.subr.bf16.mxu1 %v5586_v28 }
0x2c17   :  { %v3931_v33 = vpop.permute.xlu1 %3930 }
0x2c18   :  { %4885 = vmatmul.mubr.msk.f32.vlgmr.msra.gmra.mrb[36].mxu0 %vm410_vm8, %v3931_v33 }
0x2c19   :  { %5159 = vmatpush3.bf16.msra.mxu1 %v5158_v5 }
0x2c1a   :  { %5160 = vmatprep.subr.bf16.mxu1 %v5586_v28 }
0x2c1d   :  { %5162 = vmatpush3.bf16.msra.mxu1 %v5161_v13 }
0x2c1e   :  { %5163 = vmatprep.subr.bf16.mxu1 %v5586_v28 }
0x2c21   :  { %5165 = vmatpush3.bf16.msra.mxu1 %v5164_v36 }
0x2ce7   :  { %v3920_v37 = vpop.f32.mrb[34].mxu1 }
0x2ce8   :  { %v3925_v38 = vrot.slane %v3920_v37, 2  ;;  %v4875_v40 = vpop.f32.mrb[35].mxu1 }
0x2cea   :  { %v3927_v43 = vadd.f32 %v3925_v38, %v6305_v18 }
0x2ceb   :  { %v4000_v35 = vpop.f32.mrb[36].mxu0 }
0x2cec   :  { %v4253_v44 = vmul.f32 -1.442695, %v3927_v43  ;;  %v4004_v45 = vadd.f32 %v4000_v35, %v6307_v20  ;;  %v4886_v48 = vpop.f32.mrb[37].mxu0 }
0x2cee   :  { %5421 = vpow2.f32 %v4253_v44  ;;  %v4254_v49 = vmul.f32 -1.442695, %v4004_v45 }
0x2cf0   :  { %5423 = vpow2.f32 %v4254_v49 }
0x2cf1   :  { %5425 = vtanh.f32 %v3927_v43 }
0x2cf8   :  { %v5422_v52 = vpop.eup %5421 }
0x2cf9   :  { %v4009_v55 = vadd.f32 1.0, %v5422_v52 }
0x2cfa   :  { %v5424_v34 = vpop.eup %5423 }
0x2cfb   :  { %5427 = vrcp.f32 %v4009_v55  ;;  %v4037_v24 = vadd.f32 1.0, %v5424_v34  ;;  %v5426_v50 = vpop.eup %5425 }
0x2cfc   :  { %5429 = vtanh.f32 %v4004_v45 }
0x2cfd   :  { %5431 = vrcp.f32 %v4037_v24 }
0x2d05   :  { %v5428_v57 = vpop.eup %5427 }
0x2d06   :  { %v5430_v47 = vpop.eup %5429  ;;  %v4012_v18 = vsel %vm5865_vm7, %v5426_v50, %v5428_v57 }
0x2d07   :  { %v5432_v58 = vpop.eup %5431  ;;  %4018 = vrot.lane.b32.xlu1 %v4012_v18, %s5588_s4  ;;  %v4016_v21 = vmul.f32 %v4014_v42, %v4012_v18 }
0x2d08   :  { %v4040_v20 = vsel %vm5865_vm7, %v5430_v47, %v5432_v58 }
0x2d09   :  { %4046 = vrot.lane.b32.xlu0 %v4040_v20, %s5588_s4  ;;  %v4044_v9 = vmul.f32 %v4042_v61, %v4040_v20 }
0x2d79   :  { %v4019_v59 = vpop.permute.xlu1 %4018 }
0x2d7a   :  { %v4021_v8 = vmul.f32 %v4019_v59, %v4012_v18 }
0x2d7b   :  { %v4047_v60 = vpop.permute.xlu0 %4046 }
0x2d7c   :  { %v4049_v41 = vmul.f32 %v4047_v60, %v4040_v20  ;;  %4023 = vrot.lane.b32.xlu1 %v4021_v8, %s5589_s25 }
0x2d7e   :  { %4051 = vrot.lane.b32.xlu0 %v4049_v41, %s5589_s25 }
0x2dee   :  { %v4024_v62 = vpop.permute.xlu1 %4023 }
0x2def   :  { %v4026_v53 = vadd.f32 %v4024_v62, %v4016_v21 }
0x2df0   :  { %v4052_v23 = vpop.permute.xlu0 %4051 }
0x2df1   :  { %5433 = vtanh.f32 %v4026_v53  ;;  %v4054_v4 = vadd.f32 %v4052_v23, %v4044_v9 }
0x2df3   :  { %5435 = vtanh.f32 %v4054_v4 }
0x2dfb   :  { %v5434_v6 = vpop.eup %5433 }
0x2dfc   :  { %4029 = vrot.lane.b32.xlu1 %v5434_v6, %s5588_s4 }
0x2dfd   :  { %v5436_v7 = vpop.eup %5435 }
0x2dfe   :  { %4057 = vrot.lane.b32.xlu0 %v5436_v7, %s5588_s4 }
0x2e6e   :  { %v4030_v3 = vpop.permute.xlu1 %4029 }
0x2e6f   :  { %v4032_v14 = vmul.f32 %v4030_v3, %v4012_v18 }
0x2e70   :  { %v4058_v15 = vpop.permute.xlu0 %4057 }
0x2e71   :  { %v4060_v16 = vmul.f32 %v4058_v15, %v4040_v20  ;;  %4062 = vrot.lane.b32.xlu0 %v4032_v14, %s5589_s25  ;;  %s5547_s25 = scalar_lea.vmem %s4169_s11, 32 }
0x2e72   :  { %p5548_p12 = scmp.ne.s32.totalorder %s4169_s11, %s5547_s25  ;;  %p5553_p0 = scmp.lt.s32.totalorder %s5547_s25, %s5547_s25 }
0x2e73   :  { %v4066_v17 = vrot.slane %v4060_v16, 2 }
0x2e74   :  { %p5554_p1 = por %p5553_p0, %p5552_p13 }
0x2e75   :  { %4067 = vrot.lane.b32.xlu1 %v4066_v17, %s5588_s4 }
0x2e76   :  { %p5555_p2 = pnand %p5554_p1, %p5548_p12 }
0x2ee3   :  { %v4063_v28 = vpop.permute.xlu0 %4062 }
0x2ee7   :  { %v4068_v19 = vpop.permute.xlu1 %4067 }
0x2ee8   :  { %v4070_v0 = vsel %vm410_vm8, %v4063_v28, %v4068_v19 }
0x2ee9   :  { %v4087_v25 = vrot.slane %v4070_v0, 6 }
0x2eeb   :  { %4904 = vmatmul.mubr.msk.f32.vlgmr.msra.gmra.mrb[36].mxu1 %vm142_vm0, %v4087_v25 }
0x2fbe   :  { %v4156_v39 = vpop.f32.mrb[36].mxu1 }
0x2fbf   :  { %v4157_v27 = vadd.f32 %v4255_v54, %v4156_v39  ;;  %v4905_v26 = vpop.f32.mrb[37].mxu1 }
0x2fc1   :  { %4161 = vst.msk [vmem:[#allocation11] sm:$0x3] %vm4160_vm12, %v4157_v27 }
0x2fc2   :  { %5558 = shalt.err (!%p5555_p2)
}
0x2fc3   :  { %s5559_s15 = scalar_lea.hbm %s6617_s16, 32 }
0x2fc4   :  { %p5560_p3 = scmp.ne.s32.totalorder %s6617_s16, %s5559_s15  ;;  %p5563_p4 = scmp.lt.u32.totalorder %s5559_s15, %s6617_s16 }
0x2fc6   :  { %p5565_p5 = pnand %p5563_p4, %p5560_p3 }
0x2fc8   :  { %5568 = shalt.err (!%p5565_p5)
}
0x2fc9   :  { %4171 = dma.vmem_to_hbm [thread:$0]  %s4169_s11, 32, %s6617_s16, [#allocation4]  }
0x2fca   :  { %5575 = dma.done.wait [#allocation4], 32  }
0x2fcb   :  { %5576 = vsyncadd [#allocation4], 4294967264 }
0x2fcc   :  { %4175 = vsyncpa [#allocation3], 1 }
0x2fcd   :  { %4176 = vsyncpa [#allocation6], 1 }
0x2fce   :  { %4177 = vsyncpa [#allocation9], 1 }
0x2fcf   :  { %4178 = vsyncpa [#allocation4], 1 }

</bundles_post_ra>
